<compile_context>
chip_gen: v7x
topology: tpu7x:2x2x1
jax: 0.10.0
libtpu: 0.0.40
codegen_flags: <defaults>
</compile_context>

<pallas_src>
import numpy as np
import jax
import jax.numpy as jnp
from jax.experimental import pallas as pl
from jax.experimental.pallas import tpu as pltpu

H = 8              # nn.LSTM(lstm_input_size, 8)
FCN_OUT = 128      # last conv channels
BN_EPS = 1e-3      # module passes eps=0.001 to every BatchNorm1d
K1, K2, K3 = 8, 5, 3


# --------------------------------------------------------------------------
# Pallas kernel: one batch block of TB elements, fully in VMEM.
# --------------------------------------------------------------------------
def alstm_fcn_kernel(x_seq_ref, x_conv_ref,
                     w1_ref, sh1_ref, w2_ref, sh2_ref, w3_ref, sh3_ref,
                     wih_ref, whh_ref, bg_ref,
                     wq_ref, wk_ref, v_ref,
                     fcw_ctx_ref, fcw_fcn_ref, fcb_ref,
                     out_ref,
                     gx_ref, keys_ref):
    C = x_seq_ref.shape[0]            # LSTM sequence length (= input channels)
    tb = x_conv_ref.shape[0]          # batch tile
    L = x_conv_ref.shape[1]
    Lout1 = L - K1 + 1
    Lout2 = Lout1 - K2 + 1
    Lout3 = Lout2 - K3 + 1
    C1 = w1_ref.shape[2]              # 128
    C2 = w2_ref.shape[1]              # 256
    C3 = w3_ref.shape[1]              # 128

    # ---------------- FCN branch: batched over TB, lane-dense channels ------
    xb = x_conv_ref[...]                                       # [TB, L, Cp] bf16
    cin = xb.shape[2]

    # conv1: tap loop (contraction = padded input channels), M = TB*Lout1.
    acc1 = jnp.zeros((tb * Lout1, C1), jnp.float32)
    for k in range(K1):
        acc1 = acc1 + jnp.dot(xb[:, k:k + Lout1, :].reshape(tb * Lout1, cin),
                              w1_ref[k], preferred_element_type=jnp.float32)
    h1 = jnp.maximum(acc1 + sh1_ref[...], 0.0)                 # bias+BN folded
    h1 = h1.reshape(tb, Lout1, C1).astype(jnp.bfloat16)

    # conv2: merged-tap im2col, one bf16 dot with contraction K2*128 = 640.
    slab2 = jnp.concatenate([h1[:, k:k + Lout2, :] for k in range(K2)],
                            axis=-1).reshape(tb * Lout2, K2 * C1)
    h2 = jnp.maximum(jnp.dot(slab2, w2_ref[...],
                             preferred_element_type=jnp.float32)
                     + sh2_ref[...], 0.0)
    h2 = h2.reshape(tb, Lout2, C2).astype(jnp.bfloat16)

    # conv3: merged-tap im2col, contraction K3*256 = 768.
    slab3 = jnp.concatenate([h2[:, k:k + Lout3, :] for k in range(K3)],
                            axis=-1).reshape(tb * Lout3, K3 * C2)
    h3 = jnp.maximum(jnp.dot(slab3, w3_ref[...],
                             preferred_element_type=jnp.float32)
                     + sh3_ref[...], 0.0)
    # global average pool over time -> lane-dense [TB, 128]
    x_fcn = jnp.mean(h3.reshape(tb, Lout3, C3), axis=1)

    # ---------------- LSTM branch (seq dim = C), batched over TB ------------
    # Input projections for all timesteps fused into one [C*TB, L]@[L,32] dot.
    gx_all = jnp.dot(x_seq_ref[...].reshape(C * tb, L), wih_ref[...],
                     preferred_element_type=jnp.float32) + bg_ref[...]
    gx_ref[...] = gx_all.reshape(C, tb, 4 * H)

    # Recurrent h@Whh as 8 VPU broadcast madds (MXU off the serial path).
    whh = whh_ref[...]
    whh_rows = [whh[i:i + 1, :] for i in range(H)]

    def lstm_body(t, carry):
        h_t, c_t = carry
        g = gx_ref[t]
        for i in range(H):
            g = g + h_t[:, i:i + 1] * whh_rows[i]
        # gate columns pre-permuted to [i | f | o | g]
        sg = jax.nn.sigmoid(g[:, 0:3 * H])
        gg = jnp.tanh(g[:, 3 * H:4 * H])
        c_n = sg[:, H:2 * H] * c_t + sg[:, 0:H] * gg
        h_n = sg[:, 2 * H:3 * H] * jnp.tanh(c_n)
        keys_ref[t] = h_n                                   # [TB, 8] scratch write
        return (h_n, c_n)

    z = jnp.zeros((tb, H), jnp.float32)
    h_last, _ = jax.lax.fori_loop(0, C, lstm_body, (z, z),
                                  unroll=(C if C <= 16 else 4))

    # ---------------- Bahdanau attention (softmax over seq dim C) -----------
    keys = keys_ref[...]                                      # [C, TB, 8]
    q = jnp.dot(h_last, wq_ref[...], preferred_element_type=jnp.float32)
    kk = jnp.dot(keys.reshape(C * tb, H), wk_ref[...],
                 preferred_element_type=jnp.float32).reshape(C, tb, H)
    energy = jnp.tanh(kk + q[None, :, :])                     # [C, TB, 8]
    scores = jnp.sum(energy * v_ref[...], axis=-1, keepdims=True)   # [C, TB, 1]
    m = jnp.max(scores, axis=0, keepdims=True)
    e = jnp.exp(scores - m)
    attn = e / jnp.sum(e, axis=0, keepdims=True)
    context = jnp.sum(keys * attn, axis=0)                    # [TB, 8]
    # lstm_dropout(p=0.8): eval-mode identity.

    # ---------------- Classifier: fc(concat(context, x_fcn)) ----------------
    logits = (jnp.dot(context, fcw_ctx_ref[...], preferred_element_type=jnp.float32)
              + jnp.dot(x_fcn, fcw_fcn_ref[...], preferred_element_type=jnp.float32)
              + fcb_ref[...])                                 # [TB, N_pad]
    out_ref[...] = logits


# --------------------------------------------------------------------------
# Wrapper: parameter folding / layout plumbing (plain JAX) + pallas_call
# --------------------------------------------------------------------------
def _pick_tb(B, L):
    """Batch tile: multiple of 8, up to 64, capped so the f32 conv2
    accumulator [TB*Lout2, 256] stays under ~6 MiB (VMEM-safe on v7x)."""
    lout2 = max(L - K1 - K2 + 2, 1)
    cap = max(8, ((6 * 1024 * 1024) // (lout2 * 256 * 4)) // 8 * 8)
    b8 = -(-B // 8) * 8
    return int(max(8, min(64, cap, b8)))


def alstm_fcn_forward(x, p):
    x = x.astype(jnp.float32)
    B, C, L = x.shape
    N = p["fc_w"].shape[0]
    assert L >= K1 + K2 + K3 - 2, "sequence length too short for the conv stack"

    TB = _pick_tb(B, L)
    B_pad = -(-B // TB) * TB
    N_pad = -(-N // 128) * 128
    C_pad = -(-C // 8) * 8            # pad conv input channels to >= 8

    # ---- fold conv bias + eval-mode BatchNorm into weights / shift ----
    def fold(w, b, g, beta, mean, var):
        scale = (g / jnp.sqrt(var + BN_EPS)).astype(jnp.float32)       # [Cout]
        shift = (beta - mean * scale + b * scale).astype(jnp.float32)  # [Cout]
        w_t = jnp.transpose(w, (2, 1, 0)).astype(jnp.float32) * scale  # [K,Cin,Cout]
        return w_t, shift[None, :]

    w1f, sh1 = fold(p["conv1_w"], p["conv1_b"], p["bn1_gamma"], p["bn1_beta"],
                    p["bn1_mean"], p["bn1_var"])
    w2f, sh2 = fold(p["conv2_w"], p["conv2_b"], p["bn2_gamma"], p["bn2_beta"],
                    p["bn2_mean"], p["bn2_var"])
    w3f, sh3 = fold(p["conv3_w"], p["conv3_b"], p["bn3_gamma"], p["bn3_beta"],
                    p["bn3_mean"], p["bn3_var"])
    # conv1 as taps (channel-padded); conv2/conv3 as merged-tap im2col weights.
    w1f = jnp.pad(w1f, ((0, 0), (0, C_pad - C), (0, 0))).astype(jnp.bfloat16)
    w2f = w2f.reshape(K2 * 128, 256).astype(jnp.bfloat16)
    w3f = w3f.reshape(K3 * 256, 128).astype(jnp.bfloat16)

    # ---- LSTM params: gate columns reordered [i|f|g|o] -> [i|f|o|g] ----
    perm = np.r_[0:H, H:2 * H, 3 * H:4 * H, 2 * H:3 * H]
    wih_t = p["lstm_w_ih"][perm].T.astype(jnp.float32)        # [L, 32]
    whh_t = p["lstm_w_hh"][perm].T.astype(jnp.float32)        # [8, 32]
    bg = (p["lstm_b_ih"] + p["lstm_b_hh"])[perm][None, :].astype(jnp.float32)

    wq_t = p["att_wq"].T.astype(jnp.float32)                  # [8, 8]
    wk_t = p["att_wk"].T.astype(jnp.float32)                  # [8, 8]
    v_row = p["att_v"].astype(jnp.float32)                    # [1, 8]

    fcw = jnp.pad(p["fc_w"].T.astype(jnp.float32), ((0, 0), (0, N_pad - N)))
    fcw_ctx, fcw_fcn = fcw[:H], fcw[H:]                       # [8,Np], [128,Np]
    fcb = jnp.pad(p["fc_b"].astype(jnp.float32), (0, N_pad - N))[None, :]

    # ---- inputs (no HBM im2col): [B,L,C] for the convs, [C,B,L] for the LSTM
    x_conv = jnp.pad(jnp.transpose(x, (0, 2, 1)),
                     ((0, B_pad - B), (0, 0), (0, C_pad - C))).astype(jnp.bfloat16)
    x_seq = jnp.pad(jnp.transpose(x, (1, 0, 2)),
                    ((0, 0), (0, B_pad - B), (0, 0)))         # [C, B_pad, L]

    params = (w1f, sh1, w2f, sh2, w3f, sh3, wih_t, whh_t, bg,
              wq_t, wk_t, v_row, fcw_ctx, fcw_fcn, fcb)

    def const_spec(a):
        nd = a.ndim
        return pl.BlockSpec(a.shape, lambda i: (0,) * nd)

    in_specs = [pl.BlockSpec((C, TB, L), lambda i: (0, i, 0)),
                pl.BlockSpec((TB, L, C_pad), lambda i: (i, 0, 0))]
    in_specs += [const_spec(a) for a in params]

    out = pl.pallas_call(
        alstm_fcn_kernel,
        out_shape=jax.ShapeDtypeStruct((B_pad, N_pad), jnp.float32),
        grid_spec=pltpu.PrefetchScalarGridSpec(
            num_scalar_prefetch=0,
            grid=(B_pad // TB,),
            in_specs=in_specs,
            out_specs=pl.BlockSpec((TB, N_pad), lambda i: (i, 0)),
            scratch_shapes=[pltpu.VMEM((C, TB, 4 * H), jnp.float32),   # gates_x
                            pltpu.VMEM((C, TB, H), jnp.float32)]),     # keys
        compiler_params=pltpu.CompilerParams(
            dimension_semantics=("parallel",),
            vmem_limit_bytes=64 * 1024 * 1024),
    )(x_seq, x_conv, *params)
    return out[:B, :N]


# --------------------------------------------------------------------------
# Deterministic parameter init (shapes from the PyTorch __init__)
# --------------------------------------------------------------------------
def init_params(key, input_size, lstm_input_size, num_classes):
    ks = jax.random.split(key, 32)
    r = lambda k, s, sc: jax.random.normal(k, s, jnp.float32) * sc
    p = {}
    p["conv1_w"] = r(ks[0], (128, input_size, 8), 0.2)
    p["conv1_b"] = r(ks[1], (128,), 0.1)
    p["conv2_w"] = r(ks[2], (256, 128, 5), 0.05)
    p["conv2_b"] = r(ks[3], (256,), 0.1)
    p["conv3_w"] = r(ks[4], (128, 256, 3), 0.05)
    p["conv3_b"] = r(ks[5], (128,), 0.1)
    for i, (c, k0) in enumerate(zip((128, 256, 128), (6, 10, 14)), start=1):
        p[f"bn{i}_gamma"] = 1.0 + 0.1 * jax.random.normal(ks[k0], (c,), jnp.float32)
        p[f"bn{i}_beta"] = 0.1 * jax.random.normal(ks[k0 + 1], (c,), jnp.float32)
        p[f"bn{i}_mean"] = 0.1 * jax.random.normal(ks[k0 + 2], (c,), jnp.float32)
        p[f"bn{i}_var"] = 1.0 + 0.5 * jax.random.uniform(ks[k0 + 3], (c,), jnp.float32)
    p["lstm_w_ih"] = r(ks[18], (4 * H, lstm_input_size), 0.2)
    p["lstm_w_hh"] = r(ks[19], (4 * H, H), 0.2)
    p["lstm_b_ih"] = r(ks[20], (4 * H,), 0.1)
    p["lstm_b_hh"] = r(ks[21], (4 * H,), 0.1)
    p["att_wq"] = r(ks[22], (H, H), 0.5)
    p["att_wk"] = r(ks[23], (H, H), 0.5)
    p["att_v"] = r(ks[24], (1, H), 0.5)
    p["fc_w"] = r(ks[25], (num_classes, H + FCN_OUT), 0.1)
    p["fc_b"] = r(ks[26], (num_classes,), 0.1)
    return p


# --------------------------------------------------------------------------
# Pure-numpy reference (eval-mode semantics) for a host-side sanity check
# --------------------------------------------------------------------------
def reference_forward(x, p):
    f64 = lambda a: np.asarray(a, dtype=np.float64)
    x = f64(x)
    B, C, L = x.shape

    def conv1d(h, w, b):
        Cout, Cin, K = w.shape
        Lout = h.shape[2] - K + 1
        out = np.zeros((h.shape[0], Cout, Lout))
        for k in range(K):
            out += np.einsum("oc,bcl->bol", w[:, :, k], h[:, :, k:k + Lout])
        return out + b[None, :, None]

    def bn(h, g, b, m, v):
        return (h - m[None, :, None]) / np.sqrt(v[None, :, None] + BN_EPS) \
            * g[None, :, None] + b[None, :, None]

    h = x
    for i, wk in zip((1, 2, 3), ("conv1", "conv2", "conv3")):
        h = conv1d(h, f64(p[f"{wk}_w"]), f64(p[f"{wk}_b"]))
        h = bn(h, f64(p[f"bn{i}_gamma"]), f64(p[f"bn{i}_beta"]),
               f64(p[f"bn{i}_mean"]), f64(p[f"bn{i}_var"]))
        h = np.maximum(h, 0.0)
    x_fcn = h.mean(axis=2)                                  # [B, 128]

    xs = np.transpose(x, (1, 0, 2))                         # [C, B, L]
    w_ih, w_hh = f64(p["lstm_w_ih"]), f64(p["lstm_w_hh"])
    b_ih, b_hh = f64(p["lstm_b_ih"]), f64(p["lstm_b_hh"])
    sig = lambda z: 1.0 / (1.0 + np.exp(-z))
    h_t = np.zeros((B, H)); c_t = np.zeros((B, H)); outs = []
    for t in range(C):
        g = xs[t] @ w_ih.T + b_ih + h_t @ w_hh.T + b_hh
        i_g, f_g = sig(g[:, :H]), sig(g[:, H:2 * H])
        g_g, o_g = np.tanh(g[:, 2 * H:3 * H]), sig(g[:, 3 * H:])
        c_t = f_g * c_t + i_g * g_g
        h_t = o_g * np.tanh(c_t)
        outs.append(h_t)
    keys = np.stack(outs, axis=0)                           # [C, B, 8]

    query = h_t[None]                                       # [1, B, 8]
    energy = np.tanh(query @ f64(p["att_wq"]).T + keys @ f64(p["att_wk"]).T)
    scores = (energy @ f64(p["att_v"]).T)[..., 0]           # [C, B]
    e = np.exp(scores - scores.max(axis=0, keepdims=True))
    attn = e / e.sum(axis=0, keepdims=True)
    context = (keys * attn[:, :, None]).sum(axis=0)         # [B, 8]

    feat = np.concatenate([context, x_fcn], axis=1)         # [B, 136]
    return feat @ f64(p["fc_w"]).T + f64(p["fc_b"])[None]


# --------------------------------------------------------------------------
if __name__ == "__main__":
    B, C, L, NUM_CLASSES = 2, 4, 16, 5   # input_size=C, lstm_input_size=L
    key = jax.random.PRNGKey(0)
    kx, kp = jax.random.split(key)
    x = jax.random.normal(kx, (B, C, L), jnp.float32)
    params = init_params(kp, C, L, NUM_CLASSES)

    out = alstm_fcn_forward(x, params)
    out = jax.block_until_ready(out)

    ref = reference_forward(np.asarray(x), jax.tree_util.tree_map(np.asarray, params))
    assert out.shape == (B, NUM_CLASSES)
    assert np.allclose(np.asarray(out), ref, atol=5e-2, rtol=5e-2), (
        f"max abs diff {np.max(np.abs(np.asarray(out) - ref))}")
    print("KERNEL_OK")
</pallas_src>

<mosaic_0001>
module attributes {stable_mosaic.version = 11 : i64} {
  func.func @alstm_fcn_kernel(%arg0: i32, %arg1: memref<4x8x16xf32, #tpu.memory_space<vmem>>, %arg2: memref<8x16x8xbf16, #tpu.memory_space<vmem>>, %arg3: memref<8x8x128xbf16, #tpu.memory_space<vmem>>, %arg4: memref<1x128xf32, #tpu.memory_space<vmem>>, %arg5: memref<640x256xbf16, #tpu.memory_space<vmem>>, %arg6: memref<1x256xf32, #tpu.memory_space<vmem>>, %arg7: memref<768x128xbf16, #tpu.memory_space<vmem>>, %arg8: memref<1x128xf32, #tpu.memory_space<vmem>>, %arg9: memref<16x32xf32, #tpu.memory_space<vmem>>, %arg10: memref<8x32xf32, #tpu.memory_space<vmem>>, %arg11: memref<1x32xf32, #tpu.memory_space<vmem>>, %arg12: memref<8x8xf32, #tpu.memory_space<vmem>>, %arg13: memref<8x8xf32, #tpu.memory_space<vmem>>, %arg14: memref<1x8xf32, #tpu.memory_space<vmem>>, %arg15: memref<8x128xf32, #tpu.memory_space<vmem>>, %arg16: memref<128x128xf32, #tpu.memory_space<vmem>>, %arg17: memref<1x128xf32, #tpu.memory_space<vmem>>, %arg18: memref<8x128xf32, #tpu.memory_space<vmem>>, %arg19: memref<4x8x32xf32, #tpu.memory_space<vmem>>, %arg20: memref<4x8x8xf32, #tpu.memory_space<vmem>>) attributes {dimension_semantics = [#tpu.dimension_semantics<parallel>], iteration_bounds = array<i64: 1>, scalar_prefetch = 0 : i64, scratch_operands = 2 : i64, tpu.core_type = #tpu.core_type<tc>, window_params = [{transform_indices = @transform_0, window_bounds = array<i64: 4, 8, 16>}, {transform_indices = @transform_1, window_bounds = array<i64: 8, 16, 8>}, {pipeline_mode = #tpu.pipeline_mode<synchronous>, transform_indices = @transform_2, window_bounds = array<i64: 8, 8, 128>}, {pipeline_mode = #tpu.pipeline_mode<synchronous>, transform_indices = @transform_3, window_bounds = array<i64: 1, 128>}, {pipeline_mode = #tpu.pipeline_mode<synchronous>, transform_indices = @transform_4, window_bounds = array<i64: 640, 256>}, {pipeline_mode = #tpu.pipeline_mode<synchronous>, transform_indices = @transform_5, window_bounds = array<i64: 1, 256>}, {pipeline_mode = #tpu.pipeline_mode<synchronous>, transform_indices = @transform_6, window_bounds = array<i64: 768, 128>}, {pipeline_mode = #tpu.pipeline_mode<synchronous>, transform_indices = @transform_7, window_bounds = array<i64: 1, 128>}, {pipeline_mode = #tpu.pipeline_mode<synchronous>, transform_indices = @transform_8, window_bounds = array<i64: 16, 32>}, {pipeline_mode = #tpu.pipeline_mode<synchronous>, transform_indices = @transform_9, window_bounds = array<i64: 8, 32>}, {pipeline_mode = #tpu.pipeline_mode<synchronous>, transform_indices = @transform_10, window_bounds = array<i64: 1, 32>}, {pipeline_mode = #tpu.pipeline_mode<synchronous>, transform_indices = @transform_11, window_bounds = array<i64: 8, 8>}, {pipeline_mode = #tpu.pipeline_mode<synchronous>, transform_indices = @transform_12, window_bounds = array<i64: 8, 8>}, {pipeline_mode = #tpu.pipeline_mode<synchronous>, transform_indices = @transform_13, window_bounds = array<i64: 1, 8>}, {pipeline_mode = #tpu.pipeline_mode<synchronous>, transform_indices = @transform_14, window_bounds = array<i64: 8, 128>}, {pipeline_mode = #tpu.pipeline_mode<synchronous>, transform_indices = @transform_15, window_bounds = array<i64: 128, 128>}, {pipeline_mode = #tpu.pipeline_mode<synchronous>, transform_indices = @transform_16, window_bounds = array<i64: 1, 128>}, {transform_indices = @transform_17, window_bounds = array<i64: 8, 128>}]} {
    %c0 = arith.constant 0 : index
    %c0_0 = arith.constant 0 : index
    %c0_1 = arith.constant 0 : index
    %0 = vector.load %arg2[%c0, %c0_0, %c0_1] : memref<8x16x8xbf16, #tpu.memory_space<vmem>>, vector<8x16x8xbf16>
    %cst = arith.constant 0.000000e+00 : f32
    %1 = vector.broadcast %cst : f32 to vector<72x128xf32>
    %2 = vector.extract_strided_slice %0 {offsets = [0, 0, 0], sizes = [8, 9, 8], strides = [1, 1, 1]} : vector<8x16x8xbf16> to vector<8x9x8xbf16>
    %3 = vector.shape_cast %2 : vector<8x9x8xbf16> to vector<72x8xbf16>
    %c0_2 = arith.constant 0 : index
    %c0_3 = arith.constant 0 : index
    %c0_4 = arith.constant 0 : index
    %4 = vector.load %arg3[%c0_2, %c0_3, %c0_4] : memref<8x8x128xbf16, #tpu.memory_space<vmem>>, vector<1x8x128xbf16>
    %5 = vector.shape_cast %4 : vector<1x8x128xbf16> to vector<8x128xbf16>
    %cst_5 = arith.constant dense<0.000000e+00> : vector<72x128xf32>
    %6 = tpu.matmul %3, %5, %cst_5 {dimension_numbers = #tpu.dot_dimension_numbers<[1], [0], [0], [1], [0, 0, 1, 1], [], []>} : vector<72x8xbf16>, vector<8x128xbf16>, vector<72x128xf32> -> vector<72x128xf32>
    %7 = arith.addf %1, %6 : vector<72x128xf32>
    %8 = vector.extract_strided_slice %0 {offsets = [0, 1, 0], sizes = [8, 9, 8], strides = [1, 1, 1]} : vector<8x16x8xbf16> to vector<8x9x8xbf16>
    %9 = vector.shape_cast %8 : vector<8x9x8xbf16> to vector<72x8xbf16>
    %c1 = arith.constant 1 : index
    %c0_6 = arith.constant 0 : index
    %c0_7 = arith.constant 0 : index
    %10 = vector.load %arg3[%c1, %c0_6, %c0_7] : memref<8x8x128xbf16, #tpu.memory_space<vmem>>, vector<1x8x128xbf16>
    %11 = vector.shape_cast %10 : vector<1x8x128xbf16> to vector<8x128xbf16>
    %cst_8 = arith.constant dense<0.000000e+00> : vector<72x128xf32>
    %12 = tpu.matmul %9, %11, %cst_8 {dimension_numbers = #tpu.dot_dimension_numbers<[1], [0], [0], [1], [0, 0, 1, 1], [], []>} : vector<72x8xbf16>, vector<8x128xbf16>, vector<72x128xf32> -> vector<72x128xf32>
    %13 = arith.addf %7, %12 : vector<72x128xf32>
    %14 = vector.extract_strided_slice %0 {offsets = [0, 2, 0], sizes = [8, 9, 8], strides = [1, 1, 1]} : vector<8x16x8xbf16> to vector<8x9x8xbf16>
    %15 = vector.shape_cast %14 : vector<8x9x8xbf16> to vector<72x8xbf16>
    %c2 = arith.constant 2 : index
    %c0_9 = arith.constant 0 : index
    %c0_10 = arith.constant 0 : index
    %16 = vector.load %arg3[%c2, %c0_9, %c0_10] : memref<8x8x128xbf16, #tpu.memory_space<vmem>>, vector<1x8x128xbf16>
    %17 = vector.shape_cast %16 : vector<1x8x128xbf16> to vector<8x128xbf16>
    %cst_11 = arith.constant dense<0.000000e+00> : vector<72x128xf32>
    %18 = tpu.matmul %15, %17, %cst_11 {dimension_numbers = #tpu.dot_dimension_numbers<[1], [0], [0], [1], [0, 0, 1, 1], [], []>} : vector<72x8xbf16>, vector<8x128xbf16>, vector<72x128xf32> -> vector<72x128xf32>
    %19 = arith.addf %13, %18 : vector<72x128xf32>
    %20 = vector.extract_strided_slice %0 {offsets = [0, 3, 0], sizes = [8, 9, 8], strides = [1, 1, 1]} : vector<8x16x8xbf16> to vector<8x9x8xbf16>
    %21 = vector.shape_cast %20 : vector<8x9x8xbf16> to vector<72x8xbf16>
    %c3 = arith.constant 3 : index
    %c0_12 = arith.constant 0 : index
    %c0_13 = arith.constant 0 : index
    %22 = vector.load %arg3[%c3, %c0_12, %c0_13] : memref<8x8x128xbf16, #tpu.memory_space<vmem>>, vector<1x8x128xbf16>
    %23 = vector.shape_cast %22 : vector<1x8x128xbf16> to vector<8x128xbf16>
    %cst_14 = arith.constant dense<0.000000e+00> : vector<72x128xf32>
    %24 = tpu.matmul %21, %23, %cst_14 {dimension_numbers = #tpu.dot_dimension_numbers<[1], [0], [0], [1], [0, 0, 1, 1], [], []>} : vector<72x8xbf16>, vector<8x128xbf16>, vector<72x128xf32> -> vector<72x128xf32>
    %25 = arith.addf %19, %24 : vector<72x128xf32>
    %26 = vector.extract_strided_slice %0 {offsets = [0, 4, 0], sizes = [8, 9, 8], strides = [1, 1, 1]} : vector<8x16x8xbf16> to vector<8x9x8xbf16>
    %27 = vector.shape_cast %26 : vector<8x9x8xbf16> to vector<72x8xbf16>
    %c4 = arith.constant 4 : index
    %c0_15 = arith.constant 0 : index
    %c0_16 = arith.constant 0 : index
    %28 = vector.load %arg3[%c4, %c0_15, %c0_16] : memref<8x8x128xbf16, #tpu.memory_space<vmem>>, vector<1x8x128xbf16>
    %29 = vector.shape_cast %28 : vector<1x8x128xbf16> to vector<8x128xbf16>
    %cst_17 = arith.constant dense<0.000000e+00> : vector<72x128xf32>
    %30 = tpu.matmul %27, %29, %cst_17 {dimension_numbers = #tpu.dot_dimension_numbers<[1], [0], [0], [1], [0, 0, 1, 1], [], []>} : vector<72x8xbf16>, vector<8x128xbf16>, vector<72x128xf32> -> vector<72x128xf32>
    %31 = arith.addf %25, %30 : vector<72x128xf32>
    %32 = vector.extract_strided_slice %0 {offsets = [0, 5, 0], sizes = [8, 9, 8], strides = [1, 1, 1]} : vector<8x16x8xbf16> to vector<8x9x8xbf16>
    %33 = vector.shape_cast %32 : vector<8x9x8xbf16> to vector<72x8xbf16>
    %c5 = arith.constant 5 : index
    %c0_18 = arith.constant 0 : index
    %c0_19 = arith.constant 0 : index
    %34 = vector.load %arg3[%c5, %c0_18, %c0_19] : memref<8x8x128xbf16, #tpu.memory_space<vmem>>, vector<1x8x128xbf16>
    %35 = vector.shape_cast %34 : vector<1x8x128xbf16> to vector<8x128xbf16>
    %cst_20 = arith.constant dense<0.000000e+00> : vector<72x128xf32>
    %36 = tpu.matmul %33, %35, %cst_20 {dimension_numbers = #tpu.dot_dimension_numbers<[1], [0], [0], [1], [0, 0, 1, 1], [], []>} : vector<72x8xbf16>, vector<8x128xbf16>, vector<72x128xf32> -> vector<72x128xf32>
    %37 = arith.addf %31, %36 : vector<72x128xf32>
    %38 = vector.extract_strided_slice %0 {offsets = [0, 6, 0], sizes = [8, 9, 8], strides = [1, 1, 1]} : vector<8x16x8xbf16> to vector<8x9x8xbf16>
    %39 = vector.shape_cast %38 : vector<8x9x8xbf16> to vector<72x8xbf16>
    %c6 = arith.constant 6 : index
    %c0_21 = arith.constant 0 : index
    %c0_22 = arith.constant 0 : index
    %40 = vector.load %arg3[%c6, %c0_21, %c0_22] : memref<8x8x128xbf16, #tpu.memory_space<vmem>>, vector<1x8x128xbf16>
    %41 = vector.shape_cast %40 : vector<1x8x128xbf16> to vector<8x128xbf16>
    %cst_23 = arith.constant dense<0.000000e+00> : vector<72x128xf32>
    %42 = tpu.matmul %39, %41, %cst_23 {dimension_numbers = #tpu.dot_dimension_numbers<[1], [0], [0], [1], [0, 0, 1, 1], [], []>} : vector<72x8xbf16>, vector<8x128xbf16>, vector<72x128xf32> -> vector<72x128xf32>
    %43 = arith.addf %37, %42 : vector<72x128xf32>
    %44 = vector.extract_strided_slice %0 {offsets = [0, 7, 0], sizes = [8, 9, 8], strides = [1, 1, 1]} : vector<8x16x8xbf16> to vector<8x9x8xbf16>
    %45 = vector.shape_cast %44 : vector<8x9x8xbf16> to vector<72x8xbf16>
    %c7 = arith.constant 7 : index
    %c0_24 = arith.constant 0 : index
    %c0_25 = arith.constant 0 : index
    %46 = vector.load %arg3[%c7, %c0_24, %c0_25] : memref<8x8x128xbf16, #tpu.memory_space<vmem>>, vector<1x8x128xbf16>
    %47 = vector.shape_cast %46 : vector<1x8x128xbf16> to vector<8x128xbf16>
    %cst_26 = arith.constant dense<0.000000e+00> : vector<72x128xf32>
    %48 = tpu.matmul %45, %47, %cst_26 {dimension_numbers = #tpu.dot_dimension_numbers<[1], [0], [0], [1], [0, 0, 1, 1], [], []>} : vector<72x8xbf16>, vector<8x128xbf16>, vector<72x128xf32> -> vector<72x128xf32>
    %49 = arith.addf %43, %48 : vector<72x128xf32>
    %c0_27 = arith.constant 0 : index
    %c0_28 = arith.constant 0 : index
    %50 = vector.load %arg4[%c0_27, %c0_28] : memref<1x128xf32, #tpu.memory_space<vmem>>, vector<1x128xf32>
    %51 = vector.broadcast %50 : vector<1x128xf32> to vector<72x128xf32>
    %52 = arith.addf %49, %51 : vector<72x128xf32>
    %cst_29 = arith.constant 0.000000e+00 : f32
    %53 = vector.broadcast %cst_29 : f32 to vector<72x128xf32>
    %54 = arith.maximumf %52, %53 : vector<72x128xf32>
    %55 = vector.shape_cast %54 : vector<72x128xf32> to vector<8x9x128xf32>
    %56 = arith.truncf %55 : vector<8x9x128xf32> to vector<8x9x128xbf16>
    %57 = vector.extract_strided_slice %56 {offsets = [0, 0, 0], sizes = [8, 5, 128], strides = [1, 1, 1]} : vector<8x9x128xbf16> to vector<8x5x128xbf16>
    %58 = vector.extract_strided_slice %56 {offsets = [0, 1, 0], sizes = [8, 5, 128], strides = [1, 1, 1]} : vector<8x9x128xbf16> to vector<8x5x128xbf16>
    %59 = vector.extract_strided_slice %56 {offsets = [0, 2, 0], sizes = [8, 5, 128], strides = [1, 1, 1]} : vector<8x9x128xbf16> to vector<8x5x128xbf16>
    %60 = vector.extract_strided_slice %56 {offsets = [0, 3, 0], sizes = [8, 5, 128], strides = [1, 1, 1]} : vector<8x9x128xbf16> to vector<8x5x128xbf16>
    %61 = vector.extract_strided_slice %56 {offsets = [0, 4, 0], sizes = [8, 5, 128], strides = [1, 1, 1]} : vector<8x9x128xbf16> to vector<8x5x128xbf16>
    %62 = tpu.concatenate %57, %58, %59, %60, %61 in 2 : vector<8x5x128xbf16>, vector<8x5x128xbf16>, vector<8x5x128xbf16>, vector<8x5x128xbf16>, vector<8x5x128xbf16> -> vector<8x5x640xbf16>
    %63 = vector.shape_cast %62 : vector<8x5x640xbf16> to vector<40x640xbf16>
    %c0_30 = arith.constant 0 : index
    %c0_31 = arith.constant 0 : index
    %64 = vector.load %arg5[%c0_30, %c0_31] : memref<640x256xbf16, #tpu.memory_space<vmem>>, vector<640x256xbf16>
    %cst_32 = arith.constant dense<0.000000e+00> : vector<40x256xf32>
    %65 = tpu.matmul %63, %64, %cst_32 {dimension_numbers = #tpu.dot_dimension_numbers<[1], [0], [0], [1], [0, 0, 1, 1], [], []>} : vector<40x640xbf16>, vector<640x256xbf16>, vector<40x256xf32> -> vector<40x256xf32>
    %c0_33 = arith.constant 0 : index
    %c0_34 = arith.constant 0 : index
    %66 = vector.load %arg6[%c0_33, %c0_34] : memref<1x256xf32, #tpu.memory_space<vmem>>, vector<1x256xf32>
    %67 = vector.broadcast %66 : vector<1x256xf32> to vector<40x256xf32>
    %68 = arith.addf %65, %67 : vector<40x256xf32>
    %cst_35 = arith.constant 0.000000e+00 : f32
    %69 = vector.broadcast %cst_35 : f32 to vector<40x256xf32>
    %70 = arith.maximumf %68, %69 : vector<40x256xf32>
    %71 = vector.shape_cast %70 : vector<40x256xf32> to vector<8x5x256xf32>
    %72 = arith.truncf %71 : vector<8x5x256xf32> to vector<8x5x256xbf16>
    %73 = vector.extract_strided_slice %72 {offsets = [0, 0, 0], sizes = [8, 3, 256], strides = [1, 1, 1]} : vector<8x5x256xbf16> to vector<8x3x256xbf16>
    %74 = vector.extract_strided_slice %72 {offsets = [0, 1, 0], sizes = [8, 3, 256], strides = [1, 1, 1]} : vector<8x5x256xbf16> to vector<8x3x256xbf16>
    %75 = vector.extract_strided_slice %72 {offsets = [0, 2, 0], sizes = [8, 3, 256], strides = [1, 1, 1]} : vector<8x5x256xbf16> to vector<8x3x256xbf16>
    %76 = tpu.concatenate %73, %74, %75 in 2 : vector<8x3x256xbf16>, vector<8x3x256xbf16>, vector<8x3x256xbf16> -> vector<8x3x768xbf16>
    %77 = vector.shape_cast %76 : vector<8x3x768xbf16> to vector<24x768xbf16>
    %c0_36 = arith.constant 0 : index
    %c0_37 = arith.constant 0 : index
    %78 = vector.load %arg7[%c0_36, %c0_37] : memref<768x128xbf16, #tpu.memory_space<vmem>>, vector<768x128xbf16>
    %cst_38 = arith.constant dense<0.000000e+00> : vector<24x128xf32>
    %79 = tpu.matmul %77, %78, %cst_38 {dimension_numbers = #tpu.dot_dimension_numbers<[1], [0], [0], [1], [0, 0, 1, 1], [], []>} : vector<24x768xbf16>, vector<768x128xbf16>, vector<24x128xf32> -> vector<24x128xf32>
    %c0_39 = arith.constant 0 : index
    %c0_40 = arith.constant 0 : index
    %80 = vector.load %arg8[%c0_39, %c0_40] : memref<1x128xf32, #tpu.memory_space<vmem>>, vector<1x128xf32>
    %81 = vector.broadcast %80 : vector<1x128xf32> to vector<24x128xf32>
    %82 = arith.addf %79, %81 : vector<24x128xf32>
    %cst_41 = arith.constant 0.000000e+00 : f32
    %83 = vector.broadcast %cst_41 : f32 to vector<24x128xf32>
    %84 = arith.maximumf %82, %83 : vector<24x128xf32>
    %85 = vector.shape_cast %84 : vector<24x128xf32> to vector<8x3x128xf32>
    %cst_42 = arith.constant dense<0.000000e+00> : vector<8x128xf32>
    %86 = vector.multi_reduction <add>, %85, %cst_42 [1] : vector<8x3x128xf32> to vector<8x128xf32>
    %cst_43 = arith.constant 3.000000e+00 : f32
    %87 = vector.broadcast %cst_43 : f32 to vector<8x128xf32>
    %88 = arith.divf %86, %87 : vector<8x128xf32>
    %c0_44 = arith.constant 0 : index
    %c0_45 = arith.constant 0 : index
    %c0_46 = arith.constant 0 : index
    %89 = vector.load %arg1[%c0_44, %c0_45, %c0_46] : memref<4x8x16xf32, #tpu.memory_space<vmem>>, vector<4x8x16xf32>
    %90 = vector.shape_cast %89 : vector<4x8x16xf32> to vector<32x16xf32>
    %c0_47 = arith.constant 0 : index
    %c0_48 = arith.constant 0 : index
    %91 = vector.load %arg9[%c0_47, %c0_48] : memref<16x32xf32, #tpu.memory_space<vmem>>, vector<16x32xf32>
    %cst_49 = arith.constant dense<0.000000e+00> : vector<32x32xf32>
    %92 = tpu.matmul %90, %91, %cst_49 {dimension_numbers = #tpu.dot_dimension_numbers<[1], [0], [0], [1], [0, 0, 1, 1], [], []>} : vector<32x16xf32>, vector<16x32xf32>, vector<32x32xf32> -> vector<32x32xf32>
    %c0_50 = arith.constant 0 : index
    %c0_51 = arith.constant 0 : index
    %93 = vector.load %arg11[%c0_50, %c0_51] : memref<1x32xf32, #tpu.memory_space<vmem>>, vector<1x32xf32>
    %94 = vector.broadcast %93 : vector<1x32xf32> to vector<32x32xf32>
    %95 = arith.addf %92, %94 : vector<32x32xf32>
    %96 = vector.shape_cast %95 : vector<32x32xf32> to vector<4x8x32xf32>
    %c0_52 = arith.constant 0 : index
    %c0_53 = arith.constant 0 : index
    %c0_54 = arith.constant 0 : index
    %97 = vector.load %arg19[%c0_52, %c0_53, %c0_54] : memref<4x8x32xf32, #tpu.memory_space<vmem>>, vector<4x8x32xf32>
    tpu.vector_store %arg19[%c0_52, %c0_53, %c0_54], %96 {strides = array<i32>} : memref<4x8x32xf32, #tpu.memory_space<vmem>>, vector<4x8x32xf32>,
    %c0_55 = arith.constant 0 : index
    %c0_56 = arith.constant 0 : index
    %98 = vector.load %arg10[%c0_55, %c0_56] : memref<8x32xf32, #tpu.memory_space<vmem>>, vector<8x32xf32>
    %99 = vector.extract_strided_slice %98 {offsets = [0, 0], sizes = [1, 32], strides = [1, 1]} : vector<8x32xf32> to vector<1x32xf32>
    %100 = vector.extract_strided_slice %98 {offsets = [1, 0], sizes = [1, 32], strides = [1, 1]} : vector<8x32xf32> to vector<1x32xf32>
    %101 = vector.extract_strided_slice %98 {offsets = [2, 0], sizes = [1, 32], strides = [1, 1]} : vector<8x32xf32> to vector<1x32xf32>
    %102 = vector.extract_strided_slice %98 {offsets = [3, 0], sizes = [1, 32], strides = [1, 1]} : vector<8x32xf32> to vector<1x32xf32>
    %103 = vector.extract_strided_slice %98 {offsets = [4, 0], sizes = [1, 32], strides = [1, 1]} : vector<8x32xf32> to vector<1x32xf32>
    %104 = vector.extract_strided_slice %98 {offsets = [5, 0], sizes = [1, 32], strides = [1, 1]} : vector<8x32xf32> to vector<1x32xf32>
    %105 = vector.extract_strided_slice %98 {offsets = [6, 0], sizes = [1, 32], strides = [1, 1]} : vector<8x32xf32> to vector<1x32xf32>
    %106 = vector.extract_strided_slice %98 {offsets = [7, 0], sizes = [1, 32], strides = [1, 1]} : vector<8x32xf32> to vector<1x32xf32>
    %cst_57 = arith.constant 0.000000e+00 : f32
    %107 = vector.broadcast %cst_57 : f32 to vector<8x8xf32>
    %c0_i32 = arith.constant 0 : i32
    %108 = arith.index_cast %c0_i32 : i32 to index
    %c0_58 = arith.constant 0 : index
    %c0_59 = arith.constant 0 : index
    %109 = vector.load %arg19[%108, %c0_58, %c0_59] : memref<4x8x32xf32, #tpu.memory_space<vmem>>, vector<1x8x32xf32>
    %110 = vector.shape_cast %109 : vector<1x8x32xf32> to vector<8x32xf32>
    %111 = vector.extract_strided_slice %107 {offsets = [0, 0], sizes = [8, 1], strides = [1, 1]} : vector<8x8xf32> to vector<8x1xf32>
    %112 = vector.broadcast %111 : vector<8x1xf32> to vector<8x32xf32>
    %113 = vector.broadcast %99 : vector<1x32xf32> to vector<8x32xf32>
    %114 = arith.mulf %112, %113 : vector<8x32xf32>
    %115 = arith.addf %110, %114 : vector<8x32xf32>
    %116 = vector.extract_strided_slice %107 {offsets = [0, 1], sizes = [8, 1], strides = [1, 1]} : vector<8x8xf32> to vector<8x1xf32>
    %117 = vector.broadcast %116 : vector<8x1xf32> to vector<8x32xf32>
    %118 = vector.broadcast %100 : vector<1x32xf32> to vector<8x32xf32>
    %119 = arith.mulf %117, %118 : vector<8x32xf32>
    %120 = arith.addf %115, %119 : vector<8x32xf32>
    %121 = vector.extract_strided_slice %107 {offsets = [0, 2], sizes = [8, 1], strides = [1, 1]} : vector<8x8xf32> to vector<8x1xf32>
    %122 = vector.broadcast %121 : vector<8x1xf32> to vector<8x32xf32>
    %123 = vector.broadcast %101 : vector<1x32xf32> to vector<8x32xf32>
    %124 = arith.mulf %122, %123 : vector<8x32xf32>
    %125 = arith.addf %120, %124 : vector<8x32xf32>
    %126 = vector.extract_strided_slice %107 {offsets = [0, 3], sizes = [8, 1], strides = [1, 1]} : vector<8x8xf32> to vector<8x1xf32>
    %127 = vector.broadcast %126 : vector<8x1xf32> to vector<8x32xf32>
    %128 = vector.broadcast %102 : vector<1x32xf32> to vector<8x32xf32>
    %129 = arith.mulf %127, %128 : vector<8x32xf32>
    %130 = arith.addf %125, %129 : vector<8x32xf32>
    %131 = vector.extract_strided_slice %107 {offsets = [0, 4], sizes = [8, 1], strides = [1, 1]} : vector<8x8xf32> to vector<8x1xf32>
    %132 = vector.broadcast %131 : vector<8x1xf32> to vector<8x32xf32>
    %133 = vector.broadcast %103 : vector<1x32xf32> to vector<8x32xf32>
    %134 = arith.mulf %132, %133 : vector<8x32xf32>
    %135 = arith.addf %130, %134 : vector<8x32xf32>
    %136 = vector.extract_strided_slice %107 {offsets = [0, 5], sizes = [8, 1], strides = [1, 1]} : vector<8x8xf32> to vector<8x1xf32>
    %137 = vector.broadcast %136 : vector<8x1xf32> to vector<8x32xf32>
    %138 = vector.broadcast %104 : vector<1x32xf32> to vector<8x32xf32>
    %139 = arith.mulf %137, %138 : vector<8x32xf32>
    %140 = arith.addf %135, %139 : vector<8x32xf32>
    %141 = vector.extract_strided_slice %107 {offsets = [0, 6], sizes = [8, 1], strides = [1, 1]} : vector<8x8xf32> to vector<8x1xf32>
    %142 = vector.broadcast %141 : vector<8x1xf32> to vector<8x32xf32>
    %143 = vector.broadcast %105 : vector<1x32xf32> to vector<8x32xf32>
    %144 = arith.mulf %142, %143 : vector<8x32xf32>
    %145 = arith.addf %140, %144 : vector<8x32xf32>
    %146 = vector.extract_strided_slice %107 {offsets = [0, 7], sizes = [8, 1], strides = [1, 1]} : vector<8x8xf32> to vector<8x1xf32>
    %147 = vector.broadcast %146 : vector<8x1xf32> to vector<8x32xf32>
    %148 = vector.broadcast %106 : vector<1x32xf32> to vector<8x32xf32>
    %149 = arith.mulf %147, %148 : vector<8x32xf32>
    %150 = arith.addf %145, %149 : vector<8x32xf32>
    %151 = vector.extract_strided_slice %150 {offsets = [0, 0], sizes = [8, 24], strides = [1, 1]} : vector<8x32xf32> to vector<8x24xf32>
    %152 = arith.negf %151 : vector<8x24xf32>
    %153 = math.exp %152 : vector<8x24xf32>
    %cst_60 = arith.constant 1.000000e+00 : f32
    %154 = vector.broadcast %cst_60 : f32 to vector<8x24xf32>
    %155 = arith.addf %154, %153 : vector<8x24xf32>
    %156 = arith.divf %154, %155 : vector<8x24xf32>
    %157 = vector.extract_strided_slice %150 {offsets = [0, 24], sizes = [8, 8], strides = [1, 1]} : vector<8x32xf32> to vector<8x8xf32>
    %158 = math.tanh %157 : vector<8x8xf32>
    %159 = vector.extract_strided_slice %156 {offsets = [0, 8], sizes = [8, 8], strides = [1, 1]} : vector<8x24xf32> to vector<8x8xf32>
    %160 = arith.mulf %159, %107 : vector<8x8xf32>
    %161 = vector.extract_strided_slice %156 {offsets = [0, 0], sizes = [8, 8], strides = [1, 1]} : vector<8x24xf32> to vector<8x8xf32>
    %162 = arith.mulf %161, %158 : vector<8x8xf32>
    %163 = arith.addf %160, %162 : vector<8x8xf32>
    %164 = vector.extract_strided_slice %156 {offsets = [0, 16], sizes = [8, 8], strides = [1, 1]} : vector<8x24xf32> to vector<8x8xf32>
    %165 = math.tanh %163 : vector<8x8xf32>
    %166 = arith.mulf %164, %165 : vector<8x8xf32>
    %167 = arith.index_cast %c0_i32 : i32 to index
    %c0_61 = arith.constant 0 : index
    %c0_62 = arith.constant 0 : index
    %168 = vector.load %arg20[%167, %c0_61, %c0_62] : memref<4x8x8xf32, #tpu.memory_space<vmem>>, vector<1x8x8xf32>
    %169 = vector.shape_cast %168 : vector<1x8x8xf32> to vector<8x8xf32>
    %170 = vector.shape_cast %166 : vector<8x8xf32> to vector<1x8x8xf32>
    tpu.vector_store %arg20[%167, %c0_61, %c0_62], %170 {strides = array<i32>} : memref<4x8x8xf32, #tpu.memory_space<vmem>>, vector<1x8x8xf32>,
    %c1_i32 = arith.constant 1 : i32
    %171 = arith.index_cast %c1_i32 : i32 to index
    %c0_63 = arith.constant 0 : index
    %c0_64 = arith.constant 0 : index
    %172 = vector.load %arg19[%171, %c0_63, %c0_64] : memref<4x8x32xf32, #tpu.memory_space<vmem>>, vector<1x8x32xf32>
    %173 = vector.shape_cast %172 : vector<1x8x32xf32> to vector<8x32xf32>
    %174 = vector.extract_strided_slice %166 {offsets = [0, 0], sizes = [8, 1], strides = [1, 1]} : vector<8x8xf32> to vector<8x1xf32>
    %175 = vector.broadcast %174 : vector<8x1xf32> to vector<8x32xf32>
    %176 = vector.broadcast %99 : vector<1x32xf32> to vector<8x32xf32>
    %177 = arith.mulf %175, %176 : vector<8x32xf32>
    %178 = arith.addf %173, %177 : vector<8x32xf32>
    %179 = vector.extract_strided_slice %166 {offsets = [0, 1], sizes = [8, 1], strides = [1, 1]} : vector<8x8xf32> to vector<8x1xf32>
    %180 = vector.broadcast %179 : vector<8x1xf32> to vector<8x32xf32>
    %181 = vector.broadcast %100 : vector<1x32xf32> to vector<8x32xf32>
    %182 = arith.mulf %180, %181 : vector<8x32xf32>
    %183 = arith.addf %178, %182 : vector<8x32xf32>
    %184 = vector.extract_strided_slice %166 {offsets = [0, 2], sizes = [8, 1], strides = [1, 1]} : vector<8x8xf32> to vector<8x1xf32>
    %185 = vector.broadcast %184 : vector<8x1xf32> to vector<8x32xf32>
    %186 = vector.broadcast %101 : vector<1x32xf32> to vector<8x32xf32>
    %187 = arith.mulf %185, %186 : vector<8x32xf32>
    %188 = arith.addf %183, %187 : vector<8x32xf32>
    %189 = vector.extract_strided_slice %166 {offsets = [0, 3], sizes = [8, 1], strides = [1, 1]} : vector<8x8xf32> to vector<8x1xf32>
    %190 = vector.broadcast %189 : vector<8x1xf32> to vector<8x32xf32>
    %191 = vector.broadcast %102 : vector<1x32xf32> to vector<8x32xf32>
    %192 = arith.mulf %190, %191 : vector<8x32xf32>
    %193 = arith.addf %188, %192 : vector<8x32xf32>
    %194 = vector.extract_strided_slice %166 {offsets = [0, 4], sizes = [8, 1], strides = [1, 1]} : vector<8x8xf32> to vector<8x1xf32>
    %195 = vector.broadcast %194 : vector<8x1xf32> to vector<8x32xf32>
    %196 = vector.broadcast %103 : vector<1x32xf32> to vector<8x32xf32>
    %197 = arith.mulf %195, %196 : vector<8x32xf32>
    %198 = arith.addf %193, %197 : vector<8x32xf32>
    %199 = vector.extract_strided_slice %166 {offsets = [0, 5], sizes = [8, 1], strides = [1, 1]} : vector<8x8xf32> to vector<8x1xf32>
    %200 = vector.broadcast %199 : vector<8x1xf32> to vector<8x32xf32>
    %201 = vector.broadcast %104 : vector<1x32xf32> to vector<8x32xf32>
    %202 = arith.mulf %200, %201 : vector<8x32xf32>
    %203 = arith.addf %198, %202 : vector<8x32xf32>
    %204 = vector.extract_strided_slice %166 {offsets = [0, 6], sizes = [8, 1], strides = [1, 1]} : vector<8x8xf32> to vector<8x1xf32>
    %205 = vector.broadcast %204 : vector<8x1xf32> to vector<8x32xf32>
    %206 = vector.broadcast %105 : vector<1x32xf32> to vector<8x32xf32>
    %207 = arith.mulf %205, %206 : vector<8x32xf32>
    %208 = arith.addf %203, %207 : vector<8x32xf32>
    %209 = vector.extract_strided_slice %166 {offsets = [0, 7], sizes = [8, 1], strides = [1, 1]} : vector<8x8xf32> to vector<8x1xf32>
    %210 = vector.broadcast %209 : vector<8x1xf32> to vector<8x32xf32>
    %211 = vector.broadcast %106 : vector<1x32xf32> to vector<8x32xf32>
    %212 = arith.mulf %210, %211 : vector<8x32xf32>
    %213 = arith.addf %208, %212 : vector<8x32xf32>
    %214 = vector.extract_strided_slice %213 {offsets = [0, 0], sizes = [8, 24], strides = [1, 1]} : vector<8x32xf32> to vector<8x24xf32>
    %215 = arith.negf %214 : vector<8x24xf32>
    %216 = math.exp %215 : vector<8x24xf32>
    %cst_65 = arith.constant 1.000000e+00 : f32
    %217 = vector.broadcast %cst_65 : f32 to vector<8x24xf32>
    %218 = arith.addf %217, %216 : vector<8x24xf32>
    %219 = arith.divf %217, %218 : vector<8x24xf32>
    %220 = vector.extract_strided_slice %213 {offsets = [0, 24], sizes = [8, 8], strides = [1, 1]} : vector<8x32xf32> to vector<8x8xf32>
    %221 = math.tanh %220 : vector<8x8xf32>
    %222 = vector.extract_strided_slice %219 {offsets = [0, 8], sizes = [8, 8], strides = [1, 1]} : vector<8x24xf32> to vector<8x8xf32>
    %223 = arith.mulf %222, %163 : vector<8x8xf32>
    %224 = vector.extract_strided_slice %219 {offsets = [0, 0], sizes = [8, 8], strides = [1, 1]} : vector<8x24xf32> to vector<8x8xf32>
    %225 = arith.mulf %224, %221 : vector<8x8xf32>
    %226 = arith.addf %223, %225 : vector<8x8xf32>
    %227 = vector.extract_strided_slice %219 {offsets = [0, 16], sizes = [8, 8], strides = [1, 1]} : vector<8x24xf32> to vector<8x8xf32>
    %228 = math.tanh %226 : vector<8x8xf32>
    %229 = arith.mulf %227, %228 : vector<8x8xf32>
    %230 = arith.index_cast %c1_i32 : i32 to index
    %c0_66 = arith.constant 0 : index
    %c0_67 = arith.constant 0 : index
    %231 = vector.load %arg20[%230, %c0_66, %c0_67] : memref<4x8x8xf32, #tpu.memory_space<vmem>>, vector<1x8x8xf32>
    %232 = vector.shape_cast %231 : vector<1x8x8xf32> to vector<8x8xf32>
    %233 = vector.shape_cast %229 : vector<8x8xf32> to vector<1x8x8xf32>
    tpu.vector_store %arg20[%230, %c0_66, %c0_67], %233 {strides = array<i32>} : memref<4x8x8xf32, #tpu.memory_space<vmem>>, vector<1x8x8xf32>,
    %c2_i32 = arith.constant 2 : i32
    %234 = arith.index_cast %c2_i32 : i32 to index
    %c0_68 = arith.constant 0 : index
    %c0_69 = arith.constant 0 : index
    %235 = vector.load %arg19[%234, %c0_68, %c0_69] : memref<4x8x32xf32, #tpu.memory_space<vmem>>, vector<1x8x32xf32>
    %236 = vector.shape_cast %235 : vector<1x8x32xf32> to vector<8x32xf32>
    %237 = vector.extract_strided_slice %229 {offsets = [0, 0], sizes = [8, 1], strides = [1, 1]} : vector<8x8xf32> to vector<8x1xf32>
    %238 = vector.broadcast %237 : vector<8x1xf32> to vector<8x32xf32>
    %239 = vector.broadcast %99 : vector<1x32xf32> to vector<8x32xf32>
    %240 = arith.mulf %238, %239 : vector<8x32xf32>
    %241 = arith.addf %236, %240 : vector<8x32xf32>
    %242 = vector.extract_strided_slice %229 {offsets = [0, 1], sizes = [8, 1], strides = [1, 1]} : vector<8x8xf32> to vector<8x1xf32>
    %243 = vector.broadcast %242 : vector<8x1xf32> to vector<8x32xf32>
    %244 = vector.broadcast %100 : vector<1x32xf32> to vector<8x32xf32>
    %245 = arith.mulf %243, %244 : vector<8x32xf32>
    %246 = arith.addf %241, %245 : vector<8x32xf32>
    %247 = vector.extract_strided_slice %229 {offsets = [0, 2], sizes = [8, 1], strides = [1, 1]} : vector<8x8xf32> to vector<8x1xf32>
    %248 = vector.broadcast %247 : vector<8x1xf32> to vector<8x32xf32>
    %249 = vector.broadcast %101 : vector<1x32xf32> to vector<8x32xf32>
    %250 = arith.mulf %248, %249 : vector<8x32xf32>
    %251 = arith.addf %246, %250 : vector<8x32xf32>
    %252 = vector.extract_strided_slice %229 {offsets = [0, 3], sizes = [8, 1], strides = [1, 1]} : vector<8x8xf32> to vector<8x1xf32>
    %253 = vector.broadcast %252 : vector<8x1xf32> to vector<8x32xf32>
    %254 = vector.broadcast %102 : vector<1x32xf32> to vector<8x32xf32>
    %255 = arith.mulf %253, %254 : vector<8x32xf32>
    %256 = arith.addf %251, %255 : vector<8x32xf32>
    %257 = vector.extract_strided_slice %229 {offsets = [0, 4], sizes = [8, 1], strides = [1, 1]} : vector<8x8xf32> to vector<8x1xf32>
    %258 = vector.broadcast %257 : vector<8x1xf32> to vector<8x32xf32>
    %259 = vector.broadcast %103 : vector<1x32xf32> to vector<8x32xf32>
    %260 = arith.mulf %258, %259 : vector<8x32xf32>
    %261 = arith.addf %256, %260 : vector<8x32xf32>
    %262 = vector.extract_strided_slice %229 {offsets = [0, 5], sizes = [8, 1], strides = [1, 1]} : vector<8x8xf32> to vector<8x1xf32>
    %263 = vector.broadcast %262 : vector<8x1xf32> to vector<8x32xf32>
    %264 = vector.broadcast %104 : vector<1x32xf32> to vector<8x32xf32>
    %265 = arith.mulf %263, %264 : vector<8x32xf32>
    %266 = arith.addf %261, %265 : vector<8x32xf32>
    %267 = vector.extract_strided_slice %229 {offsets = [0, 6], sizes = [8, 1], strides = [1, 1]} : vector<8x8xf32> to vector<8x1xf32>
    %268 = vector.broadcast %267 : vector<8x1xf32> to vector<8x32xf32>
    %269 = vector.broadcast %105 : vector<1x32xf32> to vector<8x32xf32>
    %270 = arith.mulf %268, %269 : vector<8x32xf32>
    %271 = arith.addf %266, %270 : vector<8x32xf32>
    %272 = vector.extract_strided_slice %229 {offsets = [0, 7], sizes = [8, 1], strides = [1, 1]} : vector<8x8xf32> to vector<8x1xf32>
    %273 = vector.broadcast %272 : vector<8x1xf32> to vector<8x32xf32>
    %274 = vector.broadcast %106 : vector<1x32xf32> to vector<8x32xf32>
    %275 = arith.mulf %273, %274 : vector<8x32xf32>
    %276 = arith.addf %271, %275 : vector<8x32xf32>
    %277 = vector.extract_strided_slice %276 {offsets = [0, 0], sizes = [8, 24], strides = [1, 1]} : vector<8x32xf32> to vector<8x24xf32>
    %278 = arith.negf %277 : vector<8x24xf32>
    %279 = math.exp %278 : vector<8x24xf32>
    %cst_70 = arith.constant 1.000000e+00 : f32
    %280 = vector.broadcast %cst_70 : f32 to vector<8x24xf32>
    %281 = arith.addf %280, %279 : vector<8x24xf32>
    %282 = arith.divf %280, %281 : vector<8x24xf32>
    %283 = vector.extract_strided_slice %276 {offsets = [0, 24], sizes = [8, 8], strides = [1, 1]} : vector<8x32xf32> to vector<8x8xf32>
    %284 = math.tanh %283 : vector<8x8xf32>
    %285 = vector.extract_strided_slice %282 {offsets = [0, 8], sizes = [8, 8], strides = [1, 1]} : vector<8x24xf32> to vector<8x8xf32>
    %286 = arith.mulf %285, %226 : vector<8x8xf32>
    %287 = vector.extract_strided_slice %282 {offsets = [0, 0], sizes = [8, 8], strides = [1, 1]} : vector<8x24xf32> to vector<8x8xf32>
    %288 = arith.mulf %287, %284 : vector<8x8xf32>
    %289 = arith.addf %286, %288 : vector<8x8xf32>
    %290 = vector.extract_strided_slice %282 {offsets = [0, 16], sizes = [8, 8], strides = [1, 1]} : vector<8x24xf32> to vector<8x8xf32>
    %291 = math.tanh %289 : vector<8x8xf32>
    %292 = arith.mulf %290, %291 : vector<8x8xf32>
    %293 = arith.index_cast %c2_i32 : i32 to index
    %c0_71 = arith.constant 0 : index
    %c0_72 = arith.constant 0 : index
    %294 = vector.load %arg20[%293, %c0_71, %c0_72] : memref<4x8x8xf32, #tpu.memory_space<vmem>>, vector<1x8x8xf32>
    %295 = vector.shape_cast %294 : vector<1x8x8xf32> to vector<8x8xf32>
    %296 = vector.shape_cast %292 : vector<8x8xf32> to vector<1x8x8xf32>
    tpu.vector_store %arg20[%293, %c0_71, %c0_72], %296 {strides = array<i32>} : memref<4x8x8xf32, #tpu.memory_space<vmem>>, vector<1x8x8xf32>,
    %c3_i32 = arith.constant 3 : i32
    %297 = arith.index_cast %c3_i32 : i32 to index
    %c0_73 = arith.constant 0 : index
    %c0_74 = arith.constant 0 : index
    %298 = vector.load %arg19[%297, %c0_73, %c0_74] : memref<4x8x32xf32, #tpu.memory_space<vmem>>, vector<1x8x32xf32>
    %299 = vector.shape_cast %298 : vector<1x8x32xf32> to vector<8x32xf32>
    %300 = vector.extract_strided_slice %292 {offsets = [0, 0], sizes = [8, 1], strides = [1, 1]} : vector<8x8xf32> to vector<8x1xf32>
    %301 = vector.broadcast %300 : vector<8x1xf32> to vector<8x32xf32>
    %302 = vector.broadcast %99 : vector<1x32xf32> to vector<8x32xf32>
    %303 = arith.mulf %301, %302 : vector<8x32xf32>
    %304 = arith.addf %299, %303 : vector<8x32xf32>
    %305 = vector.extract_strided_slice %292 {offsets = [0, 1], sizes = [8, 1], strides = [1, 1]} : vector<8x8xf32> to vector<8x1xf32>
    %306 = vector.broadcast %305 : vector<8x1xf32> to vector<8x32xf32>
    %307 = vector.broadcast %100 : vector<1x32xf32> to vector<8x32xf32>
    %308 = arith.mulf %306, %307 : vector<8x32xf32>
    %309 = arith.addf %304, %308 : vector<8x32xf32>
    %310 = vector.extract_strided_slice %292 {offsets = [0, 2], sizes = [8, 1], strides = [1, 1]} : vector<8x8xf32> to vector<8x1xf32>
    %311 = vector.broadcast %310 : vector<8x1xf32> to vector<8x32xf32>
    %312 = vector.broadcast %101 : vector<1x32xf32> to vector<8x32xf32>
    %313 = arith.mulf %311, %312 : vector<8x32xf32>
    %314 = arith.addf %309, %313 : vector<8x32xf32>
    %315 = vector.extract_strided_slice %292 {offsets = [0, 3], sizes = [8, 1], strides = [1, 1]} : vector<8x8xf32> to vector<8x1xf32>
    %316 = vector.broadcast %315 : vector<8x1xf32> to vector<8x32xf32>
    %317 = vector.broadcast %102 : vector<1x32xf32> to vector<8x32xf32>
    %318 = arith.mulf %316, %317 : vector<8x32xf32>
    %319 = arith.addf %314, %318 : vector<8x32xf32>
    %320 = vector.extract_strided_slice %292 {offsets = [0, 4], sizes = [8, 1], strides = [1, 1]} : vector<8x8xf32> to vector<8x1xf32>
    %321 = vector.broadcast %320 : vector<8x1xf32> to vector<8x32xf32>
    %322 = vector.broadcast %103 : vector<1x32xf32> to vector<8x32xf32>
    %323 = arith.mulf %321, %322 : vector<8x32xf32>
    %324 = arith.addf %319, %323 : vector<8x32xf32>
    %325 = vector.extract_strided_slice %292 {offsets = [0, 5], sizes = [8, 1], strides = [1, 1]} : vector<8x8xf32> to vector<8x1xf32>
    %326 = vector.broadcast %325 : vector<8x1xf32> to vector<8x32xf32>
    %327 = vector.broadcast %104 : vector<1x32xf32> to vector<8x32xf32>
    %328 = arith.mulf %326, %327 : vector<8x32xf32>
    %329 = arith.addf %324, %328 : vector<8x32xf32>
    %330 = vector.extract_strided_slice %292 {offsets = [0, 6], sizes = [8, 1], strides = [1, 1]} : vector<8x8xf32> to vector<8x1xf32>
    %331 = vector.broadcast %330 : vector<8x1xf32> to vector<8x32xf32>
    %332 = vector.broadcast %105 : vector<1x32xf32> to vector<8x32xf32>
    %333 = arith.mulf %331, %332 : vector<8x32xf32>
    %334 = arith.addf %329, %333 : vector<8x32xf32>
    %335 = vector.extract_strided_slice %292 {offsets = [0, 7], sizes = [8, 1], strides = [1, 1]} : vector<8x8xf32> to vector<8x1xf32>
    %336 = vector.broadcast %335 : vector<8x1xf32> to vector<8x32xf32>
    %337 = vector.broadcast %106 : vector<1x32xf32> to vector<8x32xf32>
    %338 = arith.mulf %336, %337 : vector<8x32xf32>
    %339 = arith.addf %334, %338 : vector<8x32xf32>
    %340 = vector.extract_strided_slice %339 {offsets = [0, 0], sizes = [8, 24], strides = [1, 1]} : vector<8x32xf32> to vector<8x24xf32>
    %341 = arith.negf %340 : vector<8x24xf32>
    %342 = math.exp %341 : vector<8x24xf32>
    %cst_75 = arith.constant 1.000000e+00 : f32
    %343 = vector.broadcast %cst_75 : f32 to vector<8x24xf32>
    %344 = arith.addf %343, %342 : vector<8x24xf32>
    %345 = arith.divf %343, %344 : vector<8x24xf32>
    %346 = vector.extract_strided_slice %339 {offsets = [0, 24], sizes = [8, 8], strides = [1, 1]} : vector<8x32xf32> to vector<8x8xf32>
    %347 = math.tanh %346 : vector<8x8xf32>
    %348 = vector.extract_strided_slice %345 {offsets = [0, 8], sizes = [8, 8], strides = [1, 1]} : vector<8x24xf32> to vector<8x8xf32>
    %349 = arith.mulf %348, %289 : vector<8x8xf32>
    %350 = vector.extract_strided_slice %345 {offsets = [0, 0], sizes = [8, 8], strides = [1, 1]} : vector<8x24xf32> to vector<8x8xf32>
    %351 = arith.mulf %350, %347 : vector<8x8xf32>
    %352 = arith.addf %349, %351 : vector<8x8xf32>
    %353 = vector.extract_strided_slice %345 {offsets = [0, 16], sizes = [8, 8], strides = [1, 1]} : vector<8x24xf32> to vector<8x8xf32>
    %354 = math.tanh %352 : vector<8x8xf32>
    %355 = arith.mulf %353, %354 : vector<8x8xf32>
    %356 = arith.index_cast %c3_i32 : i32 to index
    %c0_76 = arith.constant 0 : index
    %c0_77 = arith.constant 0 : index
    %357 = vector.load %arg20[%356, %c0_76, %c0_77] : memref<4x8x8xf32, #tpu.memory_space<vmem>>, vector<1x8x8xf32>
    %358 = vector.shape_cast %357 : vector<1x8x8xf32> to vector<8x8xf32>
    %359 = vector.shape_cast %355 : vector<8x8xf32> to vector<1x8x8xf32>
    tpu.vector_store %arg20[%356, %c0_76, %c0_77], %359 {strides = array<i32>} : memref<4x8x8xf32, #tpu.memory_space<vmem>>, vector<1x8x8xf32>,
    %c4_i32 = arith.constant 4 : i32
    %c0_78 = arith.constant 0 : index
    %c0_79 = arith.constant 0 : index
    %c0_80 = arith.constant 0 : index
    %360 = vector.load %arg20[%c0_78, %c0_79, %c0_80] : memref<4x8x8xf32, #tpu.memory_space<vmem>>, vector<4x8x8xf32>
    %c0_81 = arith.constant 0 : index
    %c0_82 = arith.constant 0 : index
    %361 = vector.load %arg12[%c0_81, %c0_82] : memref<8x8xf32, #tpu.memory_space<vmem>>, vector<8x8xf32>
    %cst_83 = arith.constant dense<0.000000e+00> : vector<8x8xf32>
    %362 = tpu.matmul %355, %361, %cst_83 {dimension_numbers = #tpu.dot_dimension_numbers<[1], [0], [0], [1], [0, 0, 1, 1], [], []>} : vector<8x8xf32>, vector<8x8xf32>, vector<8x8xf32> -> vector<8x8xf32>
    %363 = vector.shape_cast %360 : vector<4x8x8xf32> to vector<32x8xf32>
    %c0_84 = arith.constant 0 : index
    %c0_85 = arith.constant 0 : index
    %364 = vector.load %arg13[%c0_84, %c0_85] : memref<8x8xf32, #tpu.memory_space<vmem>>, vector<8x8xf32>
    %cst_86 = arith.constant dense<0.000000e+00> : vector<32x8xf32>
    %365 = tpu.matmul %363, %364, %cst_86 {dimension_numbers = #tpu.dot_dimension_numbers<[1], [0], [0], [1], [0, 0, 1, 1], [], []>} : vector<32x8xf32>, vector<8x8xf32>, vector<32x8xf32> -> vector<32x8xf32>
    %366 = vector.shape_cast %365 : vector<32x8xf32> to vector<4x8x8xf32>
    %367 = vector.shape_cast %362 : vector<8x8xf32> to vector<1x8x8xf32>
    %368 = vector.broadcast %367 : vector<1x8x8xf32> to vector<4x8x8xf32>
    %369 = arith.addf %366, %368 : vector<4x8x8xf32>
    %370 = math.tanh %369 : vector<4x8x8xf32>
    %c0_87 = arith.constant 0 : index
    %c0_88 = arith.constant 0 : index
    %371 = vector.load %arg14[%c0_87, %c0_88] : memref<1x8xf32, #tpu.memory_space<vmem>>, vector<1x8xf32>
    %372 = vector.shape_cast %371 : vector<1x8xf32> to vector<1x1x8xf32>
    %373 = vector.broadcast %372 : vector<1x1x8xf32> to vector<4x8x8xf32>
    %374 = arith.mulf %370, %373 : vector<4x8x8xf32>
    %cst_89 = arith.constant dense<0.000000e+00> : vector<4x8xf32>
    %375 = vector.multi_reduction <add>, %374, %cst_89 [2] : vector<4x8x8xf32> to vector<4x8xf32>
    %376 = vector.shape_cast %375 : vector<4x8xf32> to vector<4x8x1xf32>
    %cst_90 = arith.constant dense<0xFF800000> : vector<8x1xf32>
    %377 = vector.multi_reduction <maximumf>, %376, %cst_90 [0] : vector<4x8x1xf32> to vector<8x1xf32>
    %378 = vector.shape_cast %377 : vector<8x1xf32> to vector<1x8x1xf32>
    %379 = vector.broadcast %378 : vector<1x8x1xf32> to vector<4x8x1xf32>
    %380 = arith.subf %376, %379 : vector<4x8x1xf32>
    %381 = math.exp %380 : vector<4x8x1xf32>
    %cst_91 = arith.constant dense<0.000000e+00> : vector<8x1xf32>
    %382 = vector.multi_reduction <add>, %381, %cst_91 [0] : vector<4x8x1xf32> to vector<8x1xf32>
    %383 = vector.shape_cast %382 : vector<8x1xf32> to vector<1x8x1xf32>
    %384 = vector.broadcast %383 : vector<1x8x1xf32> to vector<4x8x1xf32>
    %385 = arith.divf %381, %384 : vector<4x8x1xf32>
    %386 = vector.broadcast %385 : vector<4x8x1xf32> to vector<4x8x8xf32>
    %387 = arith.mulf %360, %386 : vector<4x8x8xf32>
    %cst_92 = arith.constant dense<0.000000e+00> : vector<8x8xf32>
    %388 = vector.multi_reduction <add>, %387, %cst_92 [0] : vector<4x8x8xf32> to vector<8x8xf32>
    %c0_93 = arith.constant 0 : index
    %c0_94 = arith.constant 0 : index
    %389 = vector.load %arg15[%c0_93, %c0_94] : memref<8x128xf32, #tpu.memory_space<vmem>>, vector<8x128xf32>
    %cst_95 = arith.constant dense<0.000000e+00> : vector<8x128xf32>
    %390 = tpu.matmul %388, %389, %cst_95 {dimension_numbers = #tpu.dot_dimension_numbers<[1], [0], [0], [1], [0, 0, 1, 1], [], []>} : vector<8x8xf32>, vector<8x128xf32>, vector<8x128xf32> -> vector<8x128xf32>
    %c0_96 = arith.constant 0 : index
    %c0_97 = arith.constant 0 : index
    %391 = vector.load %arg16[%c0_96, %c0_97] : memref<128x128xf32, #tpu.memory_space<vmem>>, vector<128x128xf32>
    %cst_98 = arith.constant dense<0.000000e+00> : vector<8x128xf32>
    %392 = tpu.matmul %88, %391, %cst_98 {dimension_numbers = #tpu.dot_dimension_numbers<[1], [0], [0], [1], [0, 0, 1, 1], [], []>} : vector<8x128xf32>, vector<128x128xf32>, vector<8x128xf32> -> vector<8x128xf32>
    %393 = arith.addf %390, %392 : vector<8x128xf32>
    %c0_99 = arith.constant 0 : index
    %c0_100 = arith.constant 0 : index
    %394 = vector.load %arg17[%c0_99, %c0_100] : memref<1x128xf32, #tpu.memory_space<vmem>>, vector<1x128xf32>
    %395 = vector.broadcast %394 : vector<1x128xf32> to vector<8x128xf32>
    %396 = arith.addf %393, %395 : vector<8x128xf32>
    %c0_101 = arith.constant 0 : index
    %c0_102 = arith.constant 0 : index
    %397 = vector.load %arg18[%c0_101, %c0_102] : memref<8x128xf32, #tpu.memory_space<vmem>>, vector<8x128xf32>
    tpu.vector_store %arg18[%c0_101, %c0_102], %396 {strides = array<i32>} : memref<8x128xf32, #tpu.memory_space<vmem>>, vector<8x128xf32>,
    return
  }
  func.func @transform_0(%arg0: i32) -> (i32, i32, i32) {
    %c0_i32 = arith.constant 0 : i32
    %c0_i32_0 = arith.constant 0 : i32
    %c0_i32_1 = arith.constant 0 : i32
    return %c0_i32, %arg0, %c0_i32_0 : i32, i32, i32
  }
  func.func @transform_1(%arg0: i32) -> (i32, i32, i32) {
    %c0_i32 = arith.constant 0 : i32
    %c0_i32_0 = arith.constant 0 : i32
    %c0_i32_1 = arith.constant 0 : i32
    return %arg0, %c0_i32, %c0_i32_0 : i32, i32, i32
  }
  func.func @transform_2(%arg0: i32) -> (i32, i32, i32) {
    %c0_i32 = arith.constant 0 : i32
    %c0_i32_0 = arith.constant 0 : i32
    %c0_i32_1 = arith.constant 0 : i32
    %c0_i32_2 = arith.constant 0 : i32
    return %c0_i32, %c0_i32_0, %c0_i32_1 : i32, i32, i32
  }
  func.func @transform_3(%arg0: i32) -> (i32, i32) {
    %c0_i32 = arith.constant 0 : i32
    %c0_i32_0 = arith.constant 0 : i32
    %c0_i32_1 = arith.constant 0 : i32
    return %c0_i32, %c0_i32_0 : i32, i32
  }
  func.func @transform_4(%arg0: i32) -> (i32, i32) {
    %c0_i32 = arith.constant 0 : i32
    %c0_i32_0 = arith.constant 0 : i32
    %c0_i32_1 = arith.constant 0 : i32
    return %c0_i32, %c0_i32_0 : i32, i32
  }
  func.func @transform_5(%arg0: i32) -> (i32, i32) {
    %c0_i32 = arith.constant 0 : i32
    %c0_i32_0 = arith.constant 0 : i32
    %c0_i32_1 = arith.constant 0 : i32
    return %c0_i32, %c0_i32_0 : i32, i32
  }
  func.func @transform_6(%arg0: i32) -> (i32, i32) {
    %c0_i32 = arith.constant 0 : i32
    %c0_i32_0 = arith.constant 0 : i32
    %c0_i32_1 = arith.constant 0 : i32
    return %c0_i32, %c0_i32_0 : i32, i32
  }
  func.func @transform_7(%arg0: i32) -> (i32, i32) {
    %c0_i32 = arith.constant 0 : i32
    %c0_i32_0 = arith.constant 0 : i32
    %c0_i32_1 = arith.constant 0 : i32
    return %c0_i32, %c0_i32_0 : i32, i32
  }
  func.func @transform_8(%arg0: i32) -> (i32, i32) {
    %c0_i32 = arith.constant 0 : i32
    %c0_i32_0 = arith.constant 0 : i32
    %c0_i32_1 = arith.constant 0 : i32
    return %c0_i32, %c0_i32_0 : i32, i32
  }
  func.func @transform_9(%arg0: i32) -> (i32, i32) {
    %c0_i32 = arith.constant 0 : i32
    %c0_i32_0 = arith.constant 0 : i32
    %c0_i32_1 = arith.constant 0 : i32
    return %c0_i32, %c0_i32_0 : i32, i32
  }
  func.func @transform_10(%arg0: i32) -> (i32, i32) {
    %c0_i32 = arith.constant 0 : i32
    %c0_i32_0 = arith.constant 0 : i32
    %c0_i32_1 = arith.constant 0 : i32
    return %c0_i32, %c0_i32_0 : i32, i32
  }
  func.func @transform_11(%arg0: i32) -> (i32, i32) {
    %c0_i32 = arith.constant 0 : i32
    %c0_i32_0 = arith.constant 0 : i32
    %c0_i32_1 = arith.constant 0 : i32
    return %c0_i32, %c0_i32_0 : i32, i32
  }
  func.func @transform_12(%arg0: i32) -> (i32, i32) {
    %c0_i32 = arith.constant 0 : i32
    %c0_i32_0 = arith.constant 0 : i32
    %c0_i32_1 = arith.constant 0 : i32
    return %c0_i32, %c0_i32_0 : i32, i32
  }
  func.func @transform_13(%arg0: i32) -> (i32, i32) {
    %c0_i32 = arith.constant 0 : i32
    %c0_i32_0 = arith.constant 0 : i32
    %c0_i32_1 = arith.constant 0 : i32
    return %c0_i32, %c0_i32_0 : i32, i32
  }
  func.func @transform_14(%arg0: i32) -> (i32, i32) {
    %c0_i32 = arith.constant 0 : i32
    %c0_i32_0 = arith.constant 0 : i32
    %c0_i32_1 = arith.constant 0 : i32
    return %c0_i32, %c0_i32_0 : i32, i32
  }
  func.func @transform_15(%arg0: i32) -> (i32, i32) {
    %c0_i32 = arith.constant 0 : i32
    %c0_i32_0 = arith.constant 0 : i32
    %c0_i32_1 = arith.constant 0 : i32
    return %c0_i32, %c0_i32_0 : i32, i32
  }
  func.func @transform_16(%arg0: i32) -> (i32, i32) {
    %c0_i32 = arith.constant 0 : i32
    %c0_i32_0 = arith.constant 0 : i32
    %c0_i32_1 = arith.constant 0 : i32
    return %c0_i32, %c0_i32_0 : i32, i32
  }
  func.func @transform_17(%arg0: i32) -> (i32, i32) {
    %c0_i32 = arith.constant 0 : i32
    %c0_i32_0 = arith.constant 0 : i32
    return %arg0, %c0_i32 : i32, i32
  }
}

</mosaic_0001>

<bundles_post_ra>
// kernel: tpu_custom_call.1
= control target key start
LH: loop header
LB: loop body
LE: loop exit
PB: predicated region body
PF: predicated region fallthrough
CT: control target
= control target key end

     0   :  { %s13760_s0 = inlined_call_operand.hbm [shape: f32[4,8,16], index: 0, kind: input, shape index: {}]   ;;  %s13761_s1 = inlined_call_operand.hbm [shape: bf16[8,16,8], index: 1, kind: input, shape index: {}]   ;;  %s13762_s2 = inlined_call_operand.hbm [shape: bf16[8,8,128], index: 2, kind: input, shape index: {}]   ;;  %s13763_s3 = inlined_call_operand.hbm [shape: f32[1,128], index: 3, kind: input, shape index: {}]   ;;  %s13764_s4 = inlined_call_operand.hbm [shape: bf16[640,256], index: 4, kind: input, shape index: {}]   ;;  %s13765_s5 = inlined_call_operand.hbm [shape: f32[1,256], index: 5, kind: input, shape index: {}]   ;;  %s13766_s6 = inlined_call_operand.hbm [shape: bf16[768,128], index: 6, kind: input, shape index: {}]   ;;  %s13767_s7 = inlined_call_operand.hbm [shape: f32[1,128], index: 7, kind: input, shape index: {}]   ;;  %s13768_s8 = inlined_call_operand.hbm [shape: f32[16,32], index: 8, kind: input, shape index: {}]   ;;  %s13769_s9 = inlined_call_operand.hbm [shape: f32[8,32], index: 9, kind: input, shape index: {}]   ;;  %s13770_s10 = inlined_call_operand.hbm [shape: f32[1,32], index: 10, kind: input, shape index: {}]   ;;  %s13771_s11 = inlined_call_operand.hbm [shape: f32[8,8], index: 11, kind: input, shape index: {}]   ;;  %s13772_s12 = inlined_call_operand.hbm [shape: f32[8,8], index: 12, kind: input, shape index: {}]   ;;  %s13773_s13 = inlined_call_operand.hbm [shape: f32[1,8], index: 13, kind: input, shape index: {}]   ;;  %s13774_s14 = inlined_call_operand.hbm [shape: f32[8,128], index: 14, kind: input, shape index: {}]   ;;  %s13775_s15 = inlined_call_operand.hbm [shape: f32[128,128], index: 15, kind: input, shape index: {}]   ;;  %s13776_s16 = inlined_call_operand.hbm [shape: f32[1,128], index: 16, kind: input, shape index: {}]   ;;  %s13777_s17 = inlined_call_operand.hbm [shape: f32[8,128], index: 17, kind: output, shape index: {}]  }
   0x1   :  { %13859 = sst [smem:[#allocation83_spill]] %s13760_s0 }
   0x2   :  { %13860 = sst [smem:[#allocation84_spill]] %s13761_s1 }
   0x3   :  { %13861 = sst [smem:[#allocation85_spill]] %s13776_s16 }
   0x4   :  { %13862 = sst [smem:[#allocation86_spill]] %s13777_s17 }
   0x5   :  { %22 = vsyncpa [#allocation5], 0 }
   0x6   :  { %23 = vsyncpa [#allocation8], 0 }
   0x7   :  { %24 = vsyncpa [#allocation11], 0 }
   0x8   :  { %25 = vsyncpa [#allocation14], 0 }
   0x9   :  { %26 = vsyncpa [#allocation17], 0 }
   0xa   :  { %27 = vsyncpa [#allocation20], 0 }
   0xb   :  { %28 = vsyncpa [#allocation23], 0 }
   0xc   :  { %29 = vsyncpa [#allocation26], 0 }
   0xd   :  { %30 = vsyncpa [#allocation29], 0 }
   0xe   :  { %31 = vsyncpa [#allocation6], 0  ;;  %s10917_s24 = smov [#allocation7]   ;;  %s13863_s28 = sld [smem:[#allocation84_spill]] }
   0xf   :  { %s49_s25 = sshll.u32 %s10917_s24, 4  ;;  %s50_s25 = int_to_ptr.vmem [resolvable:$true] %s49_s25 }
  0x14   :  { %s10501_s29 = scalar_lea.hbm %s13863_s28, 1024 }
  0x15   :  { %p10502_p0 = scmp.ne.s32.totalorder %s13863_s28, %s10501_s29  ;;  %p10505_p1 = scmp.lt.u32.totalorder %s10501_s29, %s13863_s28 }
  0x17   :  { %p10507_p2 = pnand %p10505_p1, %p10502_p0 }
  0x19   :  { %10510 = shalt.err (!%p10507_p2)
}
  0x1a   :  { %s10511_s1 = scalar_lea.vmem %s50_s25, 1024  ;;  %p10516_p4 = scmp.lt.s32.totalorder %s50_s25, %s50_s25 }
  0x1b   :  { %p10512_p3 = scmp.ne.s32.totalorder %s50_s25, %s10511_s1  ;;  %p10517_p5 = scmp.lt.s32.totalorder %s10511_s1, %s10511_s1 }
  0x1d   :  { %p10518_p6 = por %p10517_p5, %p10516_p4 }
  0x1f   :  { %p10519_p7 = pnand %p10518_p6, %p10512_p3 }
  0x21   :  { %10522 = shalt.err (!%p10519_p7)
}
  0x22   :  { %s10918_s20 = smov 64   ;;  %s10919_s21 = smov 4  }
  0x23   :  { %55 = dma.hbm_to_vmem [thread:$0]  %s13863_s28, 1024, %s50_s25, [#allocation8], %s10918_s20, %s10918_s20, %s10919_s21  }
  0x24   :  { %s10920_s24 = smov [#allocation10]   ;;  %s10921_s27 = smov [#allocation13]  }
  0x25   :  { %s74_s26 = sshll.u32 %s10920_s24, 4  ;;  %s96_s29 = sshll.u32 %s10921_s27, 4  ;;  %s75_s26 = int_to_ptr.vmem [resolvable:$true] %s74_s26  ;;  %s97_s29 = int_to_ptr.vmem [resolvable:$true] %s96_s29 }
  0x26   :  { %s10523_s18 = scalar_lea.hbm %s13763_s3, 16 }
  0x27   :  { %p10524_p8 = scmp.ne.s32.totalorder %s13763_s3, %s10523_s18  ;;  %p10527_p9 = scmp.lt.u32.totalorder %s10523_s18, %s13763_s3 }
  0x29   :  { %p10529_p10 = pnand %p10527_p9, %p10524_p8 }
  0x2b   :  { %10532 = shalt.err (!%p10529_p10)
}
  0x2c   :  { %s10533_s25 = scalar_lea.vmem %s75_s26, 16  ;;  %s10537_s28 = scalar_lea.vmem %s75_s26, 32 }
  0x2d   :  { %p10534_p11 = scmp.ne.s32.totalorder %s75_s26, %s10533_s25  ;;  %p10538_p12 = scmp.lt.s32.totalorder %s75_s26, %s75_s26 }
  0x2e   :  { %p10539_p13 = scmp.lt.s32.totalorder %s10537_s28, %s10533_s25 }
  0x30   :  { %p10540_p0 = por %p10539_p13, %p10538_p12 }
  0x32   :  { %p10541_p1 = pnand %p10540_p0, %p10534_p11 }
  0x34   :  { %10544 = shalt.err (!%p10541_p1)
}
  0x35   :  { %77 = dma.hbm_to_vmem [thread:$0]  %s13763_s3, 16, %s75_s26, [#allocation11]  }
  0x36   :  { %s10545_s16 = scalar_lea.hbm %s13765_s5, 32 }
  0x37   :  { %p10546_p2 = scmp.ne.s32.totalorder %s13765_s5, %s10545_s16  ;;  %p10549_p3 = scmp.lt.u32.totalorder %s10545_s16, %s13765_s5 }
  0x39   :  { %p10551_p4 = pnand %p10549_p3, %p10546_p2 }
  0x3b   :  { %10554 = shalt.err (!%p10551_p4)
}
  0x3c   :  { %s10555_s19 = scalar_lea.vmem %s97_s29, 32  ;;  %p10560_p6 = scmp.lt.s32.totalorder %s97_s29, %s97_s29 }
  0x3d   :  { %p10556_p5 = scmp.ne.s32.totalorder %s97_s29, %s10555_s19  ;;  %p10561_p7 = scmp.lt.s32.totalorder %s10555_s19, %s10555_s19 }
  0x3f   :  { %p10562_p8 = por %p10561_p7, %p10560_p6 }
  0x41   :  { %p10563_p9 = pnand %p10562_p8, %p10556_p5 }
  0x43   :  { %10566 = shalt.err (!%p10563_p9)
}
  0x44   :  { %99 = dma.hbm_to_vmem [thread:$0]  %s13765_s5, 32, %s97_s29, [#allocation14]  }
  0x45   :  { %s10922_s1 = smov [#allocation16]   ;;  %s10923_s28 = smov [#allocation19]  }
  0x46   :  { %s118_s25 = sshll.u32 %s10922_s1, 4  ;;  %s140_s22 = sshll.u32 %s10923_s28, 4  ;;  %s119_s25 = int_to_ptr.vmem [resolvable:$true] %s118_s25  ;;  %s141_s22 = int_to_ptr.vmem [resolvable:$true] %s140_s22 }
  0x47   :  { %s10567_s27 = scalar_lea.hbm %s13767_s7, 16 }
  0x48   :  { %p10568_p10 = scmp.ne.s32.totalorder %s13767_s7, %s10567_s27  ;;  %p10571_p11 = scmp.lt.u32.totalorder %s10567_s27, %s13767_s7 }
  0x4a   :  { %p10573_p12 = pnand %p10571_p11, %p10568_p10 }
  0x4c   :  { %10576 = shalt.err (!%p10573_p12)
}
  0x4d   :  { %s10577_s5 = scalar_lea.vmem %s119_s25, 16  ;;  %s10581_s29 = scalar_lea.vmem %s119_s25, 32 }
  0x4e   :  { %p10578_p13 = scmp.ne.s32.totalorder %s119_s25, %s10577_s5  ;;  %p10582_p0 = scmp.lt.s32.totalorder %s119_s25, %s119_s25 }
  0x4f   :  { %p10583_p1 = scmp.lt.s32.totalorder %s10581_s29, %s10577_s5 }
  0x51   :  { %p10584_p2 = por %p10583_p1, %p10582_p0 }
  0x53   :  { %p10585_p3 = pnand %p10584_p2, %p10578_p13 }
  0x55   :  { %10588 = shalt.err (!%p10585_p3)
}
  0x56   :  { %121 = dma.hbm_to_vmem [thread:$0]  %s13767_s7, 16, %s119_s25, [#allocation17]  }
  0x57   :  { %s10589_s1 = scalar_lea.hbm %s13769_s9, 128 }
  0x58   :  { %p10590_p4 = scmp.ne.s32.totalorder %s13769_s9, %s10589_s1  ;;  %p10593_p5 = scmp.lt.u32.totalorder %s10589_s1, %s13769_s9 }
  0x5a   :  { %p10595_p6 = pnand %p10593_p5, %p10590_p4 }
  0x5c   :  { %10598 = shalt.err (!%p10595_p6)
}
  0x5d   :  { %s10599_s16 = scalar_lea.vmem %s141_s22, 128  ;;  %p10604_p8 = scmp.lt.s32.totalorder %s141_s22, %s141_s22 }
  0x5e   :  { %p10600_p7 = scmp.ne.s32.totalorder %s141_s22, %s10599_s16  ;;  %p10605_p9 = scmp.lt.s32.totalorder %s10599_s16, %s10599_s16 }
  0x60   :  { %p10606_p10 = por %p10605_p9, %p10604_p8 }
  0x62   :  { %p10607_p11 = pnand %p10606_p10, %p10600_p7 }
  0x64   :  { %10610 = shalt.err (!%p10607_p11)
}
  0x65   :  { %143 = dma.hbm_to_vmem [thread:$0]  %s13769_s9, 128, %s141_s22, [#allocation20]  }
  0x66   :  { %s10924_s17 = smov [#allocation22]   ;;  %s10925_s30 = smov [#allocation25]  }
  0x67   :  { %s160_s0 = sshll.u32 %s10924_s17, 4  ;;  %s180_s5 = sshll.u32 %s10925_s30, 4  ;;  %s161_s0 = int_to_ptr.vmem [resolvable:$true] %s160_s0  ;;  %s181_s5 = int_to_ptr.vmem [resolvable:$true] %s180_s5 }
  0x68   :  { %s10611_s19 = scalar_lea.hbm %s13771_s11, 128 }
  0x69   :  { %p10612_p12 = scmp.ne.s32.totalorder %s13771_s11, %s10611_s19  ;;  %p10615_p13 = scmp.lt.u32.totalorder %s10611_s19, %s13771_s11 }
  0x6b   :  { %p10617_p0 = pnand %p10615_p13, %p10612_p12 }
  0x6d   :  { %10620 = shalt.err (!%p10617_p0)
}
  0x6e   :  { %s10621_s9 = scalar_lea.vmem %s161_s0, 128  ;;  %p10626_p2 = scmp.lt.s32.totalorder %s161_s0, %s161_s0 }
  0x6f   :  { %p10622_p1 = scmp.ne.s32.totalorder %s161_s0, %s10621_s9  ;;  %p10627_p3 = scmp.lt.s32.totalorder %s10621_s9, %s10621_s9 }
  0x71   :  { %p10628_p4 = por %p10627_p3, %p10626_p2 }
  0x73   :  { %p10629_p5 = pnand %p10628_p4, %p10622_p1 }
  0x75   :  { %10632 = shalt.err (!%p10629_p5)
}
  0x76   :  { %163 = dma.hbm_to_vmem [thread:$0]  %s13771_s11, 128, %s161_s0, [#allocation23]  }
  0x77   :  { %s10633_s16 = scalar_lea.hbm %s13773_s13, 16 }
  0x78   :  { %p10634_p6 = scmp.ne.s32.totalorder %s13773_s13, %s10633_s16  ;;  %p10637_p7 = scmp.lt.u32.totalorder %s10633_s16, %s13773_s13 }
  0x7a   :  { %p10639_p8 = pnand %p10637_p7, %p10634_p6 }
  0x7c   :  { %10642 = shalt.err (!%p10639_p8)
}
  0x7d   :  { %s10643_s29 = scalar_lea.vmem %s181_s5, 16  ;;  %s10647_s18 = scalar_lea.vmem %s181_s5, 32 }
  0x7e   :  { %p10644_p9 = scmp.ne.s32.totalorder %s181_s5, %s10643_s29  ;;  %p10648_p10 = scmp.lt.s32.totalorder %s181_s5, %s181_s5 }
  0x7f   :  { %p10649_p11 = scmp.lt.s32.totalorder %s10647_s18, %s10643_s29 }
  0x81   :  { %p10650_p12 = por %p10649_p11, %p10648_p10 }
  0x83   :  { %p10651_p13 = pnand %p10650_p12, %p10644_p9 }
  0x85   :  { %10654 = shalt.err (!%p10651_p13)
}
  0x86   :  { %183 = dma.hbm_to_vmem [thread:$0]  %s13773_s13, 16, %s181_s5, [#allocation26]  }
  0x87   :  { %s10926_s19 = smov [#allocation28]   ;;  %s10927_s26 = smov [#allocation4]  }
  0x88   :  { %s199_s3 = sshll.u32 %s10926_s19, 4  ;;  %s37_s1 = sshll.u32 %s10927_s26, 4  ;;  %s200_s3 = int_to_ptr.vmem [resolvable:$true] %s199_s3  ;;  %s38_s1 = int_to_ptr.vmem [resolvable:$true] %s37_s1 }
  0x89   :  { %s10655_s22 = scalar_lea.hbm %s13775_s15, 2048 }
  0x8a   :  { %p10656_p0 = scmp.ne.s32.totalorder %s13775_s15, %s10655_s22  ;;  %p10659_p1 = scmp.lt.u32.totalorder %s10655_s22, %s13775_s15 }
  0x8c   :  { %p10661_p2 = pnand %p10659_p1, %p10656_p0 }
  0x8e   :  { %10664 = shalt.err (!%p10661_p2)
}
  0x8f   :  { %s10665_s13 = scalar_lea.vmem %s200_s3, 2048  ;;  %p10670_p4 = scmp.lt.s32.totalorder %s200_s3, %s200_s3 }
  0x90   :  { %p10666_p3 = scmp.ne.s32.totalorder %s200_s3, %s10665_s13  ;;  %p10671_p5 = scmp.lt.s32.totalorder %s10665_s13, %s10665_s13 }
  0x92   :  { %p10672_p6 = por %p10671_p5, %p10670_p4 }
  0x94   :  { %p10673_p7 = pnand %p10672_p6, %p10666_p3 }
  0x96   :  { %10676 = shalt.err (!%p10673_p7)
}
  0x97   :  { %s10928_s5 = smov 128   ;;  %s10929_s7 = smov 8  }
  0x98   :  { %205 = dma.hbm_to_vmem [thread:$0]  %s13775_s15, 2048, %s200_s3, [#allocation29], %s10928_s5, %s10928_s5, %s10929_s7  }
  0x99   :  { %s13864_s18 = sld [smem:[#allocation83_spill]] }
  0x9f   :  { %s10677_s11 = scalar_lea.hbm %s13864_s18, 512 }
  0xa0   :  { %p10678_p8 = scmp.ne.s32.totalorder %s13864_s18, %s10677_s11  ;;  %p10681_p9 = scmp.lt.u32.totalorder %s10677_s11, %s13864_s18 }
  0xa2   :  { %p10683_p10 = pnand %p10681_p9, %p10678_p8 }
  0xa4   :  { %10686 = shalt.err (!%p10683_p10)
}
  0xa5   :  { %s10687_s9 = scalar_lea.vmem %s38_s1, 512  ;;  %p10692_p12 = scmp.lt.s32.totalorder %s38_s1, %s38_s1 }
  0xa6   :  { %p10688_p11 = scmp.ne.s32.totalorder %s38_s1, %s10687_s9  ;;  %p10693_p13 = scmp.lt.s32.totalorder %s10687_s9, %s10687_s9 }
  0xa8   :  { %p10694_p0 = por %p10693_p13, %p10692_p12 }
  0xaa   :  { %p10695_p1 = pnand %p10694_p0, %p10688_p11 }
  0xac   :  { %10698 = shalt.err (!%p10695_p1)
}
  0xad   :  { %43 = dma.hbm_to_vmem [thread:$0]  %s13864_s18, 512, %s38_s1, [#allocation5], %s10928_s5, %s10928_s5, %s10929_s7  }
  0xae   :  { %s10930_s22 = smov [#allocation9]   ;;  %s10931_s24 = smov [#allocation12]  }
  0xaf   :  { %s61_s23 = sshll.u32 %s10930_s22, 4  ;;  %s83_s27 = sshll.u32 %s10931_s24, 4  ;;  %s62_s23 = int_to_ptr.vmem [resolvable:$true] %s61_s23  ;;  %s84_s27 = int_to_ptr.vmem [resolvable:$true] %s83_s27 }
  0xb0   :  { %s10699_s25 = scalar_lea.hbm %s13762_s2, 512 }
  0xb1   :  { %p10700_p2 = scmp.ne.s32.totalorder %s13762_s2, %s10699_s25  ;;  %p10703_p3 = scmp.lt.u32.totalorder %s10699_s25, %s13762_s2 }
  0xb3   :  { %p10705_p4 = pnand %p10703_p3, %p10700_p2 }
  0xb5   :  { %10708 = shalt.err (!%p10705_p4)
}
  0xb6   :  { %s10709_s1 = scalar_lea.vmem %s62_s23, 512  ;;  %p10714_p6 = scmp.lt.s32.totalorder %s62_s23, %s62_s23 }
  0xb7   :  { %p10710_p5 = scmp.ne.s32.totalorder %s62_s23, %s10709_s1  ;;  %p10715_p7 = scmp.lt.s32.totalorder %s10709_s1, %s10709_s1 }
  0xb9   :  { %p10716_p8 = por %p10715_p7, %p10714_p6 }
  0xbb   :  { %p10717_p9 = pnand %p10716_p8, %p10710_p5 }
  0xbd   :  { %10720 = shalt.err (!%p10717_p9)
}
  0xbe   :  { %67 = dma.hbm_to_vmem [thread:$0]  %s13762_s2, 512, %s62_s23, [#allocation8], %s10918_s20, %s10918_s20, %s10919_s21  }
  0xbf   :  { %s10721_s28 = scalar_lea.hbm %s13764_s4, 10240 }
  0xc0   :  { %p10722_p10 = scmp.ne.s32.totalorder %s13764_s4, %s10721_s28  ;;  %p10725_p11 = scmp.lt.u32.totalorder %s10721_s28, %s13764_s4 }
  0xc2   :  { %p10727_p12 = pnand %p10725_p11, %p10722_p10 }
  0xc4   :  { %10730 = shalt.err (!%p10727_p12)
}
  0xc5   :  { %s10731_s24 = scalar_lea.vmem %s84_s27, 10240  ;;  %p10736_p0 = scmp.lt.s32.totalorder %s84_s27, %s84_s27 }
  0xc6   :  { %p10732_p13 = scmp.ne.s32.totalorder %s84_s27, %s10731_s24  ;;  %p10737_p1 = scmp.lt.s32.totalorder %s10731_s24, %s10731_s24 }
  0xc8   :  { %p10738_p2 = por %p10737_p1, %p10736_p0 }
  0xca   :  { %p10739_p3 = pnand %p10738_p2, %p10732_p13 }
  0xcc   :  { %10742 = shalt.err (!%p10739_p3)
}
  0xcd   :  { %89 = dma.hbm_to_vmem [thread:$0]  %s13764_s4, 10240, %s84_s27, [#allocation11], %s10928_s5, %s10928_s5, %s10929_s7  }
  0xce   :  { %s10932_s16 = smov [#allocation15]   ;;  %s10933_s25 = smov [#allocation18]  }
  0xcf   :  { %s105_s13 = sshll.u32 %s10932_s16, 4  ;;  %s127_s17 = sshll.u32 %s10933_s25, 4  ;;  %s106_s13 = int_to_ptr.vmem [resolvable:$true] %s105_s13  ;;  %s128_s17 = int_to_ptr.vmem [resolvable:$true] %s127_s17 }
  0xd0   :  { %s10743_s11 = scalar_lea.hbm %s13766_s6, 6144 }
  0xd1   :  { %p10744_p4 = scmp.ne.s32.totalorder %s13766_s6, %s10743_s11  ;;  %p10747_p5 = scmp.lt.u32.totalorder %s10743_s11, %s13766_s6 }
  0xd3   :  { %p10749_p6 = pnand %p10747_p5, %p10744_p4 }
  0xd5   :  { %10752 = shalt.err (!%p10749_p6)
}
  0xd6   :  { %s10753_s4 = scalar_lea.vmem %s106_s13, 6144  ;;  %p10758_p8 = scmp.lt.s32.totalorder %s106_s13, %s106_s13 }
  0xd7   :  { %p10754_p7 = scmp.ne.s32.totalorder %s106_s13, %s10753_s4  ;;  %p10759_p9 = scmp.lt.s32.totalorder %s10753_s4, %s10753_s4 }
  0xd9   :  { %p10760_p10 = por %p10759_p9, %p10758_p8 }
  0xdb   :  { %p10761_p11 = pnand %p10760_p10, %p10754_p7 }
  0xdd   :  { %10764 = shalt.err (!%p10761_p11)
}
  0xde   :  { %111 = dma.hbm_to_vmem [thread:$0]  %s13766_s6, 6144, %s106_s13, [#allocation14], %s10918_s20, %s10918_s20, %s10919_s21  }
  0xdf   :  { %s10765_s15 = scalar_lea.hbm %s13768_s8, 256 }
  0xe0   :  { %p10766_p12 = scmp.ne.s32.totalorder %s13768_s8, %s10765_s15  ;;  %p10769_p13 = scmp.lt.u32.totalorder %s10765_s15, %s13768_s8 }
  0xe2   :  { %p10771_p0 = pnand %p10769_p13, %p10766_p12 }
  0xe4   :  { %10774 = shalt.err (!%p10771_p0)
}
  0xe5   :  { %s10775_s23 = scalar_lea.vmem %s128_s17, 256  ;;  %p10780_p2 = scmp.lt.s32.totalorder %s128_s17, %s128_s17 }
  0xe6   :  { %p10776_p1 = scmp.ne.s32.totalorder %s128_s17, %s10775_s23  ;;  %p10781_p3 = scmp.lt.s32.totalorder %s10775_s23, %s10775_s23 }
  0xe8   :  { %p10782_p4 = por %p10781_p3, %p10780_p2 }
  0xea   :  { %p10783_p5 = pnand %p10782_p4, %p10776_p1 }
  0xec   :  { %10786 = shalt.err (!%p10783_p5)
}
  0xed   :  { %133 = dma.hbm_to_vmem [thread:$0]  %s13768_s8, 256, %s128_s17, [#allocation17], %s10928_s5, %s10928_s5, %s10929_s7  }
  0xee   :  { %s10934_s21 = smov [#allocation21]   ;;  %s10935_s13 = smov [#allocation24]  }
  0xef   :  { %s150_s16 = sshll.u32 %s10934_s21, 4  ;;  %s170_s25 = sshll.u32 %s10935_s13, 4  ;;  %s151_s16 = int_to_ptr.vmem [resolvable:$true] %s150_s16  ;;  %s171_s25 = int_to_ptr.vmem [resolvable:$true] %s170_s25 }
  0xf0   :  { %s10787_s11 = scalar_lea.hbm %s13770_s10, 16 }
  0xf1   :  { %p10788_p6 = scmp.ne.s32.totalorder %s13770_s10, %s10787_s11  ;;  %p10791_p7 = scmp.lt.u32.totalorder %s10787_s11, %s13770_s10 }
  0xf3   :  { %p10793_p8 = pnand %p10791_p7, %p10788_p6 }
  0xf5   :  { %10796 = shalt.err (!%p10793_p8)
}
  0xf6   :  { %s10797_s8 = scalar_lea.vmem %s151_s16, 16  ;;  %s10801_s5 = scalar_lea.vmem %s151_s16, 32 }
  0xf7   :  { %p10798_p9 = scmp.ne.s32.totalorder %s151_s16, %s10797_s8  ;;  %p10802_p10 = scmp.lt.s32.totalorder %s151_s16, %s151_s16 }
  0xf8   :  { %p10803_p11 = scmp.lt.s32.totalorder %s10801_s5, %s10797_s8 }
  0xfa   :  { %p10804_p12 = por %p10803_p11, %p10802_p10 }
  0xfc   :  { %p10805_p13 = pnand %p10804_p12, %p10798_p9 }
  0xfe   :  { %10808 = shalt.err (!%p10805_p13)
}
  0xff   :  { %153 = dma.hbm_to_vmem [thread:$0]  %s13770_s10, 16, %s151_s16, [#allocation20]  }
 0x100   :  { %s10809_s28 = scalar_lea.hbm %s13772_s12, 128 }
 0x101   :  { %p10810_p0 = scmp.ne.s32.totalorder %s13772_s12, %s10809_s28  ;;  %p10813_p1 = scmp.lt.u32.totalorder %s10809_s28, %s13772_s12 }
 0x103   :  { %p10815_p2 = pnand %p10813_p1, %p10810_p0 }
 0x105   :  { %10818 = shalt.err (!%p10815_p2)
}
 0x106   :  { %s10819_s24 = scalar_lea.vmem %s171_s25, 128  ;;  %p10824_p4 = scmp.lt.s32.totalorder %s171_s25, %s171_s25 }
 0x107   :  { %p10820_p3 = scmp.ne.s32.totalorder %s171_s25, %s10819_s24  ;;  %p10825_p5 = scmp.lt.s32.totalorder %s10819_s24, %s10819_s24 }
 0x109   :  { %p10826_p6 = por %p10825_p5, %p10824_p4 }
 0x10b   :  { %p10827_p7 = pnand %p10826_p6, %p10820_p3 }
 0x10d   :  { %10830 = shalt.err (!%p10827_p7)
}
 0x10e   :  { %173 = dma.hbm_to_vmem [thread:$0]  %s13772_s12, 128, %s171_s25, [#allocation23]  }
 0x10f   :  { %s10936_s23 = smov [#allocation27]   ;;  %s10937_s20 = smov [#allocation30]  }
 0x110   :  { %s190_s6 = sshll.u32 %s10936_s23, 4  ;;  %s212_s21 = sshll.u32 %s10937_s20, 4  ;;  %s191_s6 = int_to_ptr.vmem [resolvable:$true] %s190_s6  ;;  %s213_s21 = int_to_ptr.vmem [resolvable:$true] %s212_s21 }
 0x111   :  { %s10831_s30 = scalar_lea.hbm %s13774_s14, 128 }
 0x112   :  { %p10832_p8 = scmp.ne.s32.totalorder %s13774_s14, %s10831_s30  ;;  %p10835_p9 = scmp.lt.u32.totalorder %s10831_s30, %s13774_s14 }
 0x114   :  { %p10837_p10 = pnand %p10835_p9, %p10832_p8 }
 0x116   :  { %10840 = shalt.err (!%p10837_p10)
}
 0x117   :  { %s10841_s12 = scalar_lea.vmem %s191_s6, 128  ;;  %p10846_p12 = scmp.lt.s32.totalorder %s191_s6, %s191_s6 }
 0x118   :  { %p10842_p11 = scmp.ne.s32.totalorder %s191_s6, %s10841_s12  ;;  %p10847_p13 = scmp.lt.s32.totalorder %s10841_s12, %s10841_s12 }
 0x11a   :  { %p10848_p0 = por %p10847_p13, %p10846_p12 }
 0x11c   :  { %p10849_p1 = pnand %p10848_p0, %p10842_p11 }
 0x11e   :  { %10852 = shalt.err (!%p10849_p1)
}
 0x11f   :  { %193 = dma.hbm_to_vmem [thread:$0]  %s13774_s14, 128, %s191_s6, [#allocation26]  }
 0x120   :  { %s13865_s5 = sld [smem:[#allocation85_spill]] }
 0x126   :  { %s10853_s17 = scalar_lea.hbm %s13865_s5, 16 }
 0x127   :  { %p10854_p2 = scmp.ne.s32.totalorder %s13865_s5, %s10853_s17  ;;  %p10857_p3 = scmp.lt.u32.totalorder %s10853_s17, %s13865_s5 }
 0x129   :  { %p10859_p4 = pnand %p10857_p3, %p10854_p2 }
 0x12b   :  { %10862 = shalt.err (!%p10859_p4)
}
 0x12c   :  { %s10863_s9 = scalar_lea.vmem %s213_s21, 16  ;;  %s10867_s15 = scalar_lea.vmem %s213_s21, 32 }
 0x12d   :  { %p10864_p5 = scmp.ne.s32.totalorder %s213_s21, %s10863_s9  ;;  %p10868_p6 = scmp.lt.s32.totalorder %s213_s21, %s213_s21 }
 0x12e   :  { %p10869_p7 = scmp.lt.s32.totalorder %s10867_s15, %s10863_s9 }
 0x130   :  { %p10870_p8 = por %p10869_p7, %p10868_p6 }
 0x132   :  { %p10871_p9 = pnand %p10870_p8, %p10864_p5 }
 0x134   :  { %10874 = shalt.err (!%p10871_p9)
}
 0x135   :  { %215 = dma.hbm_to_vmem [thread:$0]  %s13865_s5, 16, %s213_s21, [#allocation29]  }
 0x136   :  { %10897 = dma.done.wait [#allocation5], 512  }
 0x137   :  { %10898 = vsyncadd [#allocation5], 4294966784 }
 0x138   :  { %10899 = dma.done.wait [#allocation8], 1536  }
 0x139   :  { %10900 = vsyncadd [#allocation8], 4294965760 }
 0x13a   :  { %10901 = dma.done.wait [#allocation11], 10256  }
 0x13b   :  { %10902 = vsyncadd [#allocation11], 4294957040 }
 0x13c   :  { %10903 = dma.done.wait [#allocation14], 6176  }
 0x13d   :  { %10904 = vsyncadd [#allocation14], 4294961120 }
 0x13e   :  { %10905 = dma.done.wait [#allocation17], 272  }
 0x13f   :  { %10906 = vsyncadd [#allocation17], 4294967024 }
 0x140   :  { %10907 = dma.done.wait [#allocation20], 144  }
 0x141   :  { %10908 = vsyncadd [#allocation20], 4294967152 }
 0x142   :  { %10909 = dma.done.wait [#allocation23], 256  }
 0x143   :  { %10910 = vsyncadd [#allocation23], 4294967040 }
 0x144   :  { %10911 = dma.done.wait [#allocation26], 144  }
 0x145   :  { %10912 = vsyncadd [#allocation26], 4294967152 }
 0x146   :  { %10913 = dma.done.wait [#allocation29], 2064  }
 0x147   :  { %10914 = vsyncadd [#allocation29], 4294965232  ;;  %v311_v0 = vlaneseq  ;;  %v13786_v1 = vmov 0.0   ;;  %vm10939_vm0 = vmmov 0   ;;  %v10940_v2 = vmov 1966171168  }
 0x148   :  { %9943 = vmatprep.subr.bf16.mxu1 %v13786_v1  ;;  %9921 = vmatprep.subr.bf16.mxu0 %v13786_v1  ;;  %v309_v3 = vunpack.c.l.s4 %v10940_v2  ;;  %vm959_vm1 = vcmask 1043456   ;;  %v676_v7 = vld [vmem:[#allocation9] sm:$0xf]  ;;  %v686_v8 = vld [vmem:[#allocation9 + $0x4] sm:$0xf]  ;;  %vm943_vm2 = vcmask 64512  }
 0x149   :  { %9945 = vmatprep.mubr.msk.bf16.mxu1 %vm10939_vm0, %v13786_v1  ;;  %9923 = vmatprep.mubr.msk.bf16.mxu0 %vm10939_vm0, %v13786_v1  ;;  %v11275_v4 = vshrl.u32 %v311_v0, 7  ;;  %v1307_v9 = vsel %vm959_vm1, %v676_v7, 0  ;;  %v961_v10 = vsel %vm959_vm1, %v686_v8, 0  ;;  %vm8541_vm3 = vcmask 130048   ;;  %s10942_s22 = smov 104   ;;  %s10951_s24 = smov 112  }
 0x14a   :  { %v310_v5 = vunpack.c.0.s8 %v309_v3  ;;  %v9418_v11 = vld.sshfl [vmem:[#allocation7] sm:$0x33 pattern:$0x75316420]  ;;  %9944 = vmatpush3.bf16.msra.mxu1 %v1307_v9  ;;  %9922 = vmatpush3.bf16.msra.mxu0 %v961_v10  ;;  %v1454_v3 = vld [vmem:[#allocation9 + $0x8] sm:$0xf] }
 0x14b   :  { %13866 = vst [vmem:[#allocation42_spill] sm:$0xff] %v11275_v4  ;;  %v9419_v12 = vld.sshfl [vmem:[#allocation7 + $0x4] sm:$0x33 pattern:$0x75316420]  ;;  %v307_v13 = vcombine.high %v9418_v11, %v9418_v11  ;;  %9965 = vmatprep.subr.bf16.mxu0 %v13786_v1  ;;  %9987 = vmatprep.subr.bf16.mxu1 %v13786_v1  ;;  %vm8462_vm4 = vcmask 1042432  }
 0x14c   :  { %v11278_v6 = vsub.s32 %v310_v5, %v11275_v4  ;;  %v9420_v15 = vld.sshfl [vmem:[#allocation7 + $0x8] sm:$0x33 pattern:$0x75316420]  ;;  %v1381_v17 = vcombine.high %v9419_v12, %v9419_v12  ;;  %v1795_v10 = vld [vmem:[#allocation9 + $0xc] sm:$0xf] }
 0x14d   :  { %v345_v18 = vcombine.high %v9420_v15, %v9420_v15  ;;  %vm8639_vm5 = vcmask 261120   ;;  %vm9228_vm6 = vcmask 1041409   ;;  %vm9230_vm7 = vcmask 1042434  }
 0x14e   :  { %v314_v14 = vrot.slane %v9418_v11, %v11278_v6  ;;  %v11284_v16 = vrot.slane %v9419_v12, %v11278_v6  ;;  %v352_v19 = vrot.slane %v9420_v15, %v11278_v6  ;;  %v11290_v20 = vrot.slane %v307_v13, %v11278_v6  ;;  %v11358_v11 = vld.sshfl [vmem:[#allocation7 + $0xc] sm:$0x33 pattern:$0x75316420] }
 0x14f   :  { %v11293_v21 = vrot.slane %v1381_v17, %v11278_v6  ;;  %v359_v24 = vrot.slane %v345_v18, %v11278_v6  ;;  %v9422_v12 = vld.sshfl [vmem:[#allocation7 + $0x10] sm:$0x33 pattern:$0x75316420]  ;;  %vm9232_vm8 = vcmask 1043459   ;;  %vm9234_vm9 = vcmask 1044484  }
 0x150   :  { %v11297_v22 = vcombine.high %v11284_v16, %v11284_v16  ;;  %v11299_v23 = vcombine.high %v314_v14, %v314_v14  ;;  %v11302_v25 = vcombine.high %v352_v19, %v352_v19  ;;  %v614_v26 = vunpack.i.h.s16 %v352_v19 }
 0x151   :  { %13867 = vst [vmem:[#allocation43_spill] sm:$0xff] %v11293_v21  ;;  %v9457_v27 = vpack.i.b16 %v352_v19, %v11284_v16  ;;  %v1071_v28 = vcombine.low %v314_v14, %v11290_v20  ;;  %v9477_v29 = vcombine.high %v314_v14, %v11290_v20  ;;  %v1786_v30 = vunpack.i.h.s16 %v11293_v21 }
 0x152   :  { %13868 = vst [vmem:[#allocation44_spill] sm:$0xff] %v11297_v22  ;;  %v2157_v31 = vcombine.low %v11284_v16, %v11293_v21  ;;  %v11310_v32 = vcombine.high %v359_v24, %v359_v24  ;;  %v616_v33 = vunpack.i.h.s16 %v359_v24  ;;  %v618_v34 = vunpack.i.h.s16 %v11302_v25 }
 0x153   :  { %v9458_v35 = vpack.i.b16 %v359_v24, %v614_v26  ;;  %v1081_v36 = vrot.slane %v1071_v28, %v11278_v6  ;;  %v11315_v37 = vrot.slane %v9477_v29, %v11278_v6  ;;  %v9484_v38 = vpack.i.b16 %v359_v24, %v11293_v21 }
 0x154   :  { %v9510_v39 = vpack.i.b16 %v11302_v25, %v11297_v22  ;;  %v9459_v40 = vpack.i.b16 %v11302_v25, %v616_v33  ;;  %v11322_v41 = vpack.i.b16 %v11310_v32, %v618_v34  ;;  %v11324_v43 = vpack.i.b16 %v616_v33, %v1786_v30 }
 0x155   :  { %13869 = vst [vmem:[#allocation45_spill] sm:$0xff] %v11315_v37  ;;  %v1073_v42 = vcombine.low %v9457_v27, %v9458_v35  ;;  %v1103_v44 = vcombine.low %v1081_v36, %v11315_v37  ;;  %v11329_v45 = vcombine.high %v11290_v20, %v11290_v20  ;;  %v605_v46 = vunpack.i.h.s16 %v314_v14 }
 0x156   :  { %v677_v47 = vunpack.i.h.s16 %v11284_v16  ;;  %v1074_v48 = vcombine.low %v9459_v40, %v11322_v41  ;;  %v11334_v50 = vcombine.low %v9484_v38, %v9459_v40  ;;  %v11339_v52 = vcombine.low %v9510_v39, %v11322_v41 }
 0x157   :  { %v1095_v49 = vrot.slane %v1073_v42, %v11278_v6  ;;  %v11342_v53 = vrot.slane %v2157_v31, %v11278_v6  ;;  %v13783_v55 = vunpack.i.h.s16 %v11297_v22  ;;  %v607_v56 = vunpack.i.h.s16 %v11290_v20  ;;  %v9424_v31 = vld.sshfl [vmem:[#allocation7 + $0x18] sm:$0x33 pattern:$0x75316420] }
 0x158   :  { %13870 = vst [vmem:[#allocation46_spill] sm:$0xff] %v11339_v52  ;;  %v1102_v54 = vrot.slane %v1074_v48, %v11278_v6  ;;  %v609_v57 = vunpack.i.h.s16 %v11299_v23  ;;  %v1111_v58 = vrot.slane %v1103_v44, %v11278_v6  ;;  %v611_v59 = vunpack.i.h.s16 %v11329_v45 }
 0x159   :  { %13871 = vst [vmem:[#allocation47_spill] sm:$0xff] %v11342_v53  ;;  %v9434_v60 = vpack.i.b16 %v11290_v20, %v605_v46  ;;  %v691_v61 = vpack.i.b16 %v614_v26, %v677_v47  ;;  %v9435_v63 = vpack.i.b16 %v11299_v23, %v607_v56  ;;  %v9450_v2 = vcombine.high %v352_v19, %v359_v24  ;;  %v11364_v26 = vld.sshfl [vmem:[#allocation7 + $0x14] sm:$0x33 pattern:$0x75316420] }
 0x15a   :  { %v1104_v62 = vcombine.low %v1095_v49, %v1102_v54  ;;  %v9436_v0 = vpack.i.b16 %v11329_v45, %v609_v57  ;;  %v9437_v5 = vpack.i.b16 %v11284_v16, %v611_v59  ;;  %v9499_v8 = vpack.i.b16 %v11293_v21, %v677_v47  ;;  %v9432_v53 = vld.sshfl [vmem:[#allocation7 + $0x38] sm:$0x33 pattern:$0x75316420] }
 0x15b   :  { %v725_v7 = vcombine.low %v691_v61, %v359_v24  ;;  %v11356_v9 = vpack.i.b16 %v11297_v22, %v1786_v30  ;;  %v723_v14 = vcombine.low %v9434_v60, %v9435_v63  ;;  %v754_v15 = vrot.slane %v9450_v2, %v11278_v6 }
 0x15c   :  { %v1118_v13 = vrot.slane %v1104_v62, %v11278_v6  ;;  %v724_v17 = vcombine.low %v9436_v0, %v9437_v5  ;;  %v1808_v19 = vcombine.low %v9435_v63, %v9436_v0  ;;  %v1703_v24 = vsel %vm959_vm1, %v1454_v3, 0 }
 0x15d   :  { %13872 = vst [vmem:[#allocation48_spill] sm:$0xff] %v11356_v9  ;;  %v747_v18 = vrot.slane %v725_v7, %v11278_v6  ;;  %v733_v29 = vrot.slane %v723_v14, %v11278_v6  ;;  %v1809_v30 = vcombine.low %v9437_v5, %v9499_v8  ;;  %v11371_v33 = vpack.i.b16 %v618_v34, %v13783_v55 }
 0x15e   :  { %v1119_v27 = vcombine.low %v1111_v58, %v1118_v13  ;;  %v11374_v35 = vrot.slane %v724_v17, %v11278_v6  ;;  %v2466_v38 = vcombine.low %v9499_v8, %v11356_v9  ;;  %v2044_v40 = vsel %vm959_vm1, %v1795_v10, 0 }
 0x15f   :  { %13873 = vst [vmem:[#allocation49_spill] sm:$0xff] %v11371_v33  ;;  %v756_v36 = vcombine.low %v747_v18, %v754_v15  ;;  %v11383_v42 = vrot.slane %v11358_v11, %v11278_v6  ;;  %v383_v44 = vcombine.high %v9422_v12, %v9422_v12  ;;  %v11388_v47 = vrot.slane %v1808_v19, %v11278_v6 }
 0x160   :  { %9946 = vmatmul.mubr.msk.bf16.vlgmr.msra.gmra.mrb[0].mxu1 %vm943_vm2, %v1119_v27  ;;  %v755_v34 = vcombine.low %v733_v29, %v11374_v35  ;;  %v13782_v48 = vunpack.i.h.s16 %v11310_v32  ;;  %v11394_v49 = vrot.slane %v1809_v30, %v11278_v6  ;;  %v11397_v54 = vrot.slane %v9422_v12, %v11278_v6  ;;  %v11448_v27 = vld.sshfl [vmem:[#allocation7 + $0x1c] sm:$0x33 pattern:$0x75316420] }
 0x161   :  { %v770_v46 = vrot.slane %v756_v36, %v11278_v6  ;;  %9988 = vmatpush3.bf16.msra.mxu1 %v2044_v40  ;;  %9949 = vmatprep.mubr.msk.bf16.mxu1 %vm10939_vm0, %v13786_v1  ;;  %v11400_v56 = vrot.slane %v383_v44, %v11278_v6  ;;  %v11404_v57 = vrot.slane %v11364_v26, %v11278_v6  ;;  %vm9236_vm10 = vcmask 1045509  }
 0x162   :  { %10031 = vmatprep.subr.bf16.mxu1 %v13786_v1  ;;  %v763_v58 = vrot.slane %v755_v34, %v11278_v6  ;;  %v11409_v59 = vrot.slane %v2466_v38, %v11278_v6  ;;  %v421_v60 = vcombine.high %v9424_v31, %v9424_v31  ;;  %v11412_v61 = vrot.slane %v9424_v31, %v11278_v6  ;;  %v9426_v34 = vld.sshfl [vmem:[#allocation7 + $0x20] sm:$0x33 pattern:$0x75316420] }
 0x163   :  { %v11416_v62 = vcombine.high %v11397_v54, %v11397_v54  ;;  %v11420_v63 = vcombine.high %v11400_v56, %v11400_v56  ;;  %v11425_v0 = vpack.i.b16 %v11383_v42, %v13782_v48  ;;  %v623_v2 = vunpack.i.h.s16 %v11397_v54 }
 0x164   :  { %v771_v3 = vcombine.low %v763_v58, %v770_v46  ;;  %v11429_v5 = vrot.slane %v421_v60, %v11278_v6  ;;  %v11433_v7 = vcombine.high %v11412_v61, %v11412_v61  ;;  %v632_v8 = vunpack.i.h.s16 %v11412_v61  ;;  %v11468_v46 = vld.sshfl [vmem:[#allocation7 + $0x24] sm:$0x33 pattern:$0x75316420] }
 0x165   :  { %13874 = vst [vmem:[#allocation50_spill] sm:$0xff] %v11416_v62  ;;  %13875 = vst [vmem:[#allocation51_spill] sm:$0xff] %v11420_v63  ;;  %v9462_v10 = vpack.i.b16 %v11412_v61, %v11404_v57  ;;  %v1120_v12 = vcombine.low %v11425_v0, %v11397_v54  ;;  %v1121_v13 = vcombine.low %v11400_v56, %v11416_v62  ;;  %v625_v14 = vunpack.i.h.s16 %v11400_v56 }
 0x166   :  { %13876 = vst [vmem:[#allocation52_spill] sm:$0xff] %v11433_v7  ;;  %9924 = vmatmul.mubr.msk.bf16.vlgmr.msra.gmra.mrb[0].mxu0 %vm943_vm2, %v771_v3  ;;  %v13784_v15 = vunpack.i.h.s16 %v11429_v5  ;;  %v9463_v17 = vpack.i.b16 %v11429_v5, %v632_v8  ;;  %v627_v18 = vunpack.i.h.s16 %v11416_v62  ;;  %v629_v19 = vunpack.i.h.s16 %v11420_v63 }
 0x167   :  { %9966 = vmatpush3.bf16.msra.mxu0 %v1703_v24  ;;  %9927 = vmatprep.mubr.msk.bf16.mxu0 %vm10939_vm0, %v13786_v1  ;;  %v1122_v29 = vcombine.low %v11420_v63, %v9462_v10  ;;  %v1130_v30 = vrot.slane %v1120_v12, %v11278_v6  ;;  %v1137_v31 = vrot.slane %v1121_v13, %v11278_v6  ;;  %v13785_v36 = vunpack.i.h.s16 %v11404_v57  ;;  %v9428_v10 = vld.sshfl [vmem:[#allocation7 + $0x28] sm:$0x33 pattern:$0x75316420] }
 0x168   :  { %v11459_v38 = vpack.i.b16 %v11433_v7, %v13784_v15  ;;  %v9438_v40 = vpack.i.b16 %v11400_v56, %v623_v2  ;;  %v11463_v24 = vpack.i.b16 %v11416_v62, %v625_v14  ;;  %v11466_v44 = vpack.i.b16 %v11420_v63, %v627_v18  ;;  %10009 = vmatprep.subr.bf16.mxu0 %v13786_v1 }
 0x169   :  { %v1144_v58 = vrot.slane %v1122_v29, %v11278_v6  ;;  %v1152_v60 = vcombine.low %v1130_v30, %v1137_v31  ;;  %v11473_v3 = vpack.i.b16 %v11404_v57, %v629_v19  ;;  %v700_v2 = vpack.i.b16 %v632_v8, %v13785_v36 }
 0x16a   :  { %v1123_v12 = vcombine.low %v9463_v17, %v11459_v38  ;;  %v772_v13 = vcombine.low %v11383_v42, %v9438_v40  ;;  %v773_v14 = vcombine.low %v11463_v24, %v11466_v44  ;;  %v775_v18 = vcombine.low %v11429_v5, %v11433_v7 }
 0x16b   :  { %v1160_v29 = vrot.slane %v1152_v60, %v11278_v6  ;;  %v774_v30 = vcombine.low %v11473_v3, %v700_v2  ;;  %v11487_v19 = vcombine.high %v11429_v5, %v11429_v5  ;;  %v11491_v8 = vrot.slane %v11448_v27, %v11278_v6 }
 0x16c   :  { %v1151_v17 = vrot.slane %v1123_v12, %v11278_v6  ;;  %v782_v31 = vrot.slane %v772_v13, %v11278_v6  ;;  %v789_v40 = vrot.slane %v773_v14, %v11278_v6  ;;  %v803_v48 = vrot.slane %v775_v18, %v11278_v6 }
 0x16d   :  { %13877 = vst [vmem:[#allocation53_spill] sm:$0xff] %v11487_v19  ;;  %13878 = vst [vmem:[#allocation54_spill] sm:$0xff] %v11491_v8  ;;  %v796_v60 = vrot.slane %v774_v30, %v11278_v6  ;;  %v459_v55 = vcombine.high %v9426_v34, %v9426_v34  ;;  %v466_v2 = vrot.slane %v9426_v34, %v11278_v6  ;;  %v13789_v18 = vunpack.i.h.s16 %v11433_v7 }
 0x16e   :  { %v11501_v28 = vrot.slane %v11468_v46, %v11278_v6  ;;  %v1153_v15 = vcombine.low %v1144_v58, %v1151_v17  ;;  %v804_v36 = vcombine.low %v782_v31, %v789_v40  ;;  %v497_v39 = vcombine.high %v9428_v10, %v9428_v10 }
 0x16f   :  { %v11504_v12 = vrot.slane %v9428_v10, %v11278_v6  ;;  %v805_v13 = vcombine.low %v796_v60, %v803_v48  ;;  %v11507_v14 = vrot.slane %v459_v55, %v11278_v6  ;;  %v13788_v30 = vunpack.i.h.s16 %v11487_v19 }
 0x170   :  { %v1167_v34 = vrot.slane %v1153_v15, %v11278_v6  ;;  %v812_v51 = vrot.slane %v804_v36, %v11278_v6  ;;  %v11514_v1 = vrot.slane %v497_v39, %v11278_v6  ;;  %v11521_v55 = vpack.i.b16 %v11487_v19, %v13789_v18 }
 0x171   :  { %13879 = vst [vmem:[#allocation55_spill] sm:$0xff] %v11507_v14  ;;  %v650_v58 = vunpack.i.h.s16 %v11504_v12  ;;  %v819_v10 = vrot.slane %v805_v13, %v11278_v6  ;;  %v11526_v48 = vpack.i.b16 %v11491_v8, %v13788_v30  ;;  %v9467_v15 = vpack.i.b16 %v11504_v12, %v11501_v28 }
 0x172   :  { %v1168_v36 = vcombine.low %v1160_v29, %v1167_v34  ;;  %v1170_v17 = vcombine.low %v466_v2, %v11507_v14  ;;  %v9478_v31 = vcombine.high %v466_v2, %v11507_v14  ;;  %v11535_v13 = vcombine.high %v466_v2, %v466_v2 }
 0x173   :  { %13880 = vst [vmem:[#allocation56_spill] sm:$0xff] %v11526_v48  ;;  %v9468_v39 = vpack.i.b16 %v11514_v1, %v650_v58  ;;  %v820_v40 = vcombine.low %v812_v51, %v819_v10  ;;  %v1169_v60 = vcombine.low %v11521_v55, %v11526_v48  ;;  %v11539_v30 = vcombine.high %v11507_v14, %v11507_v14  ;;  %v11671_v48 = vld.sshfl [vmem:[#allocation7 + $0x3c] sm:$0x33 pattern:$0x75316420] }
 0x174   :  { %13881 = vst [vmem:[#allocation57_spill] sm:$0xff] %v11535_v13  ;;  %9950 = vmatmul.mubr.msk.bf16.gmra.mrb[4].mxu1 %vm943_vm2, %v1168_v36  ;;  %v1186_v29 = vrot.slane %v1170_v17, %v11278_v6  ;;  %v11544_v34 = vrot.slane %v9478_v31, %v11278_v6  ;;  %v641_v4 = vunpack.i.h.s16 %v466_v2  ;;  %v13884_v51 = vmov 0.0   ;;  %v11555_v36 = vld.sshfl [vmem:[#allocation7 + $0x2c] sm:$0x33 pattern:$0x75316420] }
 0x175   :  { %13882 = vst [vmem:[#allocation58_spill] sm:$0xff] %v11539_v30  ;;  %v1172_v18 = vcombine.low %v9467_v15, %v9468_v39  ;;  %9928 = vmatmul.mubr.msk.bf16.gmra.mrb[4].mxu0 %vm943_vm2, %v820_v40  ;;  %9953 = vmatprep.mubr.msk.bf16.mxu1 %vm10939_vm0, %v13884_v51  ;;  %v11550_v10 = vrot.slane %v1169_v60, %v11278_v6  ;;  %v643_v9 = vunpack.i.h.s16 %v11507_v14  ;;  %v645_v22 = vunpack.i.h.s16 %v11535_v13  ;;  %v9430_v39 = vld.sshfl [vmem:[#allocation7 + $0x30] sm:$0x33 pattern:$0x75316420] }
 0x176   :  { %13883 = vst [vmem:[#allocation59_spill] sm:$0xff] %v11544_v34  ;;  %v647_v15 = vunpack.i.h.s16 %v11539_v30  ;;  %13886 = vst [vmem:[#allocation61_spill] sm:$0xff] %v11555_v36  ;;  %9931 = vmatprep.mubr.msk.bf16.mxu0 %vm10939_vm0, %v13884_v51  ;;  %v13805_v17 = vunpack.i.h.s16 %v11501_v28  ;;  %v9442_v31 = vpack.i.b16 %v11507_v14, %v641_v4  ;;  %v821_v40 = vcombine.low %v11487_v19, %v11491_v8  ;;  %v11564_v60 = vld.sshfl [vmem:[#allocation7 + $0x34] sm:$0x33 pattern:$0x75316420] }
 0x177   :  { %13885 = vst [vmem:[#allocation60_spill] sm:$0xff] %v11550_v10  ;;  %v1200_v2 = vrot.slane %v1172_v18, %v11278_v6  ;;  %13887 = vst [vmem:[#allocation62_spill] sm:$0xff] %v11564_v60  ;;  %v1201_v21 = vcombine.low %v11550_v10, %v1186_v29  ;;  %v11568_v62 = vpack.i.b16 %v11535_v13, %v643_v9  ;;  %vm9238_vm11 = vcmask 1046534  }
 0x178   :  { %v11571_v63 = vpack.i.b16 %v11539_v30, %v645_v22  ;;  %v11574_v7 = vpack.i.b16 %v11501_v28, %v647_v15  ;;  %v709_v4 = vpack.i.b16 %v650_v58, %v13805_v17  ;;  %v11580_v19 = vrot.slane %v821_v40, %v11278_v6 }
 0x179   :  { %v1202_v18 = vcombine.low %v11544_v34, %v1200_v2  ;;  %v11584_v29 = vcombine.high %v11504_v12, %v11504_v12  ;;  %v1209_v9 = vrot.slane %v1201_v21, %v11278_v6  ;;  %v822_v22 = vcombine.low %v9442_v31, %v11568_v62 }
 0x17a   :  { %13888 = vst [vmem:[#allocation63_spill] sm:$0xff] %v11574_v7  ;;  %13889 = vst [vmem:[#allocation64_spill] sm:$0xff] %v11580_v19  ;;  %v823_v15 = vcombine.low %v11571_v63, %v11574_v7  ;;  %v11592_v2 = vcombine.high %v11514_v1, %v11514_v1  ;;  %v824_v40 = vcombine.low %v709_v4, %v11514_v1  ;;  %vm9240_vm12 = vcmask 1047559  }
 0x17b   :  { %13890 = vst [vmem:[#allocation65_spill] sm:$0xff] %v11584_v29  ;;  %v1216_v58 = vrot.slane %v1202_v18, %v11278_v6  ;;  %v11598_v17 = vrot.slane %v11555_v36, %v11278_v6  ;;  %v535_v34 = vcombine.high %v9430_v39, %v9430_v39  ;;  %v838_v21 = vrot.slane %v822_v22, %v11278_v6 }
 0x17c   :  { %13891 = vst [vmem:[#allocation66_spill] sm:$0xff] %v11592_v2  ;;  %v11602_v31 = vrot.slane %v823_v15, %v11278_v6  ;;  %v11605_v10 = vrot.slane %v9430_v39, %v11278_v6  ;;  %v11609_v37 = vrot.slane %v11564_v60, %v11278_v6  ;;  %v852_v4 = vrot.slane %v824_v40, %v11278_v6 }
 0x17d   :  { %v1217_v18 = vcombine.low %v1209_v9, %v1216_v58  ;;  %v11613_v52 = vrot.slane %v535_v34, %v11278_v6  ;;  %v573_v33 = vcombine.high %v9432_v53, %v9432_v53  ;;  %v853_v36 = vcombine.low %v11580_v19, %v838_v21 }
 0x17e   :  { %13892 = vst [vmem:[#allocation67_spill] sm:$0xff] %v11602_v31  ;;  %13893 = vst [vmem:[#allocation68_spill] sm:$0xff] %v11605_v10  ;;  %v11618_v22 = vcombine.high %v11605_v10, %v11605_v10  ;;  %v11621_v39 = vrot.slane %v9432_v53, %v11278_v6  ;;  %v13812_v15 = vunpack.i.h.s16 %v11514_v1  ;;  %v854_v9 = vcombine.low %v11602_v31, %v852_v4 }
 0x17f   :  { %13894 = vst [vmem:[#allocation69_spill] sm:$0xff] %v11613_v52  ;;  %9954 = vmatmul.mubr.msk.bf16.gmra.mrb[8].mxu1 %vm943_vm2, %v1217_v18  ;;  %v11628_v34 = vcombine.high %v11613_v52, %v11613_v52  ;;  %v11631_v58 = vrot.slane %v573_v33, %v11278_v6  ;;  %v13817_v40 = vunpack.i.h.s16 %v11584_v29  ;;  %v861_v21 = vrot.slane %v853_v36, %v11278_v6 }
 0x180   :  { %13895 = vst [vmem:[#allocation70_spill] sm:$0xff] %v11618_v22  ;;  %13896 = vst [vmem:[#allocation71_spill] sm:$0xff] %v11621_v39  ;;  %9957 = vmatprep.mubr.msk.bf16.mxu1 %vm10939_vm0, %v13884_v51  ;;  %v11641_v18 = vpack.i.b16 %v11584_v29, %v13812_v15  ;;  %v9472_v4 = vpack.i.b16 %v11621_v39, %v11609_v37  ;;  %v868_v33 = vrot.slane %v854_v9, %v11278_v6 }
 0x181   :  { %13897 = vst [vmem:[#allocation72_spill] sm:$0xff] %v11628_v34  ;;  %v11649_v31 = vpack.i.b16 %v11592_v2, %v13817_v40  ;;  %v1220_v36 = vcombine.low %v11613_v52, %v11618_v22  ;;  %v659_v53 = vunpack.i.h.s16 %v11605_v10  ;;  %v13899_v19 = vunpack.i.h.s16 %v11592_v2 }
 0x182   :  { %v1221_v60 = vcombine.low %v11628_v34, %v9472_v4  ;;  %v661_v30 = vunpack.i.h.s16 %v11613_v52  ;;  %v663_v9 = vunpack.i.h.s16 %v11618_v22  ;;  %v869_v29 = vcombine.low %v861_v21, %v868_v33 }
 0x183   :  { %13898 = vst [vmem:[#allocation73_spill] sm:$0xff] %v11649_v31  ;;  %v11657_v15 = vpack.i.b16 %v11598_v17, %v13899_v19  ;;  %v1218_v40 = vcombine.low %v11641_v18, %v11649_v31  ;;  %v1242_v7 = vrot.slane %v1220_v36, %v11278_v6  ;;  %v665_v14 = vunpack.i.h.s16 %v11628_v34 }
 0x184   :  { %v1249_v19 = vrot.slane %v1221_v60, %v11278_v6  ;;  %v668_v13 = vunpack.i.h.s16 %v11621_v39  ;;  %9932 = vmatmul.mubr.msk.bf16.gmra.mrb[8].mxu0 %vm943_vm2, %v869_v29  ;;  %v9446_v33 = vpack.i.b16 %v11613_v52, %v659_v53  ;;  %v11677_v36 = vpack.i.b16 %v11618_v22, %v661_v30 }
 0x185   :  { %13900 = vst [vmem:[#allocation74_spill] sm:$0xff] %v11657_v15  ;;  %v1219_v2 = vcombine.low %v11657_v15, %v11605_v10  ;;  %v1228_v21 = vrot.slane %v1218_v40, %v11278_v6  ;;  %v11680_v31 = vpack.i.b16 %v11628_v34, %v663_v9  ;;  %9935 = vmatprep.mubr.msk.bf16.mxu0 %vm10939_vm0, %v13884_v51  ;;  %v13902_v29 = vunpack.i.h.s16 %v11609_v37 }
 0x186   :  { %13901 = vst [vmem:[#allocation75_spill] sm:$0xff] %v11677_v36  ;;  %v1251_v4 = vcombine.low %v1242_v7, %v1249_v19  ;;  %v11686_v10 = vpack.i.b16 %v11609_v37, %v665_v14  ;;  %v9451_v53 = vcombine.high %v11504_v12, %v11514_v1  ;;  %v871_v30 = vcombine.low %v11598_v17, %v9446_v33 }
 0x187   :  { %v1235_v60 = vrot.slane %v1219_v2, %v11278_v6  ;;  %v718_v40 = vpack.i.b16 %v668_v13, %v13902_v29  ;;  %v872_v9 = vcombine.low %v11677_v36, %v11680_v31  ;;  %v11697_v34 = vcombine.high %v11621_v39, %v11621_v39 }
 0x188   :  { %v1265_v7 = vrot.slane %v1251_v4, %v11278_v6  ;;  %v11703_v19 = vcombine.high %v11631_v58, %v11631_v58  ;;  %v880_v12 = vrot.slane %v9451_v53, %v11278_v6  ;;  %v887_v33 = vrot.slane %v871_v30, %v11278_v6 }
 0x189   :  { %v1250_v2 = vcombine.low %v1228_v21, %v1235_v60  ;;  %v873_v14 = vcombine.low %v11686_v10, %v718_v40  ;;  %v894_v29 = vrot.slane %v872_v9, %v11278_v6  ;;  %v11710_v22 = vrot.slane %v11671_v48, %v11278_v6 }
 0x18a   :  { %13903 = vst [vmem:[#allocation76_spill] sm:$0xff] %v11703_v19  ;;  %v13836_v60 = vunpack.i.h.s16 %v11631_v58  ;;  %v13835_v40 = vunpack.i.h.s16 %v11697_v34  ;;  %v902_v39 = vcombine.low %v880_v12, %v887_v33  ;;  %v13834_v52 = vunpack.i.h.s16 %v11703_v19 }
 0x18b   :  { %13904 = vst [vmem:[#allocation77_spill] sm:$0xff] %v11710_v22  ;;  %v1258_v21 = vrot.slane %v1250_v2, %v11278_v6  ;;  %v901_v4 = vrot.slane %v873_v14, %v11278_v6  ;;  %v9473_v53 = vpack.i.b16 %v11631_v58, %v668_v13  ;;  %v919_v30 = vcombine.low %v11631_v58, %v11697_v34 }
 0x18c   :  { %v11723_v2 = vpack.i.b16 %v11697_v34, %v13836_v60  ;;  %v11728_v14 = vpack.i.b16 %v11703_v19, %v13835_v40  ;;  %v910_v12 = vrot.slane %v902_v39, %v11278_v6  ;;  %v11734_v13 = vpack.i.b16 %v11710_v22, %v13834_v52 }
 0x18d   :  { %v1266_v9 = vcombine.low %v1258_v21, %v1265_v7  ;;  %v903_v36 = vcombine.low %v894_v29, %v901_v4  ;;  %v920_v7 = vcombine.low %v11703_v19, %v11710_v22  ;;  %v927_v33 = vrot.slane %v919_v30, %v11278_v6  ;;  %v13931_v19 = vld [vmem:[#allocation75_spill] sm:$0xff] }
 0x18e   :  { %v1267_v21 = vcombine.low %v9473_v53, %v11723_v2  ;;  %v1811_v4 = vcombine.low %v11310_v32, %v11383_v42  ;;  %v13905_v39 = vcombine.low %v11324_v43, %v11302_v25  ;;  %v1268_v30 = vcombine.low %v11728_v14, %v11734_v13 }
 0x18f   :  { %9958 = vmatmul.mubr.msk.bf16.gmra.mrb[12].mxu1 %vm943_vm2, %v1266_v9  ;;  %v917_v29 = vrot.slane %v903_v36, %v11278_v6  ;;  %v11753_v9 = vrot.slane %v920_v7, %v11278_v6  ;;  %v1840_v36 = vcombine.low %v11388_v47, %v11394_v49  ;;  %v1467_v53 = vcombine.low %v11290_v20, %v11299_v23 }
 0x190   :  { %v1832_v52 = vrot.slane %v13905_v39, %v11278_v6  ;;  %9961 = vmatprep.mubr.msk.bf16.mxu1 %vm10939_vm0, %v13884_v51  ;;  %v1275_v60 = vrot.slane %v1267_v21, %v11278_v6  ;;  %v1839_v25 = vrot.slane %v1811_v4, %v11278_v6  ;;  %v1468_v43 = vcombine.low %v11329_v45, %v11284_v16  ;;  %v2144_v39 = vld [vmem:[#allocation9 + $0x10] sm:$0xf]  ;;  %v2453_v45 = vld [vmem:[#allocation9 + $0x14] sm:$0xf] }
 0x191   :  { %13906 = vst [vmem:[#allocation78_spill] sm:$0xff] %v11753_v9  ;;  %v918_v40 = vcombine.low %v910_v12, %v917_v29  ;;  %v11766_v7 = vrot.slane %v1268_v30, %v11278_v6  ;;  %v935_v47 = vcombine.low %v927_v33, %v11753_v9  ;;  %v1470_v20 = vcombine.low %v11322_v41, %v11425_v0 }
 0x192   :  { %v1841_v23 = vcombine.low %v1832_v52, %v1839_v25  ;;  %v1848_v12 = vrot.slane %v1840_v36, %v11278_v6  ;;  %v1477_v29 = vrot.slane %v1467_v53, %v11278_v6  ;;  %v11775_v16 = vrot.slane %v1468_v43, %v11278_v6 }
 0x193   :  { %13907 = vst [vmem:[#allocation79_spill] sm:$0xff] %v11766_v7  ;;  %9936 = vmatmul.mubr.msk.bf16.gmra.mrb[12].mxu0 %vm943_vm2, %v918_v40  ;;  %v1283_v21 = vcombine.low %v1275_v60, %v11766_v7  ;;  %v942_v33 = vrot.slane %v935_v47, %v11278_v6  ;;  %v1498_v41 = vrot.slane %v1470_v20, %v11278_v6  ;;  %v11783_v40 = vsel %vm959_vm1, %v2144_v39, 0 }
 0x194   :  { %13908 = vst [vmem:[#allocation80_spill] sm:$0xff] %v11775_v16  ;;  %9939 = vmatprep.mubr.msk.bf16.mxu0 %vm10939_vm0, %v13884_v51  ;;  %v1855_v52 = vrot.slane %v1841_v23, %v11278_v6  ;;  %v1499_v4 = vcombine.low %v1477_v29, %v11775_v16  ;;  %v1389_v30 = vcombine.high %v11358_v11, %v11358_v11  ;;  %v2670_v43 = vsel %vm959_vm1, %v2453_v45, 0 }
 0x195   :  { %v1397_v36 = vcombine.high %v11364_v26, %v11364_v26  ;;  %v1290_v53 = vrot.slane %v1283_v21, %v11278_v6  ;;  %v13909_v60 = vrot.slane %v11334_v50, %v11278_v6  ;;  %v1858_v39 = vcombine.low %v11466_v44, %v11473_v3 }
 0x196   :  { %v1507_v47 = vrot.slane %v1499_v4, %v11278_v6  ;;  %v11800_v20 = vrot.slane %v1389_v30, %v11278_v6  ;;  %v9503_v26 = vcombine.high %v11412_v61, %v11429_v5  ;;  %v1856_v50 = vcombine.low %v1848_v12, %v1855_v52 }
 0x197   :  { %v1500_v25 = vcombine.low %v13909_v60, %v1498_v41  ;;  %v11803_v11 = vrot.slane %v1397_v36, %v11278_v6  ;;  %9962 = vmatmul.mubr.msk.bf16.gmra.mrb[16].mxu1 %vm943_vm2, %v1290_v53  ;;  %v1874_v29 = vrot.slane %v1858_v39, %v11278_v6  ;;  %v678_v45 = vunpack.i.h.s16 %v11383_v42 }
 0x198   :  { %9989 = vmatprep.mubr.msk.bf16.mxu1 %vm10939_vm0, %v13884_v51  ;;  %v13910_v41 = vunpack.i.h.s16 %v11404_v57  ;;  %v1857_v61 = vcombine.low %v11800_v20, %v11463_v24  ;;  %v9492_v36 = vcombine.high %v11397_v54, %v11400_v56  ;;  %v1519_v53 = vcombine.low %v11459_v38, %v11521_v55 }
 0x199   :  { %v1514_v23 = vrot.slane %v1500_v25, %v11278_v6  ;;  %v13840_v21 = vunpack.i.h.s16 %v11803_v11  ;;  %v9486_v12 = vpack.i.b16 %v11429_v5, %v11803_v11  ;;  %v11824_v30 = vpack.i.b16 %v11800_v20, %v678_v45 }
 0x19a   :  { %v11817_v4 = vpack.i.b16 %v11803_v11, %v13910_v41  ;;  %v13911_v60 = vunpack.i.h.s16 %v11429_v5  ;;  %v1867_v25 = vrot.slane %v1857_v61, %v11278_v6  ;;  %v1888_v54 = vrot.slane %v9503_v26, %v11278_v6 }
 0x19b   :  { %v1515_v52 = vcombine.low %v1507_v47, %v1514_v23  ;;  %9940 = vmatmul.mubr.msk.bf16.gmra.mrb[16].mxu0 %vm943_vm2, %v942_v33  ;;  %v1518_v39 = vcombine.low %v11404_v57, %v9486_v12  ;;  %v1405_v47 = vcombine.high %v11448_v27, %v11448_v27  ;;  %v1516_v38 = vcombine.low %v11824_v30, %v11400_v56 }
 0x19c   :  { %v1800_v24 = vpack.i.b16 %v13911_v60, %v13840_v21  ;;  %9967 = vmatprep.mubr.msk.bf16.mxu0 %vm10939_vm0, %v13884_v51  ;;  %v1533_v55 = vrot.slane %v9492_v36, %v11278_v6  ;;  %v1547_v5 = vrot.slane %v1519_v53, %v11278_v6  ;;  %v1889_v23 = vcombine.low %v1867_v25, %v1874_v29 }
 0x19d   :  { %v1540_v45 = vrot.slane %v1518_v39, %v11278_v6  ;;  %v11849_v41 = vrot.slane %v1405_v47, %v11278_v6  ;;  %v1526_v27 = vrot.slane %v1516_v38, %v11278_v6  ;;  %v1413_v26 = vcombine.high %v11468_v46, %v11468_v46 }
 0x19e   :  { %v1859_v33 = vcombine.low %v11817_v4, %v1800_v24  ;;  %v1907_v56 = vcombine.low %v11568_v62, %v11571_v63  ;;  %v680_v61 = vunpack.i.h.s16 %v11491_v8  ;;  %v1897_v36 = vrot.slane %v1889_v23, %v11278_v6  ;;  %v13915_v23 = vld [vmem:[#allocation56_spill] sm:$0xff] }
 0x19f   :  { %13912 = vst [vmem:[#allocation81_spill] sm:$0xff] %v11849_v41  ;;  %v1549_v29 = vcombine.low %v1540_v45, %v1547_v5  ;;  %v1906_v53 = vcombine.low %v11491_v8, %v11849_v41  ;;  %9990 = vmatmul.mubr.msk.bf16.vlgmr.msra.gmra.mrb[20].mxu1 %vm943_vm2, %v1856_v50  ;;  %v1548_v60 = vcombine.low %v1526_v27, %v1533_v55  ;;  %v682_v50 = vunpack.i.h.s16 %v11598_v17  ;;  %v13916_v27 = vld [vmem:[#allocation57_spill] sm:$0xff] }
 0x1a0   :  { %v1881_v12 = vrot.slane %v1859_v33, %v11278_v6  ;;  %v11863_v24 = vrot.slane %v1413_v26, %v11278_v6  ;;  %v1923_v46 = vrot.slane %v1907_v56, %v11278_v6  ;;  %v11867_v62 = vpack.i.b16 %v11849_v41, %v680_v61  ;;  %10032 = vmatpush3.bf16.msra.mxu1 %v2670_v43  ;;  %v13917_v26 = vld [vmem:[#allocation55_spill] sm:$0xff] }
 0x1a1   :  { %9993 = vmatprep.mubr.msk.bf16.mxu1 %vm10939_vm0, %v13884_v51  ;;  %v1563_v25 = vrot.slane %v1549_v29, %v11278_v6  ;;  %v11873_v39 = vrot.slane %v1906_v53, %v11278_v6  ;;  %v1556_v47 = vrot.slane %v1548_v60, %v11278_v6  ;;  %v13914_v55 = vunpack.i.h.s16 %v11501_v28  ;;  %10075 = vmatprep.subr.bf16.mxu1 %v13884_v51  ;;  %v13919_v29 = vld [vmem:[#allocation63_spill] sm:$0xff] }
 0x1a2   :  { %v1890_v63 = vcombine.low %v1881_v12, %v1888_v54  ;;  %v13839_v38 = vunpack.i.h.s16 %v11863_v24  ;;  %v9488_v43 = vpack.i.b16 %v11514_v1, %v11863_v24  ;;  %v1565_v45 = vcombine.low %v13915_v23, %v11867_v62 }
 0x1a3   :  { %13913 = vst [vmem:[#allocation82_spill] sm:$0xff] %v11873_v39  ;;  %v11881_v5 = vpack.i.b16 %v11863_v24, %v13914_v55  ;;  %9968 = vmatmul.mubr.msk.bf16.vlgmr.msra.gmra.mrb[20].mxu0 %vm943_vm2, %v1515_v52  ;;  %v1938_v33 = vcombine.low %v11873_v39, %v1923_v46  ;;  %v1566_v56 = vcombine.low %v13917_v26, %v13916_v27  ;;  %v13918_v52 = vunpack.i.h.s16 %v11514_v1  ;;  %v13920_v55 = vld [vmem:[#allocation58_spill] sm:$0xff] }
 0x1a4   :  { %v1904_v54 = vrot.slane %v1890_v63, %v11278_v6  ;;  %10010 = vmatpush3.bf16.msra.mxu0 %v11783_v40  ;;  %9971 = vmatprep.mubr.msk.bf16.mxu0 %vm10939_vm0, %v13884_v51  ;;  %v1564_v61 = vcombine.low %v1556_v47, %v1563_v25  ;;  %v1567_v40 = vcombine.low %v13920_v55, %v11501_v28  ;;  %v13921_v25 = vld [vmem:[#allocation65_spill] sm:$0xff] }
 0x1a5   :  { %v1803_v12 = vpack.i.b16 %v13918_v52, %v13839_v38  ;;  %v1908_v53 = vcombine.low %v13919_v29, %v11881_v5  ;;  %v1946_v63 = vrot.slane %v1938_v33, %v11278_v6  ;;  %v1568_v23 = vcombine.low %v9488_v43, %v11641_v18  ;;  %10053 = vmatprep.subr.bf16.mxu0 %v13884_v51  ;;  %v13925_v33 = vld [vmem:[#allocation61_spill] sm:$0xff]  ;;  %v13926_v43 = vld [vmem:[#allocation62_spill] sm:$0xff] }
 0x1a6   :  { %v1905_v46 = vcombine.low %v1897_v36, %v1904_v54  ;;  %v11913_v27 = vrot.slane %v1565_v45, %v11278_v6  ;;  %v1582_v26 = vrot.slane %v1566_v56, %v11278_v6  ;;  %v11917_v36 = vrot.slane %v1567_v40, %v11278_v6  ;;  %v13927_v29 = vld [vmem:[#allocation66_spill] sm:$0xff] }
 0x1a7   :  { %v1909_v47 = vcombine.low %v1803_v12, %v13921_v25  ;;  %v11910_v1 = vrot.slane %v1908_v53, %v11278_v6  ;;  %v1596_v54 = vrot.slane %v1568_v23, %v11278_v6  ;;  %v1421_v18 = vcombine.high %v13925_v33, %v13925_v33  ;;  %v13928_v23 = vld [vmem:[#allocation73_spill] sm:$0xff] }
 0x1a8   :  { %13923 = vst [vmem:[#allocation57_spill] sm:$0xff] %v11913_v27  ;;  %13924 = vst [vmem:[#allocation55_spill] sm:$0xff] %v11917_v36  ;;  %v1429_v52 = vcombine.high %v13926_v43, %v13926_v43  ;;  %9994 = vmatmul.mubr.msk.bf16.gmra.mrb[24].mxu1 %vm943_vm2, %v1905_v46  ;;  %v1597_v45 = vcombine.low %v11913_v27, %v1582_v26  ;;  %v1955_v56 = vcombine.low %v13927_v29, %v11598_v17 }
 0x1a9   :  { %13922 = vst [vmem:[#allocation56_spill] sm:$0xff] %v11910_v1  ;;  %v1937_v12 = vrot.slane %v1909_v47, %v11278_v6  ;;  %v1957_v53 = vcombine.low %v11680_v31, %v11686_v10  ;;  %9997 = vmatprep.mubr.msk.bf16.mxu1 %vm10939_vm0, %v13884_v51  ;;  %v1598_v55 = vcombine.low %v11917_v36, %v1596_v54  ;;  %v13935_v36 = vunpack.i.h.s16 %v11631_v58 }
 0x1aa   :  { %v11935_v40 = vrot.slane %v1421_v18, %v11278_v6  ;;  %v11938_v46 = vrot.slane %v1429_v52, %v11278_v6  ;;  %v1614_v47 = vcombine.low %v13928_v23, %v11657_v15  ;;  %v1605_v33 = vrot.slane %v1597_v45, %v11278_v6 }
 0x1ab   :  { %v1939_v26 = vcombine.low %v11910_v1, %v1937_v12  ;;  %v1965_v43 = vrot.slane %v1955_v56, %v11278_v6  ;;  %v1979_v38 = vrot.slane %v1957_v53, %v11278_v6  ;;  %9972 = vmatmul.mubr.msk.bf16.gmra.mrb[24].mxu0 %vm943_vm2, %v1564_v61  ;;  %v1612_v54 = vrot.slane %v1598_v55, %v11278_v6  ;;  %v13932_v53 = vld [vmem:[#allocation69_spill] sm:$0xff]  ;;  %v13933_v55 = vld [vmem:[#allocation68_spill] sm:$0xff] }
 0x1ac   :  { %v13929_v52 = vunpack.i.h.s16 %v11609_v37  ;;  %v1956_v12 = vcombine.low %v11935_v40, %v13931_v19  ;;  %9975 = vmatprep.mubr.msk.bf16.mxu0 %vm10939_vm0, %v13884_v51  ;;  %v11960_v56 = vpack.i.b16 %v11935_v40, %v682_v50  ;;  %v9490_v61 = vpack.i.b16 %v11631_v58, %v11938_v46 }
 0x1ad   :  { %v1953_v45 = vrot.slane %v1939_v26, %v11278_v6  ;;  %v9493_v60 = vcombine.high %v13933_v55, %v13932_v53  ;;  %v1613_v18 = vcombine.low %v1605_v33, %v1612_v54  ;;  %v1624_v39 = vrot.slane %v1614_v47, %v11278_v6 }
 0x1ae   :  { %v11952_v21 = vpack.i.b16 %v11938_v46, %v13929_v52  ;;  %v13934_v52 = vunpack.i.h.s16 %v11938_v46  ;;  %v1972_v1 = vrot.slane %v1956_v12, %v11278_v6  ;;  %v1615_v50 = vcombine.low %v11960_v56, %v13932_v53 }
 0x1af   :  { %v1954_v26 = vcombine.low %v1946_v63, %v1953_v45  ;;  %v1617_v27 = vcombine.low %v11609_v37, %v9490_v61  ;;  %v1638_v7 = vrot.slane %v9493_v60, %v11278_v6  ;;  %v1437_v54 = vcombine.high %v11671_v48, %v11671_v48  ;;  %v13937_v60 = vld [vmem:[#allocation49_spill] sm:$0xff] }
 0x1b0   :  { %13930 = vst [vmem:[#allocation63_spill] sm:$0xff] %v11952_v21  ;;  %v1806_v19 = vpack.i.b16 %v13935_v36, %v13934_v52  ;;  %v1987_v33 = vcombine.low %v1965_v43, %v1972_v1  ;;  %v13936_v36 = vld [vmem:[#allocation71_spill] sm:$0xff]  ;;  %v2159_v47 = vcombine.low %v11425_v0, %v11824_v30  ;;  %v1631_v63 = vrot.slane %v1615_v50, %v11278_v6 }
 0x1b1   :  { %v9504_v52 = vcombine.high %v13936_v36, %v11631_v58  ;;  %9998 = vmatmul.mubr.msk.bf16.gmra.mrb[28].mxu1 %vm943_vm2, %v1954_v26  ;;  %v1645_v12 = vrot.slane %v1617_v27, %v11278_v6  ;;  %v2467_v45 = vcombine.low %v13937_v60, %v11310_v32  ;;  %v11993_v58 = vrot.slane %v1437_v54, %v11278_v6  ;;  %v13942_v60 = vld [vmem:[#allocation47_spill] sm:$0xff] }
 0x1b2   :  { %v1958_v55 = vcombine.low %v11952_v21, %v1806_v19  ;;  %10001 = vmatprep.mubr.msk.bf16.mxu1 %vm10939_vm0, %v13884_v51  ;;  %v1995_v1 = vrot.slane %v1987_v33, %v11278_v6  ;;  %v1663_v43 = vcombine.low %v11723_v2, %v11728_v14  ;;  %v1646_v61 = vcombine.low %v1624_v39, %v1631_v63 }
 0x1b3   :  { %v1647_v53 = vcombine.low %v1638_v7, %v1645_v12  ;;  %v2012_v27 = vrot.slane %v9504_v52, %v11278_v6  ;;  %v2468_v19 = vcombine.low %v11383_v42, %v11800_v20  ;;  %9976 = vmatmul.mubr.msk.bf16.gmra.mrb[28].mxu0 %vm943_vm2, %v1613_v18  ;;  %v2005_v50 = vcombine.low %v11710_v22, %v11993_v58  ;;  %v13941_v12 = vld [vmem:[#allocation45_spill] sm:$0xff] }
 0x1b4   :  { %v1986_v48 = vrot.slane %v1958_v55, %v11278_v6  ;;  %v13938_v55 = vunpack.i.h.s16 %v11710_v22  ;;  %v2482_v2 = vrot.slane %v2467_v45, %v11278_v6  ;;  %9979 = vmatprep.mubr.msk.bf16.mxu0 %vm10939_vm0, %v13884_v51  ;;  %v1654_v14 = vrot.slane %v1646_v61, %v11278_v6 }
 0x1b5   :  { %v1661_v7 = vrot.slane %v1647_v53, %v11278_v6  ;;  %v2489_v39 = vrot.slane %v2468_v19, %v11278_v6  ;;  %v12018_v36 = vrot.slane %v2005_v50, %v11278_v6  ;;  %v2180_v63 = vrot.slane %v2159_v47, %v11278_v6 }
 0x1b6   :  { %v1988_v26 = vcombine.low %v1979_v38, %v1986_v48  ;;  %v12006_v33 = vpack.i.b16 %v11993_v58, %v13938_v55  ;;  %v13939_v38 = vld [vmem:[#allocation46_spill] sm:$0xff]  ;;  %v13943_v45 = vcombine.low %v13941_v12, %v13942_v60  ;;  %v13944_v61 = vcombine.low %v11374_v35, %v11409_v59 }
 0x1b7   :  { %v2173_v18 = vrot.slane %v13939_v38, %v11278_v6  ;;  %13940 = vst [vmem:[#allocation58_spill] sm:$0xff] %v12018_v36  ;;  %v1671_v19 = vrot.slane %v1663_v43, %v11278_v6  ;;  %v1662_v55 = vcombine.low %v1654_v14, %v1661_v7  ;;  %v12042_v12 = vcombine.high %v11383_v42, %v11383_v42 }
 0x1b8   :  { %v2002_v54 = vrot.slane %v1988_v26, %v11278_v6  ;;  %v1664_v52 = vcombine.low %v11734_v13, %v12006_v33  ;;  %v2189_v48 = vrot.slane %v13943_v45, %v11278_v6  ;;  %v12031_v53 = vrot.slane %v13944_v61, %v11278_v6  ;;  %v13947_v45 = vld [vmem:[#allocation52_spill] sm:$0xff] }
 0x1b9   :  { %v2491_v26 = vcombine.low %v2482_v2, %v2489_v39  ;;  %v2182_v47 = vcombine.low %v2173_v18, %v2180_v63  ;;  %v12046_v35 = vcombine.high %v11404_v57, %v11404_v57  ;;  %v2508_v59 = vcombine.low %v11473_v3, %v11817_v4 }
 0x1ba   :  { %v2003_v50 = vcombine.low %v1995_v1, %v2002_v54  ;;  %v12035_v13 = vrot.slane %v1664_v52, %v11278_v6  ;;  %v2020_v1 = vcombine.low %v2012_v27, %v12018_v36  ;;  %v1787_v2 = vunpack.i.h.s16 %v11800_v20 }
 0x1bb   :  { %v12038_v38 = vrot.slane %v2491_v26, %v11278_v6  ;;  %v2196_v43 = vrot.slane %v2182_v47, %v11278_v6  ;;  %v13846_v7 = vunpack.i.h.s16 %v12046_v35  ;;  %v13946_v39 = vunpack.i.h.s16 %v11803_v11  ;;  %9980 = vmatmul.mubr.msk.bf16.gmra.mrb[32].mxu0 %vm943_vm2, %v1662_v55  ;;  %v13950_v47 = vld [vmem:[#allocation50_spill] sm:$0xff] }
 0x1bc   :  { %13945 = vst [vmem:[#allocation65_spill] sm:$0xff] %v12035_v13  ;;  %10002 = vmatmul.mubr.msk.bf16.gmra.mrb[32].mxu1 %vm943_vm2, %v2003_v50  ;;  %v2507_v27 = vcombine.low %v12042_v12, %v11466_v44  ;;  %v1679_v54 = vcombine.low %v1671_v19, %v12035_v13  ;;  %v2523_v63 = vrot.slane %v2508_v59, %v11278_v6  ;;  %v13948_v61 = vunpack.i.h.s16 %v13947_v45 }
 0x1bd   :  { %10005 = vmatprep.mubr.msk.bf16.mxu1 %vm10939_vm0, %v13884_v51  ;;  %v12062_v18 = vpack.i.b16 %v12046_v35, %v13946_v39  ;;  %v12068_v52 = vcombine.low %v2189_v48, %v2196_v43  ;;  %v12072_v60 = vpack.i.b16 %v12042_v12, %v1787_v2  ;;  %9983 = vmatprep.mubr.msk.bf16.mxu0 %vm10939_vm0, %v13884_v51  ;;  %v13949_v48 = vld [vmem:[#allocation51_spill] sm:$0xff] }
 0x1be   :  { %v2458_v26 = vpack.i.b16 %v13948_v61, %v13846_v7  ;;  %v2516_v44 = vrot.slane %v2507_v27, %v11278_v6  ;;  %v9512_v19 = vpack.i.b16 %v13947_v45, %v12046_v35  ;;  %v2199_v50 = vcombine.low %v13949_v48, %v11404_v57 }
 0x1bf   :  { %v2027_v55 = vrot.slane %v2020_v1, %v11278_v6  ;;  %v2198_v59 = vcombine.low %v12072_v60, %v13950_v47  ;;  %v12090_v43 = vcombine.high %v11491_v8, %v11491_v8  ;;  %v12094_v2 = vcombine.high %v11501_v28, %v11501_v28 }
 0x1c0   :  { %v2509_v39 = vcombine.low %v12062_v18, %v2458_v26  ;;  %v2200_v27 = vcombine.low %v11803_v11, %v9512_v19  ;;  %v2214_v45 = vrot.slane %v2199_v50, %v11278_v6  ;;  %v1686_v61 = vrot.slane %v1679_v54, %v11278_v6  ;;  %v13952_v50 = vld [vmem:[#allocation43_spill] sm:$0xff] }
 0x1c1   :  { %v2207_v1 = vrot.slane %v2198_v59, %v11278_v6  ;;  %v13951_v7 = vunpack.i.h.s16 %v11863_v24  ;;  %v2531_v36 = vcombine.low %v2516_v44, %v2523_v63  ;;  %v2548_v19 = vcombine.low %v11849_v41, %v12090_v43  ;;  %v2770_v59 = vld [vmem:[#allocation9 + $0x18] sm:$0xf] }
 0x1c2   :  { %v2530_v13 = vrot.slane %v2509_v39, %v11278_v6  ;;  %v2221_v26 = vrot.slane %v2200_v27, %v11278_v6  ;;  %v12113_v54 = vcombine.high %v13952_v50, %v13952_v50  ;;  %v13953_v8 = vunpack.i.h.s16 %v12094_v2  ;;  %v13955_v44 = vld [vmem:[#allocation64_spill] sm:$0xff] }
 0x1c3   :  { %v12105_v14 = vpack.i.b16 %v12094_v2, %v13951_v7  ;;  %v2222_v47 = vcombine.low %v2207_v1, %v2214_v45  ;;  %v13954_v7 = vunpack.i.h.s16 %v13921_v25  ;;  %v1789_v63 = vunpack.i.h.s16 %v11849_v41  ;;  %v13956_v27 = vld [vmem:[#allocation60_spill] sm:$0xff]  ;;  %9984 = vmatmul.mubr.msk.bf16.gmra.mrb[36].mxu0 %vm943_vm2, %v1686_v61  ;;  %v3079_v45 = vld [vmem:[#allocation9 + $0x1c] sm:$0xf] }
 0x1c4   :  { %10006 = vmatmul.mubr.msk.bf16.gmra.mrb[36].mxu1 %vm943_vm2, %v2027_v55  ;;  %v2532_v39 = vcombine.low %v2530_v13, %v13955_v44  ;;  %v2223_v16 = vcombine.low %v2221_v26, %v13956_v27  ;;  %v9514_v55 = vpack.i.b16 %v13921_v25, %v12094_v2  ;;  %v2557_v1 = vrot.slane %v2548_v19, %v11278_v6  ;;  %v13958_v41 = vld [vmem:[#allocation44_spill] sm:$0xff] }
 0x1c5   :  { %v2461_v9 = vpack.i.b16 %v13954_v7, %v13953_v8  ;;  %10033 = vmatprep.mubr.msk.bf16.mxu1 %vm10939_vm0, %v13884_v51  ;;  %v2549_v48 = vcombine.low %v11881_v5, %v12105_v14  ;;  %v12133_v7 = vpack.i.b16 %v12090_v43, %v1789_v63  ;;  %v13959_v13 = vunpack.i.h.s16 %v13958_v41  ;;  %10011 = vmatprep.mubr.msk.bf16.mxu0 %vm10939_vm0, %v13884_v51 }
 0x1c6   :  { %v2987_v5 = vsel %vm959_vm1, %v2770_v59, 0  ;;  %v2539_v25 = vrot.slane %v2531_v36, %v11278_v6  ;;  %v2546_v61 = vrot.slane %v2532_v39, %v11278_v6  ;;  %v2240_v19 = vcombine.low %v11501_v28, %v11863_v24 }
 0x1c7   :  { %v2550_v8 = vcombine.low %v2461_v9, %v13927_v29  ;;  %13957 = vst [vmem:[#allocation61_spill] sm:$0xff] %v12133_v7  ;;  %v12138_v26 = vpack.i.b16 %v12113_v54, %v13959_v13  ;;  %v2239_v9 = vcombine.low %v11867_v62, %v12133_v7  ;;  %v2241_v63 = vcombine.low %v9514_v55, %v13928_v23  ;;  %v13960_v62 = vld [vmem:[#allocation67_spill] sm:$0xff] }
 0x1c8   :  { %v12152_v44 = vcombine.high %v11598_v17, %v11598_v17  ;;  %v3296_v27 = vsel %vm959_vm1, %v3079_v45, 0  ;;  %v2230_v59 = vrot.slane %v2222_v47, %v11278_v6  ;;  %v2237_v36 = vrot.slane %v2223_v16, %v11278_v6 }
 0x1c9   :  { %v2564_v39 = vrot.slane %v2549_v48, %v11278_v6  ;;  %v2571_v13 = vrot.slane %v2550_v8, %v11278_v6  ;;  %v2572_v7 = vcombine.low %v2557_v1, %v13960_v62  ;;  %v2248_v28 = vrot.slane %v2239_v9, %v11278_v6  ;;  %v13963_v62 = vld [vmem:[#allocation59_spill] sm:$0xff] }
 0x1ca   :  { %v12163_v23 = vcombine.high %v11609_v37, %v11609_v37  ;;  %v2547_v55 = vcombine.low %v2539_v25, %v2546_v61  ;;  %v2589_v45 = vcombine.low %v11598_v17, %v11935_v40  ;;  %v2590_v47 = vcombine.low %v12152_v44, %v11680_v31 }
 0x1cb   :  { %v1791_v16 = vunpack.i.h.s16 %v11935_v40  ;;  %v13961_v48 = vcombine.low %v12031_v53, %v12038_v38  ;;  %v2255_v8 = vrot.slane %v2240_v19, %v11278_v6  ;;  %v2262_v1 = vrot.slane %v2241_v63, %v11278_v6  ;;  %10012 = vmatmul.mubr.msk.bf16.vlgmr.msra.gmra.mrb[40].mxu0 %vm943_vm2, %v12068_v52 }
 0x1cc   :  { %v13856_v9 = vunpack.i.h.s16 %v12163_v23  ;;  %v2591_v25 = vcombine.low %v11686_v10, %v11952_v21  ;;  %v13962_v31 = vunpack.i.h.s16 %v11938_v46  ;;  %v2599_v53 = vrot.slane %v2589_v45, %v11278_v6  ;;  %10054 = vmatpush3.bf16.msra.mxu0 %v2987_v5  ;;  %10015 = vmatprep.mubr.msk.bf16.mxu0 %vm10939_vm0, %v13884_v51 }
 0x1cd   :  { %10034 = vmatmul.mubr.msk.bf16.vlgmr.msra.gmra.mrb[40].mxu1 %vm943_vm2, %v13961_v48  ;;  %v2606_v38 = vrot.slane %v2590_v47, %v11278_v6  ;;  %v2238_v19 = vcombine.low %v2230_v59, %v2237_v36  ;;  %v2573_v63 = vcombine.low %v2564_v39, %v2571_v13  ;;  %v2263_v48 = vcombine.low %v2248_v28, %v13963_v62  ;;  %v13965_v28 = vld [vmem:[#allocation70_spill] sm:$0xff] }
 0x1ce   :  { %10076 = vmatpush3.bf16.msra.mxu1 %v3296_v27  ;;  %10037 = vmatprep.mubr.msk.bf16.mxu1 %vm10939_vm0, %v13884_v51  ;;  %v12184_v61 = vpack.i.b16 %v12163_v23, %v13962_v31  ;;  %v13964_v27 = vunpack.i.h.s16 %v11697_v34  ;;  %v12198_v45 = vpack.i.b16 %v12152_v44, %v1791_v16  ;;  %v1793_v47 = vunpack.i.h.s16 %v11993_v58  ;;  %v13966_v16 = vld [vmem:[#allocation72_spill] sm:$0xff] }
 0x1cf   :  { %v2621_v31 = vcombine.low %v2599_v53, %v2606_v38  ;;  %v3070_v52 = vunpack.i.h.s16 %v12113_v54  ;;  %v2613_v36 = vrot.slane %v2591_v25, %v11278_v6  ;;  %v9516_v39 = vpack.i.b16 %v11697_v34, %v12163_v23 }
 0x1d0   :  { %v2464_v21 = vpack.i.b16 %v13964_v27, %v13856_v9  ;;  %v2280_v5 = vcombine.low %v11657_v15, %v11960_v56  ;;  %v2264_v13 = vcombine.low %v2255_v8, %v2262_v1  ;;  %v2281_v53 = vcombine.low %v12198_v45, %v13965_v28 }
 0x1d1   :  { %v2282_v38 = vcombine.low %v13966_v16, %v11609_v37  ;;  %v12214_v62 = vcombine.high %v11710_v22, %v11710_v22  ;;  %v2283_v34 = vcombine.low %v11938_v46, %v9516_v39  ;;  %v13967_v27 = vunpack.i.h.s16 %v11310_v32 }
 0x1d2   :  { %v2592_v59 = vcombine.low %v12184_v61, %v2464_v21  ;;  %v2580_v21 = vrot.slane %v2572_v7, %v11278_v6  ;;  %v2587_v8 = vrot.slane %v2573_v63, %v11278_v6  ;;  %v12223_v1 = vrot.slane %v2621_v31, %v11278_v6 }
 0x1d3   :  { %v3081_v9 = vpack.i.b16 %v13967_v27, %v3070_v52  ;;  %v2290_v28 = vrot.slane %v2280_v5, %v11278_v6  ;;  %v2297_v15 = vrot.slane %v2281_v53, %v11278_v6  ;;  %v2304_v7 = vrot.slane %v2282_v38, %v11278_v6  ;;  %10016 = vmatmul.mubr.msk.bf16.gmra.mrb[44].mxu0 %vm943_vm2, %v2238_v19 }
 0x1d4   :  { %v2620_v25 = vrot.slane %v2592_v59, %v11278_v6  ;;  %v2311_v59 = vrot.slane %v2283_v34, %v11278_v6  ;;  %v12231_v39 = vpack.i.b16 %v12214_v62, %v1793_v47  ;;  %v2785_v63 = vcombine.low %v11824_v30, %v12072_v60  ;;  %10019 = vmatprep.mubr.msk.bf16.mxu0 %vm10939_vm0, %v13884_v51 }
 0x1d5   :  { %10038 = vmatmul.mubr.msk.bf16.gmra.mrb[44].mxu1 %vm943_vm2, %v2547_v55  ;;  %v2271_v31 = vrot.slane %v2263_v48, %v11278_v6  ;;  %v2278_v52 = vrot.slane %v2264_v13, %v11278_v6  ;;  %v2638_v55 = vcombine.low %v11993_v58, %v12214_v62  ;;  %v3093_v53 = vcombine.low %v3081_v9, %v11383_v42 }
 0x1d6   :  { %v2622_v22 = vcombine.low %v2613_v36, %v2620_v25  ;;  %10041 = vmatprep.mubr.msk.bf16.mxu1 %vm10939_vm0, %v13884_v51  ;;  %v13968_v36 = vld [vmem:[#allocation48_spill] sm:$0xff]  ;;  %v2588_v30 = vcombine.low %v2580_v21, %v2587_v8  ;;  %v2312_v60 = vcombine.low %v2290_v28, %v2297_v15  ;;  %v3094_v48 = vcombine.low %v11800_v20, %v12042_v12 }
 0x1d7   :  { %v3092_v5 = vcombine.low %v13968_v36, %v12138_v26  ;;  %v2313_v38 = vcombine.low %v2304_v7, %v2311_v59  ;;  %v2329_v26 = vcombine.low %v12006_v33, %v12231_v39  ;;  %v9532_v19 = vpack.i.b16 %v11310_v32, %v12113_v54 }
 0x1d8   :  { %v2636_v47 = vrot.slane %v2622_v22, %v11278_v6  ;;  %v2806_v22 = vrot.slane %v2785_v63, %v11278_v6  ;;  %v2279_v42 = vcombine.low %v2271_v31, %v2278_v52  ;;  %v12257_v9 = vrot.slane %v2638_v55, %v11278_v6  ;;  %v13970_v31 = vld [vmem:[#allocation53_spill] sm:$0xff] }
 0x1d9   :  { %v2783_v15 = vcombine.low %v13952_v50, %v13958_v41  ;;  %v3101_v21 = vrot.slane %v3092_v5, %v11278_v6  ;;  %v3108_v25 = vrot.slane %v3093_v53, %v11278_v6  ;;  %v2784_v34 = vcombine.low %v9532_v19, %v11425_v0 }
 0x1da   :  { %v2637_v13 = vcombine.low %v12223_v1, %v2636_v47  ;;  %v2754_v33 = vcombine.high %v11800_v20, %v11800_v20  ;;  %v2320_v32 = vrot.slane %v2312_v60, %v11278_v6  ;;  %v3115_v54 = vrot.slane %v3094_v48, %v11278_v6  ;;  %v13972_v60 = vld [vmem:[#allocation51_spill] sm:$0xff] }
 0x1db   :  { %v2755_v27 = vcombine.high %v11803_v11, %v11803_v11  ;;  %v3134_v8 = vcombine.low %v11817_v4, %v12062_v18  ;;  %v2327_v41 = vrot.slane %v2313_v38, %v11278_v6  ;;  %v2336_v50 = vrot.slane %v2329_v26, %v11278_v6  ;;  %10020 = vmatmul.mubr.msk.bf16.gmra.mrb[48].mxu0 %vm943_vm2, %v2279_v42  ;;  %v13973_v42 = vld [vmem:[#allocation80_spill] sm:$0xff] }
 0x1dc   :  { %v3133_v0 = vcombine.low %v2754_v33, %v11473_v3  ;;  %v2445_v20 = vunpack.i.h.s16 %v12042_v12  ;;  %v2792_v1 = vrot.slane %v2783_v15, %v11278_v6  ;;  %v13969_v7 = vunpack.i.h.s16 %v12046_v35  ;;  %10023 = vmatprep.mubr.msk.bf16.mxu0 %vm10939_vm0, %v13884_v51 }
 0x1dd   :  { %10042 = vmatmul.mubr.msk.bf16.gmra.mrb[48].mxu1 %vm943_vm2, %v2588_v30  ;;  %v3072_v28 = vunpack.i.h.s16 %v2755_v27  ;;  %v3149_v4 = vrot.slane %v3134_v8, %v11278_v6  ;;  %v2799_v18 = vrot.slane %v2784_v34, %v11278_v6  ;;  %v9534_v12 = vpack.i.b16 %v13970_v31, %v2755_v27 }
 0x1de   :  { %10045 = vmatprep.mubr.msk.bf16.mxu1 %vm10939_vm0, %v13884_v51  ;;  %v9546_v59 = vpack.i.b16 %v2755_v27, %v13969_v7  ;;  %v3142_v63 = vrot.slane %v3133_v0, %v11278_v6  ;;  %v9533_v3 = vpack.i.b16 %v2754_v33, %v2445_v20  ;;  %v3116_v52 = vcombine.low %v11394_v49, %v3101_v21 }
 0x1df   :  { %v13971_v55 = vunpack.i.h.s16 %v13970_v31  ;;  %v2825_v5 = vcombine.low %v11404_v57, %v11803_v11  ;;  %v12296_v47 = vcombine.high %v11863_v24, %v11863_v24  ;;  %v3117_v53 = vcombine.low %v3108_v25, %v3115_v54  ;;  %v13974_v11 = vld [vmem:[#allocation78_spill] sm:$0xff]  ;;  %v13975_v25 = vld [vmem:[#allocation79_spill] sm:$0xff] }
 0x1e0   :  { %v3157_v30 = vcombine.low %v3142_v63, %v3149_v4  ;;  %v2824_v48 = vcombine.low %v9533_v3, %v13972_v60  ;;  %v2826_v38 = vcombine.low %v12046_v35, %v9534_v12  ;;  %v2328_v26 = vcombine.low %v2320_v32, %v2327_v41  ;;  %v13976_v41 = vld [vmem:[#allocation57_spill] sm:$0xff] }
 0x1e1   :  { %v3084_v36 = vpack.i.b16 %v13971_v55, %v3072_v28  ;;  %v2840_v49 = vrot.slane %v2825_v5, %v11278_v6  ;;  %v2807_v15 = vcombine.low %v13973_v42, %v2792_v1  ;;  %v2808_v21 = vcombine.low %v2799_v18, %v2806_v22 }
 0x1e2   :  { %v2833_v34 = vrot.slane %v2824_v48, %v11278_v6  ;;  %v2847_v57 = vrot.slane %v2826_v38, %v11278_v6  ;;  %v2646_v33 = vcombine.low %v13974_v11, %v12257_v9  ;;  %v2337_v54 = vcombine.low %v13975_v25, %v2336_v50  ;;  %v13977_v9 = vld [vmem:[#allocation82_spill] sm:$0xff] }
 0x1e3   :  { %v3135_v19 = vcombine.low %v9546_v59, %v3084_v36  ;;  %v3074_v35 = vunpack.i.h.s16 %v12296_v47  ;;  %v12311_v32 = vrot.slane %v3116_v52, %v11278_v6  ;;  %v12314_v22 = vrot.slane %v3117_v53, %v11278_v6  ;;  %10024 = vmatmul.mubr.msk.bf16.gmra.mrb[52].mxu0 %vm943_vm2, %v2328_v26 }
 0x1e4   :  { %v2848_v8 = vcombine.low %v2833_v34, %v2840_v49  ;;  %v2849_v0 = vcombine.low %v2847_v57, %v13976_v41  ;;  %v12321_v20 = vrot.slane %v3157_v30, %v11278_v6  ;;  %v2447_v1 = vunpack.i.h.s16 %v12090_v43  ;;  %10027 = vmatprep.mubr.msk.bf16.mxu0 %vm10939_vm0, %v13884_v51  ;;  %v13981_v30 = vld [vmem:[#allocation54_spill] sm:$0xff] }
 0x1e5   :  { %v3156_v27 = vrot.slane %v3135_v19, %v11278_v6  ;;  %10046 = vmatmul.mubr.msk.bf16.gmra.mrb[52].mxu1 %vm943_vm2, %v2637_v13  ;;  %v13978_v13 = vld [vmem:[#allocation81_spill] sm:$0xff]  ;;  %v2815_v7 = vrot.slane %v2807_v15, %v11278_v6  ;;  %v2822_v59 = vrot.slane %v2808_v21, %v11278_v6  ;;  %v13979_v43 = vunpack.i.h.s16 %v12094_v2 }
 0x1e6   :  { %10049 = vmatprep.mubr.msk.bf16.mxu1 %vm10939_vm0, %v13884_v51  ;;  %v2756_v28 = vcombine.high %v13978_v13, %v13978_v13  ;;  %v2856_v4 = vrot.slane %v2848_v8, %v11278_v6  ;;  %v2863_v18 = vrot.slane %v2849_v0, %v11278_v6  ;;  %v13980_v31 = vunpack.i.h.s16 %v13927_v29 }
 0x1e7   :  { %v3158_v50 = vcombine.low %v3156_v27, %v13977_v9  ;;  %v9547_v3 = vpack.i.b16 %v12296_v47, %v13979_v43  ;;  %v2653_v52 = vrot.slane %v2646_v33, %v11278_v6  ;;  %v2449_v36 = vunpack.i.h.s16 %v12152_v44  ;;  %v13982_v33 = vld [vmem:[#allocation76_spill] sm:$0xff] }
 0x1e8   :  { %v3087_v12 = vpack.i.b16 %v13980_v31, %v3074_v35  ;;  %v12342_v55 = vcombine.low %v2856_v4, %v2863_v18  ;;  %v2344_v5 = vrot.slane %v2337_v54, %v11278_v6  ;;  %v9549_v60 = vcombine.high %v13981_v30, %v13978_v13 }
 0x1e9   :  { %v12334_v63 = vrot.slane %v3158_v50, %v11278_v6  ;;  %v9535_v48 = vpack.i.b16 %v2756_v28, %v2447_v1  ;;  %v3132_v38 = vcombine.low %v12311_v32, %v12314_v22  ;;  %v2823_v26 = vcombine.low %v2815_v7, %v2822_v59  ;;  %v13986_v32 = vld [vmem:[#allocation63_spill] sm:$0xff]  ;;  %v13987_v22 = vld [vmem:[#allocation74_spill] sm:$0xff]  ;;  %v13988_v7 = vld [vmem:[#allocation77_spill] sm:$0xff] }
 0x1ea   :  { %v2758_v19 = vcombine.high %v11935_v40, %v11935_v40  ;;  %v2759_v49 = vcombine.high %v11938_v46, %v11938_v46  ;;  %v3175_v42 = vcombine.low %v12105_v14, %v9547_v3  ;;  %v3176_v15 = vcombine.low %v3087_v12, %v11598_v17 }
 0x1eb   :  { %v3173_v53 = vcombine.low %v12321_v20, %v12334_v63  ;;  %v2906_v21 = vcombine.low %v11960_v56, %v12198_v45  ;;  %v2908_v34 = vcombine.low %v11609_v37, %v11938_v46  ;;  %v9536_v57 = vpack.i.b16 %v13927_v29, %v12296_v47  ;;  %v13983_v56 = vld [vmem:[#allocation61_spill] sm:$0xff]  ;;  %10028 = vmatmul.mubr.msk.bf16.gmra.mrb[56].mxu0 %vm943_vm2, %v2344_v5 }
 0x1ec   :  { %v9537_v11 = vpack.i.b16 %v2758_v19, %v2449_v36  ;;  %v9538_v25 = vpack.i.b16 %v13982_v33, %v2759_v49  ;;  %v3215_v54 = vcombine.low %v11935_v40, %v12152_v44  ;;  %v3183_v17 = vrot.slane %v9549_v60, %v11278_v6  ;;  %10055 = vmatprep.mubr.msk.bf16.mxu0 %vm10939_vm0, %v13884_v51 }
 0x1ed   :  { %10050 = vmatmul.mubr.msk.bf16.gmra.mrb[56].mxu1 %vm943_vm2, %v2653_v52  ;;  %v2865_v14 = vcombine.low %v13983_v56, %v9535_v48  ;;  %v2866_v37 = vcombine.low %v11863_v24, %v12094_v2  ;;  %v3076_v46 = vunpack.i.h.s16 %v2759_v49  ;;  %v2916_v47 = vrot.slane %v2906_v21, %v11278_v6 }
 0x1ee   :  { %10077 = vmatprep.mubr.msk.bf16.mxu1 %vm10939_vm0, %v13884_v51  ;;  %v2907_v29 = vcombine.low %v9537_v11, %v13966_v16  ;;  %v2909_v45 = vcombine.low %v12163_v23, %v9538_v25  ;;  %v2930_v40 = vrot.slane %v2908_v34, %v11278_v6  ;;  %v13984_v44 = vunpack.i.h.s16 %v12163_v23 }
 0x1ef   :  { %v13985_v35 = vunpack.i.h.s16 %v13982_v33  ;;  %v3216_v2 = vcombine.low %v2758_v19, %v11686_v10  ;;  %v3217_v16 = vcombine.low %v13986_v32, %v12184_v61  ;;  %v2867_v8 = vcombine.low %v9536_v57, %v13987_v22  ;;  %v13989_v19 = vld [vmem:[#allocation58_spill] sm:$0xff]  ;;  %v13991_v33 = vld [vmem:[#allocation55_spill] sm:$0xff] }
 0x1f0   :  { %v9548_v27 = vpack.i.b16 %v2759_v49, %v13984_v44  ;;  %v2923_v41 = vrot.slane %v2907_v29, %v11278_v6  ;;  %v2937_v0 = vrot.slane %v2909_v45, %v11278_v6  ;;  %v3225_v9 = vrot.slane %v3215_v54, %v11278_v6  ;;  %v13992_v54 = vld [vmem:[#allocation65_spill] sm:$0xff] }
 0x1f1   :  { %v3090_v24 = vpack.i.b16 %v13985_v35, %v3076_v46  ;;  %v3232_v23 = vrot.slane %v3216_v2, %v11278_v6  ;;  %v3239_v1 = vrot.slane %v3217_v16, %v11278_v6  ;;  %v2451_v13 = vunpack.i.h.s16 %v12214_v62 }
 0x1f2   :  { %v2938_v28 = vcombine.low %v2916_v47, %v2923_v41  ;;  %v2939_v10 = vcombine.low %v2930_v40, %v2937_v0  ;;  %v2760_v61 = vcombine.high %v11993_v58, %v11993_v58  ;;  %v9550_v59 = vcombine.high %v13988_v7, %v11993_v58 }
 0x1f3   :  { %v3218_v50 = vcombine.low %v9548_v27, %v3090_v24  ;;  %v3190_v4 = vrot.slane %v3175_v42, %v11278_v6  ;;  %v3197_v18 = vrot.slane %v3176_v15, %v11278_v6  ;;  %v3247_v3 = vcombine.low %v3225_v9, %v3232_v23  ;;  %10056 = vmatmul.mubr.msk.bf16.vlgmr.msra.gmra.mrb[60].mxu0 %vm943_vm2, %v2823_v26  ;;  %v13990_v15 = vld [vmem:[#allocation56_spill] sm:$0xff] }
 0x1f4   :  { %v2946_v31 = vrot.slane %v2938_v28, %v11278_v6  ;;  %v2953_v62 = vrot.slane %v2939_v10, %v11278_v6  ;;  %v9539_v12 = vpack.i.b16 %v2760_v61, %v2451_v13  ;;  %v3271_v52 = vrot.slane %v9550_v59, %v11278_v6  ;;  %10059 = vmatprep.mubr.msk.bf16.mxu0 %vm10939_vm0, %v13884_v51  ;;  %v10285_v13 = vld [vmem:[#allocation12 + $0x4] ss:$8 sps:$4 sm:$0xff]   ;;  %v10283_v28 = vld [vmem:[#allocation12] ss:$8 sps:$4 sm:$0xff]  }
 0x1f5   :  { %v3246_v43 = vrot.slane %v3218_v50, %v11278_v6  ;;  %10078 = vmatmul.mubr.msk.bf16.vlgmr.msra.gmra.mrb[60].mxu1 %vm943_vm2, %v3132_v38  ;;  %v2874_v58 = vrot.slane %v2865_v14, %v11278_v6  ;;  %v2881_v36 = vrot.slane %v2866_v37, %v11278_v6  ;;  %v3255_v30 = vrot.slane %v3247_v3, %v11278_v6 }
 0x1f6   :  { %10081 = vmatprep.mubr.msk.bf16.mxu1 %vm10939_vm0, %v13884_v51  ;;  %v2888_v60 = vrot.slane %v2867_v8, %v11278_v6  ;;  %v2954_v48 = vcombine.low %v2946_v31, %v2953_v62  ;;  %v2955_v38 = vcombine.low %v12231_v39, %v9539_v12  ;;  %v3272_v49 = vcombine.low %v13989_v19, %v3271_v52  ;;  %v10291_v12 = vld [vmem:[#allocation12 + $0x24] ss:$8 sps:$4 sm:$0xff]   ;;  %v10294_v19 = vld [vmem:[#allocation12 + $0x34] ss:$8 sps:$4 sm:$0xff]  }
 0x1f7   :  { %v3248_v5 = vcombine.low %v3239_v1, %v3246_v43  ;;  %v3198_v21 = vcombine.low %v3183_v17, %v13990_v15  ;;  %v3199_v34 = vcombine.low %v3190_v4, %v3197_v18  ;;  %v2889_v26 = vcombine.low %v2874_v58, %v13991_v33  ;;  %5801 = vmatprep.subr.bf16.mxu0 %v10285_v13  ;;  %v10288_v4 = vld [vmem:[#allocation12 + $0x14] ss:$8 sps:$4 sm:$0xff]   ;;  %v10286_v18 = vld [vmem:[#allocation12 + $0x10] ss:$8 sps:$4 sm:$0xff]  }
 0x1f8   :  { %v2962_v57 = vrot.slane %v2955_v38, %v11278_v6  ;;  %v2890_v25 = vcombine.low %v2881_v36, %v2888_v60  ;;  %5802 = vmatpush1.bf16.msra.mxu0 %v10283_v28  ;;  %v10289_v36 = vld [vmem:[#allocation12 + $0x20] ss:$8 sps:$4 sm:$0xff]   ;;  %v10292_v15 = vld [vmem:[#allocation12 + $0x30] ss:$8 sps:$4 sm:$0xff]  }
 0x1f9   :  { %v3262_v42 = vrot.slane %v3248_v5, %v11278_v6  ;;  %v3206_v39 = vrot.slane %v3198_v21, %v11278_v6  ;;  %v3213_v14 = vrot.slane %v3199_v34, %v11278_v6  ;;  %v2897_v17 = vrot.slane %v2889_v26, %v11278_v6  ;;  %5803 = vmatprep.subr.bf16.mxu0 %v10288_v4  ;;  %v10295_v26 = vld [vmem:[#allocation12 + $0x40] ss:$8 sps:$4 sm:$0xff]   ;;  %v10306_v4 = vld [vmem:[#allocation12 + $0x74] ss:$8 sps:$4 sm:$0xff]  }
 0x1fa   :  { %v2963_v56 = vcombine.low %v13992_v54, %v2962_v57  ;;  %v2904_v37 = vrot.slane %v2890_v25, %v11278_v6 }
 0x1fb   :  { %v3263_v11 = vcombine.low %v3255_v30, %v3262_v42  ;;  %10060 = vmatmul.mubr.msk.bf16.gmra.mrb[64].mxu0 %vm943_vm2, %v12342_v55  ;;  %v3214_v20 = vcombine.low %v3206_v39, %v3213_v14  ;;  %v3279_v55 = vrot.slane %v3272_v49, %v11278_v6 }
 0x1fc   :  { %10063 = vmatprep.mubr.msk.bf16.mxu0 %vm10939_vm0, %v13884_v51  ;;  %v2905_v63 = vcombine.low %v2897_v17, %v2904_v37  ;;  %5804 = vmatpush1.bf16.msra.mxu0 %v10286_v18  ;;  %v10304_v18 = vld [vmem:[#allocation12 + $0x70] ss:$8 sps:$4 sm:$0xff]  }
 0x1fd   :  { %10082 = vmatmul.mubr.msk.bf16.gmra.mrb[64].mxu1 %vm943_vm2, %v3173_v53  ;;  %v2970_v53 = vrot.slane %v2963_v56, %v11278_v6  ;;  %5805 = vmatprep.subr.bf16.mxu0 %v10291_v12 }
 0x1fe   :  { %10085 = vmatprep.mubr.msk.bf16.mxu1 %vm10939_vm0, %v13884_v51 }
 0x200   :  { %5806 = vmatpush1.bf16.msra.mxu0 %v10289_v36 }
 0x201   :  { %5807 = vmatprep.subr.bf16.mxu0 %v10294_v19 }
 0x203   :  { %10064 = vmatmul.mubr.msk.bf16.gmra.mrb[68].mxu0 %vm943_vm2, %v2905_v63  ;;  %v10300_v63 = vld [vmem:[#allocation12 + $0x54] ss:$8 sps:$4 sm:$0xff]  }
 0x204   :  { %10067 = vmatprep.mubr.msk.bf16.mxu0 %vm10939_vm0, %v13884_v51  ;;  %5808 = vmatpush1.bf16.msra.mxu0 %v10292_v15  ;;  %v10310_v15 = vld [vmem:[#allocation12 + $0x90] ss:$8 sps:$4 sm:$0xff]  }
 0x205   :  { %10086 = vmatmul.mubr.msk.bf16.gmra.mrb[68].mxu1 %vm943_vm2, %v3214_v20 }
 0x206   :  { %10089 = vmatprep.mubr.msk.bf16.mxu1 %vm10939_vm0, %v13884_v51 }
 0x20b   :  { %10068 = vmatmul.mubr.msk.bf16.gmra.mrb[72].mxu0 %vm943_vm2, %v2954_v48 }
 0x20c   :  { %10071 = vmatprep.mubr.msk.bf16.mxu0 %vm10939_vm0, %v13884_v51 }
 0x20d   :  { %10090 = vmatmul.mubr.msk.bf16.gmra.mrb[72].mxu1 %vm943_vm2, %v3263_v11  ;;  %v10297_v11 = vld [vmem:[#allocation12 + $0x44] ss:$8 sps:$4 sm:$0xff]  }
 0x20e   :  { %10093 = vmatprep.mubr.msk.bf16.mxu1 %vm10939_vm0, %v13884_v51  ;;  %5809 = vmatprep.subr.bf16.mxu0 %v10297_v11 }
 0x20f   :  { %5810 = vmatpush1.bf16.msra.mxu0 %v10295_v26 }
 0x210   :  { %5811 = vmatprep.subr.bf16.mxu0 %v10300_v63  ;;  %v10318_v63 = vld [vmem:[#allocation12 + $0xb4] ss:$8 sps:$4 sm:$0xff]  }
 0x213   :  { %10072 = vmatmul.mubr.msk.bf16.gmra.mrb[76].mxu0 %vm943_vm2, %v2970_v53 }
 0x215   :  { %10094 = vmatmul.mubr.msk.bf16.gmra.mrb[76].mxu1 %vm943_vm2, %v3279_v55  ;;  %v10298_v55 = vld [vmem:[#allocation12 + $0x50] ss:$8 sps:$4 sm:$0xff]  }
 0x216   :  { %5812 = vmatpush1.bf16.msra.mxu0 %v10298_v55  ;;  %v10316_v55 = vld [vmem:[#allocation12 + $0xb0] ss:$8 sps:$4 sm:$0xff]  }
 0x233   :  { %v1343_v46 = vpop.f32.mrb[0].mxu1 }
 0x234   :  { %v9947_v29 = vpop.f32.mrb[1].mxu1 }
 0x235   :  { %v1346_v45 = vpop.f32.mrb[2].mxu1 }
 0x236   :  { %v9948_v47 = vpop.f32.mrb[3].mxu1 }
 0x239   :  { %v997_v40 = vpop.f32.mrb[0].mxu0 }
 0x23a   :  { %v12452_v44 = vadd.f32 %v1343_v46, %v997_v40  ;;  %v9925_v27 = vpop.f32.mrb[1].mxu0 }
 0x23b   :  { %v1000_v35 = vpop.f32.mrb[2].mxu0 }
 0x23c   :  { %v12454_v24 = vadd.f32 %v1346_v45, %v1000_v35  ;;  %v9926_v2 = vpop.f32.mrb[3].mxu0 }
 0x247   :  { %v1351_v32 = vpop.f32.mrb[4].mxu1 }
 0x248   :  { %v1005_v16 = vpop.f32.mrb[4].mxu0  ;;  %v9951_v22 = vpop.f32.mrb[5].mxu1 }
 0x249   :  { %v12456_v8 = vadd.f32 %v1351_v32, %v1005_v16  ;;  %v9929_v41 = vpop.f32.mrb[5].mxu0  ;;  %v1354_v0 = vpop.f32.mrb[6].mxu1 }
 0x24a   :  { %v1008_v9 = vpop.f32.mrb[6].mxu0  ;;  %v9952_v50 = vpop.f32.mrb[7].mxu1 }
 0x24b   :  { %v12458_v23 = vadd.f32 %v1354_v0, %v1008_v9  ;;  %v9930_v1 = vpop.f32.mrb[7].mxu0  ;;  %v10303_v0 = vld [vmem:[#allocation12 + $0x64] ss:$8 sps:$4 sm:$0xff]   ;;  %v10301_v50 = vld [vmem:[#allocation12 + $0x60] ss:$8 sps:$4 sm:$0xff]  }
 0x24c   :  { %5813 = vmatprep.subr.bf16.mxu0 %v10303_v0  ;;  %v10322_v0 = vld [vmem:[#allocation12 + $0xd0] ss:$8 sps:$4 sm:$0xff]  }
 0x24d   :  { %5814 = vmatpush1.bf16.msra.mxu0 %v10301_v50  ;;  %v10327_v50 = vld [vmem:[#allocation12 + $0xe4] ss:$8 sps:$4 sm:$0xff]  }
 0x24e   :  { %5815 = vmatprep.subr.bf16.mxu0 %v10306_v4 }
 0x251   :  { %5816 = vmatpush1.bf16.msra.mxu0 %v10304_v18  ;;  %v10328_v18 = vld [vmem:[#allocation12 + $0xf0] ss:$8 sps:$4 sm:$0xff]  }
 0x252   :  { %v1359_v10 = vpop.f32.mrb[8].mxu1 }
 0x253   :  { %v9955_v61 = vpop.f32.mrb[9].mxu1 }
 0x254   :  { %v1362_v7 = vpop.f32.mrb[10].mxu1 }
 0x255   :  { %v9956_v59 = vpop.f32.mrb[11].mxu1 }
 0x257   :  { %v1013_v43 = vpop.f32.mrb[8].mxu0 }
 0x258   :  { %v12460_v3 = vadd.f32 %v1359_v10, %v1013_v43  ;;  %v9933_v31 = vpop.f32.mrb[9].mxu0 }
 0x259   :  { %v1016_v62 = vpop.f32.mrb[10].mxu0 }
 0x25a   :  { %v12462_v52 = vadd.f32 %v1362_v7, %v1016_v62  ;;  %v9934_v58 = vpop.f32.mrb[11].mxu0 }
 0x25b   :  { %v10309_v58 = vld [vmem:[#allocation12 + $0x84] ss:$8 sps:$4 sm:$0xff]  }
 0x25c   :  { %5817 = vmatprep.subr.bf16.mxu0 %v10309_v58 }
 0x262   :  { %v1367_v5 = vpop.f32.mrb[12].mxu1 }
 0x263   :  { %v9959_v30 = vpop.f32.mrb[13].mxu1 }
 0x264   :  { %v1370_v60 = vpop.f32.mrb[14].mxu1 }
 0x265   :  { %v9960_v48 = vpop.f32.mrb[15].mxu1 }
 0x266   :  { %v1021_v38 = vpop.f32.mrb[12].mxu0 }
 0x267   :  { %v12464_v49 = vadd.f32 %v1367_v5, %v1021_v38  ;;  %v9937_v42 = vpop.f32.mrb[13].mxu0 }
 0x268   :  { %v1024_v21 = vpop.f32.mrb[14].mxu0  ;;  %v10312_v42 = vld [vmem:[#allocation12 + $0x94] ss:$8 sps:$4 sm:$0xff]  }
 0x269   :  { %v12466_v34 = vadd.f32 %v1370_v60, %v1024_v21  ;;  %v9938_v57 = vpop.f32.mrb[15].mxu0 }
 0x26a   :  { %v1375_v33 = vpop.f32.mrb[16].mxu1 }
 0x26b   :  { %v9963_v25 = vpop.f32.mrb[17].mxu1 }
 0x26c   :  { %v1378_v54 = vpop.f32.mrb[18].mxu1  ;;  %v10313_v25 = vld [vmem:[#allocation12 + $0xa0] ss:$8 sps:$4 sm:$0xff]  }
 0x26d   :  { %v9964_v39 = vpop.f32.mrb[19].mxu1 }
 0x26e   :  { %v1029_v56 = vpop.f32.mrb[16].mxu0 }
 0x26f   :  { %v12468_v14 = vadd.f32 %v1375_v33, %v1029_v56  ;;  %v9941_v17 = vpop.f32.mrb[17].mxu0  ;;  %v10315_v33 = vld [vmem:[#allocation12 + $0xa4] ss:$8 sps:$4 sm:$0xff]  }
 0x270   :  { %v1032_v37 = vpop.f32.mrb[18].mxu0 }
 0x271   :  { %v9942_v20 = vpop.f32.mrb[19].mxu0 }
 0x272   :  { %v2080_v53 = vpop.f32.mrb[20].mxu1 }
 0x273   :  { %v9991_v46 = vpop.f32.mrb[21].mxu1 }
 0x274   :  { %v2083_v29 = vpop.f32.mrb[22].mxu1 }
 0x275   :  { %v9992_v47 = vpop.f32.mrb[23].mxu1 }
 0x276   :  { %v1739_v45 = vpop.f32.mrb[20].mxu0 }
 0x277   :  { %v1777_v40 = vadd.f32 %v1739_v45, %v12452_v44  ;;  %v9969_v27 = vpop.f32.mrb[21].mxu0  ;;  %v10321_v45 = vld [vmem:[#allocation12 + $0xc4] ss:$8 sps:$4 sm:$0xff]  }
 0x278   :  { %v1742_v35 = vpop.f32.mrb[22].mxu0 }
 0x279   :  { %v1778_v2 = vadd.f32 %v1742_v35, %v12454_v24  ;;  %v9970_v32 = vpop.f32.mrb[23].mxu0  ;;  %v12472_v16 = vadd.f32 %v2080_v53, %v1777_v40  ;;  %v10319_v40 = vld [vmem:[#allocation12 + $0xc0] ss:$8 sps:$4 sm:$0xff]  }
 0x27b   :  { %v2088_v22 = vpop.f32.mrb[24].mxu1  ;;  %v12474_v41 = vadd.f32 %v2083_v29, %v1778_v2 }
 0x27c   :  { %v9995_v9 = vpop.f32.mrb[25].mxu1 }
 0x27d   :  { %v2091_v1 = vpop.f32.mrb[26].mxu1  ;;  %v10324_v9 = vld [vmem:[#allocation12 + $0xd4] ss:$8 sps:$4 sm:$0xff]  }
 0x27e   :  { %v1747_v13 = vpop.f32.mrb[24].mxu0  ;;  %v9996_v28 = vpop.f32.mrb[27].mxu1 }
 0x27f   :  { %v1779_v44 = vadd.f32 %v1747_v13, %v12456_v8  ;;  %v9973_v10 = vpop.f32.mrb[25].mxu0  ;;  %v10307_v8 = vld [vmem:[#allocation12 + $0x80] ss:$8 sps:$4 sm:$0xff]  }
 0x280   :  { %v1750_v61 = vpop.f32.mrb[26].mxu0  ;;  %5818 = vmatpush1.bf16.msra.mxu0 %v10307_v8  ;;  %v10325_v13 = vld [vmem:[#allocation12 + $0xe0] ss:$8 sps:$4 sm:$0xff]  }
 0x281   :  { %v1780_v24 = vadd.f32 %v1750_v61, %v12458_v23  ;;  %v9974_v7 = vpop.f32.mrb[27].mxu0  ;;  %v12478_v59 = vadd.f32 %v2088_v22, %v1779_v44  ;;  %5819 = vmatprep.subr.bf16.mxu0 %v10312_v42  ;;  %v10330_v44 = vld [vmem:[#allocation12 + $0xf4] ss:$8 sps:$4 sm:$0xff]  }
 0x283   :  { %v12480_v31 = vadd.f32 %v2091_v1, %v1780_v24 }
 0x284   :  { %v2096_v43 = vpop.f32.mrb[28].mxu1  ;;  %5820 = vmatpush1.bf16.msra.mxu0 %v10310_v15 }
 0x285   :  { %v9999_v62 = vpop.f32.mrb[29].mxu1  ;;  %5821 = vmatprep.subr.bf16.mxu0 %v10315_v33 }
 0x286   :  { %v2099_v12 = vpop.f32.mrb[30].mxu1  ;;  %v1755_v36 = vpop.f32.mrb[28].mxu0 }
 0x287   :  { %v10000_v5 = vpop.f32.mrb[31].mxu1  ;;  %v1781_v30 = vadd.f32 %v1755_v36, %v12460_v3  ;;  %v9977_v60 = vpop.f32.mrb[29].mxu0 }
 0x288   :  { %v1758_v23 = vpop.f32.mrb[30].mxu0  ;;  %5822 = vmatpush1.bf16.msra.mxu0 %v10313_v25 }
 0x289   :  { %v1782_v48 = vadd.f32 %v1758_v23, %v12462_v52  ;;  %v9978_v38 = vpop.f32.mrb[31].mxu0  ;;  %v12484_v19 = vadd.f32 %v2096_v43, %v1781_v30  ;;  %5823 = vmatprep.subr.bf16.mxu0 %v10318_v63 }
 0x28b   :  { %v12486_v21 = vadd.f32 %v2099_v12, %v1782_v48 }
 0x28c   :  { %5824 = vmatpush1.bf16.msra.mxu0 %v10316_v55 }
 0x28d   :  { %5825 = vmatprep.subr.bf16.mxu0 %v10321_v45 }
 0x28e   :  { %v1763_v26 = vpop.f32.mrb[32].mxu0 }
 0x28f   :  { %v2104_v57 = vpop.f32.mrb[32].mxu1  ;;  %v1783_v54 = vadd.f32 %v1763_v26, %v12464_v49  ;;  %v9981_v56 = vpop.f32.mrb[33].mxu0 }
 0x290   :  { %v10003_v11 = vpop.f32.mrb[33].mxu1  ;;  %v1766_v52 = vpop.f32.mrb[34].mxu0  ;;  %5826 = vmatpush1.bf16.msra.mxu0 %v10319_v40 }
 0x291   :  { %v2107_v3 = vpop.f32.mrb[34].mxu1  ;;  %v1784_v17 = vadd.f32 %v1766_v52, %v12466_v34  ;;  %v9982_v37 = vpop.f32.mrb[35].mxu0  ;;  %v12490_v20 = vadd.f32 %v2104_v57, %v1783_v54  ;;  %5827 = vmatprep.subr.bf16.mxu0 %v10324_v9 }
 0x292   :  { %v10004_v39 = vpop.f32.mrb[35].mxu1 }
 0x293   :  { %v12492_v53 = vadd.f32 %v2107_v3, %v1784_v17 }
 0x294   :  { %5828 = vmatpush1.bf16.msra.mxu0 %v10322_v0 }
 0x295   :  { %5829 = vmatprep.subr.bf16.mxu0 %v10327_v50 }
 0x296   :  { %v1771_v49 = vpop.f32.mrb[36].mxu0 }
 0x297   :  { %v2112_v46 = vpop.f32.mrb[36].mxu1  ;;  %v1785_v27 = vadd.f32 %v1771_v49, %v12468_v14  ;;  %v9985_v35 = vpop.f32.mrb[37].mxu0 }
 0x298   :  { %v10007_v29 = vpop.f32.mrb[37].mxu1  ;;  %v1774_v34 = vpop.f32.mrb[38].mxu0  ;;  %5830 = vmatpush1.bf16.msra.mxu0 %v10325_v13 }
 0x299   :  { %v2115_v47 = vpop.f32.mrb[38].mxu1  ;;  %v9986_v32 = vpop.f32.mrb[39].mxu0  ;;  %v12495_v22 = vadd.f32 %v2112_v46, %v1785_v27  ;;  %5831 = vmatprep.subr.bf16.mxu0 %v10330_v44 }
 0x29a   :  { %v10008_v2 = vpop.f32.mrb[39].mxu1 }
 0x29c   :  { %5832 = vmatpush1.bf16.msra.mxu0 %v10328_v18 }
 0x29e   :  { %v2397_v10 = vpop.f32.mrb[40].mxu0 }
 0x29f   :  { %v2435_v61 = vadd.f32 %v2397_v10, %v12472_v16  ;;  %v10013_v24 = vpop.f32.mrb[41].mxu0 }
 0x2a0   :  { %v2706_v1 = vpop.f32.mrb[40].mxu1  ;;  %v2400_v4 = vpop.f32.mrb[42].mxu0 }
 0x2a1   :  { %v10035_v28 = vpop.f32.mrb[41].mxu1  ;;  %v2436_v43 = vadd.f32 %v2400_v4, %v12474_v41  ;;  %v10014_v62 = vpop.f32.mrb[43].mxu0  ;;  %v2744_v12 = vadd.f32 %v2706_v1, %v2435_v61 }
 0x2a2   :  { %v2709_v14 = vpop.f32.mrb[42].mxu1 }
 0x2a3   :  { %v10036_v7 = vpop.f32.mrb[43].mxu1  ;;  %v2745_v58 = vadd.f32 %v2709_v14, %v2436_v43 }
 0x2a4   :  { %v12518_v7 = vld [vmem:[#allocation10] ss:$0 sm:$0xff] }
 0x2a6   :  { %v2405_v8 = vpop.f32.mrb[44].mxu0 }
 0x2a7   :  { %v2437_v60 = vadd.f32 %v2405_v8, %v12478_v59  ;;  %v10017_v23 = vpop.f32.mrb[45].mxu0 }
 0x2a8   :  { %v2714_v36 = vpop.f32.mrb[44].mxu1  ;;  %v2408_v48 = vpop.f32.mrb[46].mxu0 }
 0x2a9   :  { %v10039_v5 = vpop.f32.mrb[45].mxu1  ;;  %v2438_v38 = vadd.f32 %v2408_v48, %v12480_v31  ;;  %v10018_v42 = vpop.f32.mrb[47].mxu0  ;;  %v2746_v15 = vadd.f32 %v2714_v36, %v2437_v60 }
 0x2aa   :  { %v2717_v30 = vpop.f32.mrb[46].mxu1 }
 0x2ab   :  { %v10040_v16 = vpop.f32.mrb[47].mxu1  ;;  %v12501_v57 = vadd.f32 %v2717_v30, %v2438_v38 }
 0x2ae   :  { %v2413_v33 = vpop.f32.mrb[48].mxu0 }
 0x2af   :  { %v2439_v3 = vadd.f32 %v2413_v33, %v12484_v19  ;;  %v10021_v25 = vpop.f32.mrb[49].mxu0 }
 0x2b0   :  { %v2722_v41 = vpop.f32.mrb[48].mxu1  ;;  %v2416_v56 = vpop.f32.mrb[50].mxu0 }
 0x2b1   :  { %v10043_v11 = vpop.f32.mrb[49].mxu1  ;;  %v2440_v59 = vadd.f32 %v2416_v56, %v12486_v21  ;;  %v10022_v39 = vpop.f32.mrb[51].mxu0  ;;  %v12505_v52 = vadd.f32 %v2722_v41, %v2439_v3  ;;  %v10333_v21 = vld [vmem:[#allocation12 + $0x104] ss:$8 sps:$4 sm:$0xff]  }
 0x2b2   :  { %v2725_v26 = vpop.f32.mrb[50].mxu1  ;;  %5862 = vmatprep.subr.bf16.mxu0 %v10333_v21 }
 0x2b3   :  { %v10044_v54 = vpop.f32.mrb[51].mxu1  ;;  %v12507_v17 = vadd.f32 %v2725_v26, %v2440_v59 }
 0x2b6   :  { %v2421_v63 = vpop.f32.mrb[52].mxu0 }
 0x2b7   :  { %v2441_v46 = vadd.f32 %v2421_v63, %v12490_v20  ;;  %v10025_v29 = vpop.f32.mrb[53].mxu0 }
 0x2b8   :  { %v2730_v31 = vpop.f32.mrb[52].mxu1  ;;  %v2424_v49 = vpop.f32.mrb[54].mxu0 }
 0x2b9   :  { %v10047_v37 = vpop.f32.mrb[53].mxu1  ;;  %v2442_v19 = vadd.f32 %v2424_v49, %v12492_v53  ;;  %v10026_v47 = vpop.f32.mrb[55].mxu0  ;;  %v12511_v40 = vadd.f32 %v2730_v31, %v2441_v46 }
 0x2ba   :  { %v2733_v55 = vpop.f32.mrb[54].mxu1 }
 0x2bb   :  { %v10048_v45 = vpop.f32.mrb[55].mxu1  ;;  %v12513_v27 = vadd.f32 %v2733_v55, %v2442_v19 }
 0x2be   :  { %v2429_v34 = vpop.f32.mrb[56].mxu0 }
 0x2bf   :  { %v2443_v0 = vadd.f32 %v2429_v34, %v12495_v22  ;;  %v10029_v9 = vpop.f32.mrb[57].mxu0 }
 0x2c0   :  { %v2738_v35 = vpop.f32.mrb[56].mxu1  ;;  %v2432_v50 = vpop.f32.mrb[58].mxu0 }
 0x2c1   :  { %v10051_v2 = vpop.f32.mrb[57].mxu1  ;;  %v10030_v1 = vpop.f32.mrb[59].mxu0  ;;  %v12516_v13 = vadd.f32 %v2738_v35, %v2443_v0 }
 0x2c2   :  { %v2741_v32 = vpop.f32.mrb[58].mxu1 }
 0x2c3   :  { %v10052_v20 = vpop.f32.mrb[59].mxu1 }
 0x2c6   :  { %v3023_v44 = vpop.f32.mrb[60].mxu0 }
 0x2c7   :  { %v3061_v14 = vadd.f32 %v3023_v44, %v2744_v12  ;;  %v10057_v61 = vpop.f32.mrb[61].mxu0 }
 0x2c8   :  { %v3332_v53 = vpop.f32.mrb[60].mxu1  ;;  %v3026_v4 = vpop.f32.mrb[62].mxu0 }
 0x2c9   :  { %v10079_v28 = vpop.f32.mrb[61].mxu1  ;;  %v3370_v18 = vadd.f32 %v3332_v53, %v3061_v14  ;;  %v3062_v43 = vadd.f32 %v3026_v4, %v2745_v58  ;;  %v10058_v62 = vpop.f32.mrb[63].mxu0 }
 0x2ca   :  { %v3335_v10 = vpop.f32.mrb[62].mxu1 }
 0x2cb   :  { %v10080_v24 = vpop.f32.mrb[63].mxu1  ;;  %v3386_v22 = vadd.f32 %v12518_v7, %v3370_v18  ;;  %v3371_v36 = vadd.f32 %v3335_v10, %v3062_v43 }
 0x2cd   :  { %v3395_v8 = vmax.f32 %v3386_v22, 0.0  ;;  %v3387_v30 = vadd.f32 %v12518_v7, %v3371_v36 }
 0x2ce   :  { %v3031_v23 = vpop.f32.mrb[64].mxu0 }
 0x2cf   :  { %v3413_v48 = vcombine.high %v3395_v8, %v3395_v8  ;;  %v3420_v12 = vrot.slane %v3395_v8, %v11278_v6  ;;  %v3396_v38 = vmax.f32 %v3387_v30, 0.0  ;;  %v3063_v42 = vadd.f32 %v3031_v23, %v2746_v15  ;;  %v10061_v41 = vpop.f32.mrb[65].mxu0 }
 0x2d0   :  { %v3340_v5 = vpop.f32.mrb[64].mxu1  ;;  %v3034_v33 = vpop.f32.mrb[66].mxu0 }
 0x2d1   :  { %v10083_v60 = vpop.f32.mrb[65].mxu1  ;;  %v3427_v58 = vrot.slane %v3413_v48, %v11278_v6  ;;  %v3428_v26 = vcombine.high %v3420_v12, %v3420_v12  ;;  %v3462_v3 = vcombine.high %v3396_v38, %v3396_v38  ;;  %v10062_v25 = vpop.f32.mrb[67].mxu0  ;;  %v3436_v54 = vrot.slane %v3420_v12, %v11278_v6 }
 0x2d2   :  { %v3343_v16 = vpop.f32.mrb[66].mxu1  ;;  %v3469_v56 = vrot.slane %v3396_v38, %v11278_v6  ;;  %v3372_v59 = vadd.f32 %v3340_v5, %v3063_v42  ;;  %v3064_v39 = vadd.f32 %v3034_v33, %v12501_v57 }
 0x2d3   :  { %v10084_v11 = vpop.f32.mrb[67].mxu1  ;;  %v3429_v31 = vcombine.high %v3427_v58, %v3427_v58  ;;  %v3443_v37 = vrot.slane %v3427_v58, %v11278_v6  ;;  %v3450_v15 = vrot.slane %v3428_v26, %v11278_v6  ;;  %v3476_v63 = vrot.slane %v3462_v3, %v11278_v6 }
 0x2d4   :  { %v3477_v55 = vcombine.high %v3469_v56, %v3469_v56  ;;  %v3485_v46 = vrot.slane %v3469_v56, %v11278_v6  ;;  %v3388_v29 = vadd.f32 %v12518_v7, %v3372_v59  ;;  %v3373_v45 = vadd.f32 %v3343_v16, %v3064_v39 }
 0x2d5   :  { %v3457_v19 = vrot.slane %v3429_v31, %v11278_v6  ;;  %v3854_v47 = vcombine.low %v3436_v54, %v3450_v15  ;;  %v9557_v21 = vcombine.high %v3436_v54, %v3450_v15  ;;  %v3478_v35 = vcombine.high %v3476_v63, %v3476_v63 }
 0x2d6   :  { %v3492_v2 = vrot.slane %v3476_v63, %v11278_v6  ;;  %v3499_v34 = vrot.slane %v3477_v55, %v11278_v6  ;;  %v3507_v32 = vcombine.high %v3485_v46, %v3485_v46  ;;  %v3909_v0 = vrot.slane %v3485_v46, %v11278_v6  ;;  %v3039_v9 = vpop.f32.mrb[68].mxu0 }
 0x2d7   :  { %v3856_v50 = vcombine.low %v3443_v37, %v3457_v19  ;;  %v9558_v1 = vcombine.high %v3443_v37, %v3457_v19  ;;  %v3864_v53 = vrot.slane %v3854_v47, %v11278_v6  ;;  %v3871_v28 = vrot.slane %v9557_v21, %v11278_v6  ;;  %v10065_v44 = vpop.f32.mrb[69].mxu0 }
 0x2d8   :  { %v3348_v49 = vpop.f32.mrb[68].mxu1  ;;  %v3506_v14 = vrot.slane %v3478_v35, %v11278_v6  ;;  %v3508_v61 = vcombine.high %v3492_v2, %v3492_v2  ;;  %v3509_v24 = vcombine.high %v3499_v34, %v3499_v34  ;;  %v3042_v4 = vpop.f32.mrb[70].mxu0  ;;  %v3917_v22 = vcombine.low %v3499_v34, %v3507_v32 }
 0x2d9   :  { %v10087_v57 = vpop.f32.mrb[69].mxu1  ;;  %v3878_v18 = vrot.slane %v3856_v50, %v11278_v6  ;;  %v3885_v43 = vrot.slane %v9558_v1, %v11278_v6  ;;  %v3886_v62 = vcombine.low %v3864_v53, %v3871_v28  ;;  %v10066_v36 = vpop.f32.mrb[71].mxu0  ;;  %v3916_v5 = vrot.slane %v3909_v0, %v11278_v6 }
 0x2da   :  { %v12536_v20 = vpop.f32.mrb[70].mxu1  ;;  %v3918_v8 = vcombine.low %v3509_v24, %v3492_v2  ;;  %v3919_v30 = vcombine.low %v3506_v14, %v3508_v61  ;;  %v3397_v60 = vmax.f32 %v3388_v29, 0.0  ;;  %v3510_v48 = vcombine.high %v3506_v14, %v3506_v14 }
 0x2db   :  { %v10088_v10 = vpop.f32.mrb[71].mxu1  ;;  %v3887_v23 = vcombine.low %v3878_v18, %v3885_v43  ;;  %v3894_v16 = vrot.slane %v3886_v62, %v11278_v6  ;;  %v3389_v12 = vadd.f32 %v12518_v7, %v3373_v45  ;;  %v3927_v38 = vrot.slane %v3917_v22, %v11278_v6 }
 0x2dc   :  { %v3934_v42 = vrot.slane %v3918_v8, %v11278_v6  ;;  %v3511_v41 = vcombine.high %v3397_v60, %v3397_v60  ;;  %v3518_v11 = vrot.slane %v3397_v60, %v11278_v6  ;;  %v3065_v3 = vadd.f32 %v3039_v9, %v12505_v52 }
 0x2dd   :  { %v3901_v58 = vrot.slane %v3887_v23, %v11278_v6  ;;  %v3398_v26 = vmax.f32 %v3389_v12, 0.0  ;;  %v12554_v25 = vadd.f32 %v3042_v4, %v12507_v17  ;;  %v3941_v31 = vrot.slane %v3919_v30, %v11278_v6 }
 0x2de   :  { %v3525_v56 = vrot.slane %v3511_v41, %v11278_v6  ;;  %v3526_v59 = vcombine.high %v3518_v11, %v3518_v11  ;;  %v3534_v39 = vrot.slane %v3518_v11, %v11278_v6  ;;  %v12559_v37 = vpop.f32.mrb[72].mxu0  ;;  %v3374_v52 = vadd.f32 %v3348_v49, %v3065_v3 }
 0x2df   :  { %v3902_v63 = vcombine.low %v3894_v16, %v3901_v58  ;;  %v3560_v55 = vcombine.high %v3398_v26, %v3398_v26  ;;  %v3567_v46 = vrot.slane %v3398_v26, %v11278_v6  ;;  %v10069_v29 = vpop.f32.mrb[73].mxu0  ;;  %v3949_v45 = vcombine.low %v3927_v38, %v3934_v42 }
 0x2e0   :  { %v12549_v33 = vpop.f32.mrb[72].mxu1  ;;  %v3527_v19 = vcombine.high %v3525_v56, %v3525_v56  ;;  %v3541_v47 = vrot.slane %v3525_v56, %v11278_v6  ;;  %v3548_v21 = vrot.slane %v3526_v59, %v11278_v6  ;;  %v3050_v35 = vpop.f32.mrb[74].mxu0  ;;  %v3920_v2 = vcombine.low %v3510_v48, %v3534_v39 }
 0x2e1   :  { %v10091_v54 = vpop.f32.mrb[73].mxu1  ;;  %v12566_v57 = vpack.c.bf16 %v3916_v5, %v3902_v63  ;;  %v3574_v34 = vrot.slane %v3560_v55, %v11278_v6  ;;  %v3575_v32 = vcombine.high %v3567_v46, %v3567_v46  ;;  %v10070_v0 = vpop.f32.mrb[75].mxu0  ;;  %v3583_v1 = vrot.slane %v3567_v46, %v11278_v6 }
 0x2e2   :  { %v12561_v15 = vpop.f32.mrb[74].mxu1  ;;  %v3555_v9 = vrot.slane %v3527_v19, %v11278_v6  ;;  %v3972_v49 = vrot.slane %v3548_v21, %v11278_v6  ;;  %v9559_v50 = vcombine.high %v3534_v39, %v3548_v21  ;;  %v3948_v53 = vrot.slane %v3920_v2, %v11278_v6 }
 0x2e3   :  { %v10092_v17 = vpop.f32.mrb[75].mxu1  ;;  %v3576_v28 = vcombine.high %v3574_v34, %v3574_v34  ;;  %v3590_v44 = vrot.slane %v3574_v34, %v11278_v6  ;;  %v3597_v10 = vrot.slane %v3575_v32, %v11278_v6  ;;  %v3957_v14 = vrot.slane %v3949_v45, %v11278_v6 }
 0x2e4   :  { %v3981_v61 = vcombine.low %v3541_v47, %v3555_v9  ;;  %v9560_v24 = vcombine.high %v3541_v47, %v3555_v9  ;;  %v3990_v4 = vrot.slane %v9559_v50, %v11278_v6  ;;  %v3950_v43 = vcombine.low %v3941_v31, %v3948_v53 }
 0x2e5   :  { %v3604_v62 = vrot.slane %v3576_v28, %v11278_v6  ;;  %v3605_v22 = vcombine.high %v3583_v1, %v3583_v1  ;;  %v3606_v36 = vcombine.high %v3590_v44, %v3590_v44  ;;  %v3607_v60 = vcombine.high %v3597_v10, %v3597_v10 }
 0x2e6   :  { %v3997_v8 = vrot.slane %v3981_v61, %v11278_v6  ;;  %v4004_v30 = vrot.slane %v9560_v24, %v11278_v6  ;;  %v3983_v23 = vcombine.low %v3583_v1, %v3597_v10  ;;  %v12582_v16 = vpop.f32.mrb[76].mxu0  ;;  %v3964_v12 = vrot.slane %v3950_v43, %v11278_v6 }
 0x2e7   :  { %v3979_v38 = vrot.slane %v3972_v49, %v11278_v6  ;;  %v4044_v42 = vcombine.low %v3604_v62, %v3606_v36  ;;  %v3390_v41 = vadd.f32 %v12518_v7, %v3374_v52  ;;  %v10073_v11 = vpop.f32.mrb[77].mxu0  ;;  %v4035_v54 = vrot.slane %v3605_v22, %v11278_v6 }
 0x2e8   :  { %v12577_v18 = vpop.f32.mrb[76].mxu1  ;;  %v4012_v26 = vcombine.low %v3990_v4, %v3997_v8  ;;  %v4011_v3 = vrot.slane %v3983_v23, %v11278_v6  ;;  %v4043_v56 = vcombine.low %v3607_v60, %v3590_v44  ;;  %v3058_v59 = vpop.f32.mrb[78].mxu0  ;;  %v3965_v39 = vcombine.low %v3957_v14, %v3964_v12 }
 0x2e9   :  { %v10095_v5 = vpop.f32.mrb[77].mxu1  ;;  %v4060_v31 = vrot.slane %v4044_v42, %v11278_v6  ;;  %v3399_v63 = vmax.f32 %v3390_v41, 0.0  ;;  %v3608_v55 = vcombine.high %v3604_v62, %v3604_v62  ;;  %v10074_v46 = vpop.f32.mrb[79].mxu0  ;;  %v3375_v45 = vadd.f32 %v12536_v20, %v12554_v25 }
 0x2ea   :  { %v3367_v48 = vpop.f32.mrb[78].mxu1  ;;  %v4020_v29 = vrot.slane %v4012_v26, %v11278_v6  ;;  %v4013_v17 = vcombine.low %v4004_v30, %v4011_v3  ;;  %v4053_v52 = vrot.slane %v4043_v56, %v11278_v6  ;;  %v12594_v19 = vpack.c.bf16 %v3979_v38, %v3965_v39 }
 0x2eb   :  { %v10096_v58 = vpop.f32.mrb[79].mxu1  ;;  %v3609_v47 = vcombine.high %v3399_v63, %v3399_v63  ;;  %v3616_v21 = vrot.slane %v3399_v63, %v11278_v6  ;;  %v3067_v2 = vadd.f32 %v12559_v37, %v12511_v40  ;;  %v3391_v0 = vadd.f32 %v12518_v7, %v3375_v45 }
 0x2ec   :  { %v4027_v34 = vrot.slane %v4013_v17, %v11278_v6  ;;  %v4075_v32 = vcombine.low %v4053_v52, %v4060_v31  ;;  %v3068_v9 = vadd.f32 %v3050_v35, %v12513_v27  ;;  %v4042_v49 = vrot.slane %v4035_v54, %v11278_v6 }
 0x2ed   :  { %v3623_v50 = vrot.slane %v3609_v47, %v11278_v6  ;;  %v3624_v20 = vcombine.high %v3616_v21, %v3616_v21  ;;  %v3632_v25 = vrot.slane %v3616_v21, %v11278_v6  ;;  %v3400_v28 = vmax.f32 %v3391_v0, 0.0 }
 0x2ee   :  { %v4028_v1 = vcombine.low %v4020_v29, %v4027_v34  ;;  %v4083_v53 = vrot.slane %v4075_v32, %v11278_v6  ;;  %v3376_v40 = vadd.f32 %v12549_v33, %v3067_v2 }
 0x2ef   :  { %v3625_v37 = vcombine.high %v3623_v50, %v3623_v50  ;;  %v3639_v44 = vrot.slane %v3623_v50, %v11278_v6  ;;  %v3646_v10 = vrot.slane %v3624_v20, %v11278_v6  ;;  %v3654_v14 = vcombine.high %v3632_v25, %v3632_v25 }
 0x2f0   :  { %v12609_v27 = vpack.c.bf16 %v4042_v49, %v4028_v1  ;;  %v4045_v35 = vcombine.low %v3608_v55, %v3632_v25  ;;  %v3658_v61 = vcombine.high %v3400_v28, %v3400_v28  ;;  %v3665_v24 = vrot.slane %v3400_v28, %v11278_v6 }
 0x2f1   :  { %v3653_v4 = vrot.slane %v3625_v37, %v11278_v6  ;;  %v3656_v43 = vcombine.high %v3646_v10, %v3646_v10  ;;  %v4046_v62 = vcombine.low %v3646_v10, %v3654_v14  ;;  %v3392_v22 = vadd.f32 %v12518_v7, %v3376_v40 }
 0x2f2   :  { %v4067_v33 = vrot.slane %v4045_v35, %v11278_v6  ;;  %v3672_v36 = vrot.slane %v3658_v61, %v11278_v6  ;;  %v3673_v5 = vcombine.high %v3665_v24, %v3665_v24  ;;  %v3681_v8 = vrot.slane %v3665_v24, %v11278_v6 }
 0x2f3   :  { %v4074_v30 = vrot.slane %v4046_v62, %v11278_v6  ;;  %v4098_v60 = vrot.slane %v3656_v43, %v11278_v6  ;;  %v4106_v23 = vcombine.low %v3639_v44, %v3653_v4  ;;  %v9561_v48 = vcombine.high %v3639_v44, %v3653_v4 }
 0x2f4   :  { %v3674_v12 = vcombine.high %v3672_v36, %v3672_v36  ;;  %v3688_v38 = vrot.slane %v3672_v36, %v11278_v6  ;;  %v3695_v42 = vrot.slane %v3673_v5, %v11278_v6  ;;  %v3401_v41 = vmax.f32 %v3392_v22, 0.0 }
 0x2f5   :  { %v4076_v11 = vcombine.low %v4067_v33, %v4074_v30  ;;  %v4105_v58 = vrot.slane %v4098_v60, %v11278_v6  ;;  %v4116_v26 = vrot.slane %v4106_v23, %v11278_v6  ;;  %v4123_v3 = vrot.slane %v9561_v48, %v11278_v6 }
 0x2f6   :  { %v3704_v54 = vcombine.high %v3688_v38, %v3688_v38  ;;  %v4108_v56 = vcombine.low %v3681_v8, %v3695_v42  ;;  %v9562_v59 = vcombine.high %v3681_v8, %v3695_v42  ;;  %v4161_v39 = vrot.slane %v3688_v38, %v11278_v6 }
 0x2f7   :  { %v4090_v31 = vrot.slane %v4076_v11, %v11278_v6  ;;  %v4138_v63 = vcombine.low %v4116_v26, %v4123_v3  ;;  %v3702_v55 = vrot.slane %v3674_v12, %v11278_v6  ;;  %v3707_v46 = vcombine.high %v3401_v41, %v3401_v41 }
 0x2f8   :  { %v4130_v29 = vrot.slane %v4108_v56, %v11278_v6  ;;  %v4137_v17 = vrot.slane %v9562_v59, %v11278_v6  ;;  %v4168_v52 = vrot.slane %v4161_v39, %v11278_v6  ;;  %v3714_v45 = vrot.slane %v3401_v41, %v11278_v6 }
 0x2f9   :  { %v4091_v47 = vcombine.low %v4083_v53, %v4090_v31  ;;  %v4146_v21 = vrot.slane %v4138_v63, %v11278_v6  ;;  %v3706_v2 = vcombine.high %v3702_v55, %v3702_v55  ;;  %v3721_v34 = vrot.slane %v3707_v46, %v11278_v6 }
 0x2fa   :  { %v4139_v32 = vcombine.low %v4130_v29, %v4137_v17  ;;  %v3722_v0 = vcombine.high %v3714_v45, %v3714_v45  ;;  %v3730_v49 = vrot.slane %v3714_v45, %v11278_v6  ;;  %v4169_v50 = vcombine.low %v3702_v55, %v3704_v54 }
 0x2fb   :  { %v12634_v20 = vpack.c.bf16 %v4105_v58, %v4091_v47  ;;  %v3723_v25 = vcombine.high %v3721_v34, %v3721_v34  ;;  %v3737_v1 = vrot.slane %v3721_v34, %v11278_v6  ;;  %v3377_v28 = vadd.f32 %v12561_v15, %v3068_v9 }
 0x2fc   :  { %v4153_v40 = vrot.slane %v4139_v32, %v11278_v6  ;;  %v3744_v53 = vrot.slane %v3722_v0, %v11278_v6  ;;  %v3752_v37 = vcombine.high %v3730_v49, %v3730_v49  ;;  %v4170_v44 = vcombine.low %v3706_v2, %v3730_v49 }
 0x2fd   :  { %v3751_v10 = vrot.slane %v3723_v25, %v11278_v6  ;;  %v4179_v14 = vrot.slane %v4169_v50, %v11278_v6  ;;  %v3393_v35 = vadd.f32 %v12518_v7, %v3377_v28  ;;  %v3069_v61 = vadd.f32 %v12582_v16, %v12516_v13 }
 0x2fe   :  { %v4154_v24 = vcombine.low %v4146_v21, %v4153_v40  ;;  %v3754_v4 = vcombine.high %v3744_v53, %v3744_v53  ;;  %v4171_v43 = vcombine.low %v3744_v53, %v3752_v37  ;;  %v4186_v15 = vrot.slane %v4170_v44, %v11278_v6 }
 0x2ff   :  { %v4224_v9 = vrot.slane %v3751_v10, %v11278_v6  ;;  %v9563_v62 = vcombine.high %v3737_v1, %v3751_v10  ;;  %v3402_v22 = vmax.f32 %v3393_v35, 0.0  ;;  %v3378_v33 = vadd.f32 %v12577_v18, %v3069_v61 }
 0x300   :  { %v4392_v36 = vshll.u32 %v12594_v19, 16  ;;  %v12649_v5 = vpack.c.bf16 %v4168_v52, %v4154_v24  ;;  %v4172_v8 = vcombine.low %v3754_v4, %v3737_v1  ;;  %v4201_v30 = vcombine.low %v4179_v14, %v4186_v15 }
 0x301   :  { %v4193_v60 = vrot.slane %v4171_v43, %v11278_v6  ;;  %v4231_v13 = vrot.slane %v4224_v9, %v11278_v6  ;;  %v3756_v16 = vcombine.high %v3402_v22, %v3402_v22  ;;  %v3763_v23 = vrot.slane %v3402_v22, %v11278_v6 }
 0x302   :  { %v4200_v48 = vrot.slane %v4172_v8, %v11278_v6  ;;  %v4209_v12 = vrot.slane %v4201_v30, %v11278_v6  ;;  %v4242_v38 = vrot.slane %v9563_v62, %v11278_v6  ;;  %v3394_v18 = vadd.f32 %v12518_v7, %v3378_v33 }
 0x303   :  { %v3770_v42 = vrot.slane %v3756_v16, %v11278_v6  ;;  %v3771_v41 = vcombine.high %v3763_v23, %v3763_v23  ;;  %v4383_v11 = vshrl.u32 %v12566_v57, 16  ;;  %v4385_v58 = vshll.u32 %v12566_v57, 16 }
 0x304   :  { %v4202_v26 = vcombine.low %v4193_v60, %v4200_v48  ;;  %v3779_v3 = vrot.slane %v3763_v23, %v11278_v6  ;;  %v3403_v54 = vmax.f32 %v3394_v18, 0.0  ;;  %v4390_v56 = vshrl.u32 %v12594_v19, 16 }
 0x305   :  { %v3772_v59 = vcombine.high %v3770_v42, %v3770_v42  ;;  %v3786_v39 = vrot.slane %v3770_v42, %v11278_v6  ;;  %v3793_v31 = vrot.slane %v3771_v41, %v11278_v6  ;;  %v4394_v7 = vrot.slane %v4392_v36, 1 }
 0x306   :  { %v4216_v63 = vrot.slane %v4202_v26, %v11278_v6  ;;  %v3805_v55 = vcombine.high %v3403_v54, %v3403_v54  ;;  %v3812_v46 = vrot.slane %v3403_v54, %v11278_v6  ;;  %v4387_v29 = vrot.slane %v4385_v58, 1 }
 0x307   :  { %v3800_v17 = vrot.slane %v3772_v59, %v11278_v6  ;;  %v3802_v52 = vcombine.high %v3786_v39, %v3786_v39  ;;  %v4233_v45 = vcombine.low %v3779_v3, %v3793_v31  ;;  %v9564_v47 = vcombine.high %v3779_v3, %v3793_v31 }
 0x308   :  { %v4217_v21 = vcombine.low %v4209_v12, %v4216_v63  ;;  %v3819_v2 = vrot.slane %v3805_v55, %v11278_v6  ;;  %v3820_v34 = vcombine.high %v3812_v46, %v3812_v46  ;;  %v3828_v32 = vrot.slane %v3812_v46, %v11278_v6 }
 0x309   :  { %v4235_v0 = vcombine.low %v3786_v39, %v3800_v17  ;;  %v4249_v49 = vrot.slane %v4233_v45, %v11278_v6  ;;  %v4287_v50 = vrot.slane %v3802_v52, %v11278_v6  ;;  %v12678_v25 = vor.u32 %v4394_v7, %v4390_v56 }
 0x30a   :  { %v12680_v1 = vpack.c.bf16 %v4231_v13, %v4217_v21  ;;  %v3804_v28 = vcombine.high %v3800_v17, %v3800_v17  ;;  %v3821_v40 = vcombine.high %v3819_v2, %v3819_v2  ;;  %v3835_v53 = vrot.slane %v3819_v2, %v11278_v6 }
 0x30b   :  { %v4256_v37 = vrot.slane %v9564_v47, %v11278_v6  ;;  %v4263_v44 = vrot.slane %v4235_v0, %v11278_v6  ;;  %v4264_v10 = vcombine.low %v4242_v38, %v4249_v49  ;;  %v3842_v14 = vrot.slane %v3820_v34, %v11278_v6 }
 0x30c   :  { %v4294_v35 = vrot.slane %v4287_v50, %v11278_v6  ;;  %v3849_v61 = vrot.slane %v3821_v40, %v11278_v6  ;;  %v3850_v24 = vcombine.high %v3828_v32, %v3828_v32  ;;  %v3851_v4 = vcombine.high %v3835_v53, %v3835_v53 }
 0x30d   :  { %v4420_v43 = vshll.u32 %v12680_v1, 16  ;;  %v4265_v15 = vcombine.low %v4256_v37, %v4263_v44  ;;  %v3852_v9 = vcombine.high %v3842_v14, %v3842_v14  ;;  %v4295_v62 = vcombine.low %v3804_v28, %v3828_v32 }
 0x30e   :  { %v4272_v22 = vrot.slane %v4264_v10, %v11278_v6  ;;  %v3853_v33 = vcombine.high %v3849_v61, %v3849_v61  ;;  %v4296_v8 = vcombine.low %v3842_v14, %v3850_v24  ;;  %v4298_v30 = vcombine.low %v3849_v61, %v3851_v4 }
 0x30f   :  { %v4279_v60 = vrot.slane %v4265_v15, %v11278_v6  ;;  %v4297_v13 = vcombine.low %v3852_v9, %v3835_v53  ;;  %v4305_v16 = vrot.slane %v4295_v62, %v11278_v6  ;;  %v4388_v23 = vor.u32 %v4387_v29, %v4383_v11 }
 0x310   :  { %v4312_v48 = vrot.slane %v4296_v8, %v11278_v6  ;;  %v4326_v12 = vrot.slane %v4298_v30, %v11278_v6  ;;  %v4350_v38 = vrot.slane %v3853_v33, %v11278_v6  ;;  %v4399_v18 = vshll.u32 %v12609_v27, 16 }
 0x311   :  { %v4280_v42 = vcombine.low %v4272_v22, %v4279_v60  ;;  %v4319_v41 = vrot.slane %v4297_v13, %v11278_v6  ;;  %v4397_v26 = vshrl.u32 %v12609_v27, 16  ;;  %v4406_v3 = vshll.u32 %v12634_v20, 16 }
 0x312   :  { %v4327_v54 = vcombine.low %v4305_v16, %v4312_v48  ;;  %v4357_v59 = vrot.slane %v4350_v38, %v11278_v6  ;;  %v4401_v39 = vrot.slane %v4399_v18, 1  ;;  %v4404_v31 = vshrl.u32 %v12634_v20, 16 }
 0x313   :  { %v12703_v7 = vpack.c.bf16 %v4294_v35, %v4280_v42  ;;  %v4328_v63 = vcombine.low %v4319_v41, %v4326_v12  ;;  %v4408_v55 = vrot.slane %v4406_v3, 1  ;;  %v4446_v46 = vrot.slane %v12566_v57, 1 }
 0x314   :  { %v4335_v29 = vrot.slane %v4327_v54, %v11278_v6  ;;  %v4402_v17 = vor.u32 %v4401_v39, %v4397_v26  ;;  %v4447_v52 = vrot.slane %v12594_v19, 1  ;;  %v4448_v45 = vrot.slane %v12609_v27, 1 }
 0x315   :  { %v4342_v47 = vrot.slane %v4328_v63, %v11278_v6  ;;  %v4449_v21 = vrot.slane %v12634_v20, 1  ;;  %v4454_v2 = vrot.slane %v4383_v11, 1  ;;  %v4455_v34 = vrot.slane %v4385_v58, 2 }
 0x316   :  { %v4457_v32 = vrot.slane %v4390_v56, 1  ;;  %v4458_v0 = vrot.slane %v4392_v36, 2  ;;  %v4460_v49 = vrot.slane %v4397_v26, 1  ;;  %v4461_v50 = vrot.slane %v4399_v18, 2 }
 0x317   :  { %v4343_v28 = vcombine.low %v4335_v29, %v4342_v47  ;;  %v4456_v40 = vor.u32 %v4455_v34, %v4454_v2  ;;  %v4463_v53 = vrot.slane %v4404_v31, 1  ;;  %v4464_v37 = vrot.slane %v4406_v3, 2 }
 0x318   :  { %v4459_v44 = vor.u32 %v4458_v0, %v4457_v32  ;;  %v4462_v10 = vor.u32 %v4461_v50, %v4460_v49  ;;  %v4478_v14 = vrot.slane %v12566_v57, 2  ;;  %v4479_v11 = vrot.slane %v12594_v19, 2 }
 0x319   :  { %v12721_v35 = vpack.c.bf16 %v4357_v59, %v4343_v28  ;;  %v4409_v58 = vor.u32 %v4408_v55, %v4404_v31  ;;  %v4465_v61 = vor.u32 %v4464_v37, %v4463_v53  ;;  %v4480_v56 = vrot.slane %v12609_v27, 2 }
 0x31a   :  { %v4486_v36 = vcombine.low %v12566_v57, %v4388_v23  ;;  %v4487_v24 = vcombine.low %v4446_v46, %v4456_v40  ;;  %v12726_v4 = vrot.slane %v4478_v14, %v11278_v6  ;;  %v4543_v15 = vcombine.low %v12594_v19, %v12678_v25 }
 0x31b   :  { %v4544_v9 = vcombine.low %v4447_v52, %v4459_v44  ;;  %v4565_v62 = vrot.slane %v4479_v11, %v11278_v6  ;;  %v4600_v22 = vcombine.low %v12609_v27, %v4402_v17  ;;  %v4601_v33 = vcombine.low %v4448_v45, %v4462_v10 }
 0x31c   :  { %v4481_v8 = vrot.slane %v12634_v20, 2  ;;  %v4494_v30 = vrot.slane %v4486_v36, %v11278_v6  ;;  %v4501_v60 = vrot.slane %v4487_v24, %v11278_v6  ;;  %v4511_v57 = vcombine.high %v12726_v4, %v12726_v4 }
 0x31d   :  { %v12739_v13 = vrot.slane %v12726_v4, %v11278_v6  ;;  %v4551_v19 = vrot.slane %v4543_v15, %v11278_v6  ;;  %v4558_v25 = vrot.slane %v4544_v9, %v11278_v6  ;;  %v4568_v16 = vcombine.high %v4565_v62, %v4565_v62 }
 0x31e   :  { %v4509_v27 = vcombine.low %v4494_v30, %v4501_v60  ;;  %v4510_v23 = vcombine.high %v4494_v30, %v4501_v60  ;;  %v4608_v48 = vrot.slane %v4600_v22, %v11278_v6  ;;  %v4615_v12 = vrot.slane %v4601_v33, %v11278_v6 }
 0x31f   :  { %v4566_v38 = vcombine.low %v4551_v19, %v4558_v25  ;;  %v4567_v18 = vcombine.high %v4551_v19, %v4558_v25  ;;  %v4589_v42 = vrot.slane %v4565_v62, %v11278_v6  ;;  %v4622_v41 = vrot.slane %v4480_v56, %v11278_v6 }
 0x320   :  { %v4518_v26 = vrot.slane %v4509_v27, %v11278_v6  ;;  %v4596_v3 = vrot.slane %v4568_v16, %v11278_v6  ;;  %v4623_v54 = vcombine.low %v4608_v48, %v4615_v12  ;;  %v4624_v59 = vcombine.high %v4608_v48, %v4615_v12 }
 0x321   :  { %v4525_v39 = vrot.slane %v4510_v23, %v11278_v6  ;;  %v4575_v31 = vrot.slane %v4566_v38, %v11278_v6  ;;  %v4582_v63 = vrot.slane %v4567_v18, %v11278_v6  ;;  %v4625_v55 = vcombine.high %v4622_v41, %v4622_v41 }
 0x322   :  { %v4632_v46 = vrot.slane %v4623_v54, %v11278_v6  ;;  %v12754_v29 = vrot.slane %v4624_v59, %v11278_v6  ;;  %v4646_v17 = vrot.slane %v4622_v41, %v11278_v6  ;;  %v4657_v52 = vcombine.low %v12634_v20, %v4409_v58 }
 0x323   :  { %v4541_v45 = vcombine.high %v4518_v26, %v12739_v13  ;;  %v4597_v47 = vcombine.low %v4575_v31, %v4589_v42  ;;  %v4599_v2 = vcombine.low %v4582_v63, %v4596_v3  ;;  %v4653_v34 = vrot.slane %v4625_v55, %v11278_v6 }
 0x324   :  { %v4598_v32 = vcombine.high %v4575_v31, %v4589_v42  ;;  %v4654_v0 = vcombine.low %v4632_v46, %v4646_v17  ;;  %v4658_v49 = vcombine.low %v4449_v21, %v4465_v61  ;;  %v4665_v50 = vrot.slane %v4657_v52, %v11278_v6 }
 0x325   :  { %v4656_v28 = vcombine.low %v12754_v29, %v4653_v34  ;;  %v4679_v40 = vrot.slane %v4481_v8, %v11278_v6  ;;  %v4948_v53 = vunpack.i.h.s16 %v4597_v47  ;;  %v4950_v37 = vunpack.i.h.s16 %v4599_v2 }
 0x326   :  { %v4655_v44 = vcombine.high %v4632_v46, %v4646_v17  ;;  %v4672_v20 = vrot.slane %v4658_v49, %v11278_v6  ;;  %v12764_v10 = vpack.i.b16 %v4597_v47, %v4541_v45  ;;  %v9577_v14 = vcombine.low %v4518_v26, %v4525_v39 }
 0x327   :  { %v12766_v11 = vpack.i.b16 %v4599_v2, %v4948_v53  ;;  %v9567_v58 = vpack.i.b16 %v4598_v32, %v4950_v37  ;;  %v4411_v56 = vshrl.u32 %v12649_v5, 16  ;;  %v4413_v21 = vshll.u32 %v12649_v5, 16 }
 0x328   :  { %v4680_v61 = vcombine.low %v4665_v50, %v4672_v20  ;;  %v12771_v36 = vrot.slane %v4679_v40, %v11278_v6  ;;  %v4418_v24 = vshrl.u32 %v12680_v1, 16  ;;  %v4422_v15 = vrot.slane %v4420_v43, 1 }
 0x329   :  { %v5096_v9 = vcombine.low %v12764_v10, %v12766_v11  ;;  %v5097_v62 = vcombine.high %v12764_v10, %v12766_v11  ;;  %v9579_v22 = vcombine.low %v9567_v58, %v4632_v46  ;;  %v12780_v33 = vcombine.high %v9567_v58, %v4654_v0 }
 0x32a   :  { %v12783_v8 = vrot.slane %v4680_v61, %v11278_v6  ;;  %v5108_v30 = vrot.slane %v9577_v14, %v11278_v6  ;;  %v4415_v60 = vrot.slane %v4413_v21, 1  ;;  %v4423_v19 = vor.u32 %v4422_v15, %v4418_v24 }
 0x32b   :  { %v5122_v25 = vrot.slane %v5096_v9, %v11278_v6  ;;  %v5136_v16 = vrot.slane %v9579_v22, %v11278_v6  ;;  %v4425_v27 = vshrl.u32 %v12703_v7, 16  ;;  %v4427_v23 = vshll.u32 %v12703_v7, 16 }
 0x32c   :  { %v12792_v48 = vcombine.low %v12783_v8, %v12771_v36  ;;  %v4416_v12 = vor.u32 %v4415_v60, %v4411_v56  ;;  %v4450_v38 = vrot.slane %v12649_v5, 1  ;;  %v4451_v18 = vrot.slane %v12680_v1, 1 }
 0x32d   :  { %v5158_v42 = vcombine.low %v5108_v30, %v5122_v25  ;;  %v5159_v41 = vcombine.high %v5108_v30, %v5122_v25  ;;  %v4429_v26 = vrot.slane %v4427_v23, 1  ;;  %v4466_v3 = vrot.slane %v4411_v56, 1 }
 0x32e   :  { %v9568_v54 = vpack.i.b16 %v12792_v48, %v4655_v44  ;;  %v4467_v59 = vrot.slane %v4413_v21, 2  ;;  %v4469_v39 = vrot.slane %v4418_v24, 1  ;;  %v4470_v31 = vrot.slane %v4420_v43, 2 }
 0x32f   :  { %v12800_v63 = vrot.slane %v5159_v41, %v11278_v6  ;;  %v12803_v55 = vrot.slane %v5158_v42, %v11278_v6  ;;  %v4430_v46 = vor.u32 %v4429_v26, %v4425_v27  ;;  %v4452_v17 = vrot.slane %v12703_v7, 1 }
 0x330   :  { %v9580_v52 = vcombine.low %v12754_v29, %v9568_v54  ;;  %v12807_v45 = vcombine.high %v4656_v28, %v9568_v54  ;;  %v4468_v47 = vor.u32 %v4467_v59, %v4466_v3  ;;  %v4472_v2 = vrot.slane %v4425_v27, 1 }
 0x331   :  { %v4471_v34 = vor.u32 %v4470_v31, %v4469_v39  ;;  %v4473_v32 = vrot.slane %v4427_v23, 2  ;;  %v4482_v0 = vrot.slane %v12649_v5, 2  ;;  %v4681_v43 = vcombine.high %v4665_v50, %v4672_v20 }
 0x332   :  { %v5150_v49 = vrot.slane %v9580_v52, %v11278_v6  ;;  %v4483_v53 = vrot.slane %v12680_v1, 2  ;;  %v4682_v37 = vcombine.high %v4679_v40, %v4679_v40  ;;  %v4714_v44 = vcombine.low %v12649_v5, %v4416_v12  ;;  %v10336_v12 = vld [vmem:[#allocation12 + $0x114] ss:$8 sps:$4 sm:$0xff]  }
 0x333   :  { %v4696_v14 = vrot.slane %v4681_v43, %v11278_v6  ;;  %v4712_v29 = vcombine.high %v12783_v8, %v12771_v36  ;;  %v4715_v28 = vcombine.low %v4450_v38, %v4468_v47  ;;  %v12817_v58 = vrot.slane %v4482_v0, %v11278_v6 }
 0x334   :  { %v5161_v56 = vcombine.low %v5136_v16, %v5150_v49  ;;  %v5162_v21 = vcombine.high %v5136_v16, %v5150_v49  ;;  %v4710_v50 = vrot.slane %v4682_v37, %v11278_v6  ;;  %v4722_v20 = vrot.slane %v4714_v44, %v11278_v6 }
 0x335   :  { %v4474_v61 = vor.u32 %v4473_v32, %v4472_v2  ;;  %v4729_v40 = vrot.slane %v4715_v28, %v11278_v6  ;;  %v4771_v5 = vcombine.low %v12680_v1, %v4423_v19  ;;  %v4772_v24 = vcombine.low %v4451_v18, %v4471_v34  ;;  %v10331_v1 = vld [vmem:[#allocation12 + $0x100] ss:$8 sps:$4 sm:$0xff]   ;;  %v10334_v2 = vld [vmem:[#allocation12 + $0x110] ss:$8 sps:$4 sm:$0xff]  }
 0x336   :  { %v12824_v15 = vrot.slane %v5162_v21, %v11278_v6  ;;  %v12827_v36 = vrot.slane %v5161_v56, %v11278_v6  ;;  %v4713_v9 = vcombine.low %v4696_v14, %v4710_v50  ;;  %v4793_v22 = vrot.slane %v4483_v53, %v11278_v6 }
 0x337   :  { %v4737_v8 = vcombine.low %v4722_v20, %v4729_v40  ;;  %v4738_v30 = vcombine.high %v4722_v20, %v4729_v40  ;;  %v4779_v60 = vrot.slane %v4771_v5, %v11278_v6  ;;  %v4786_v25 = vrot.slane %v4772_v24, %v11278_v6 }
 0x338   :  { %v5209_v16 = vcombine.low %v12800_v63, %v12824_v15  ;;  %v5206_v19 = vcombine.low %v12803_v55, %v12827_v36  ;;  %v12838_v27 = vrot.slane %v12817_v58, %v11278_v6  ;;  %v4796_v23 = vcombine.high %v4793_v22, %v4793_v22 }
 0x339   :  { %v4746_v38 = vrot.slane %v4737_v8, %v11278_v6  ;;  %v4753_v18 = vrot.slane %v4738_v30, %v11278_v6  ;;  %v4794_v42 = vcombine.low %v4779_v60, %v4786_v25  ;;  %v4795_v41 = vcombine.high %v4779_v60, %v4786_v25  ;;  %v10342_v30 = vld [vmem:[#allocation12 + $0x134] ss:$8 sps:$4 sm:$0xff]  }
 0x33a   :  { %5833 = vmatprep.mubr.bf16.mxu0 %v5209_v16  ;;  %v4817_v26 = vrot.slane %v4793_v22, %v11278_v6  ;;  %v4828_v3 = vcombine.low %v12703_v7, %v4430_v46  ;;  %v4829_v54 = vcombine.low %v4452_v17, %v4474_v61  ;;  %v4958_v59 = vunpack.i.h.s16 %v12792_v48  ;;  %v10339_v17 = vld [vmem:[#allocation12 + $0x124] ss:$8 sps:$4 sm:$0xff]   ;;  %v10337_v61 = vld [vmem:[#allocation12 + $0x120] ss:$8 sps:$4 sm:$0xff]  }
 0x33b   :  { %5834 = vmatmul.mubr.bf16.vlgmr.msra.gmra.mrb[80].mxu0 %v5206_v19  ;;  %v4803_v39 = vrot.slane %v4794_v42, %v11278_v6  ;;  %v4810_v31 = vrot.slane %v4795_v41, %v11278_v6  ;;  %v4824_v52 = vrot.slane %v4796_v23, %v11278_v6  ;;  %v4960_v47 = vunpack.i.h.s16 %v4713_v9  ;;  %v10340_v42 = vld [vmem:[#allocation12 + $0x130] ss:$8 sps:$4 sm:$0xff]  }
 0x33c   :  { %5863 = vmatpush1.bf16.msra.mxu0 %v10331_v1  ;;  %v4836_v34 = vrot.slane %v4828_v3, %v11278_v6  ;;  %v4843_v32 = vrot.slane %v4829_v54, %v11278_v6  ;;  %v12850_v0 = vpack.i.b16 %v4713_v9, %v4958_v59  ;;  %v9581_v46 = vcombine.low %v4746_v38, %v4753_v18 }
 0x33d   :  { %5864 = vmatprep.subr.bf16.mxu0 %v10336_v12  ;;  %v4769_v48 = vcombine.high %v4746_v38, %v12838_v27  ;;  %v4825_v43 = vcombine.low %v4803_v39, %v4817_v26  ;;  %v4827_v49 = vcombine.low %v4810_v31, %v4824_v52  ;;  %v12853_v53 = vpack.i.b16 %v4712_v29, %v4960_v47  ;;  %v10345_v31 = vld [vmem:[#allocation12 + $0x144] ss:$8 sps:$4 sm:$0xff]  }
 0x33e   :  { %v4826_v37 = vcombine.high %v4803_v39, %v4817_v26  ;;  %v4851_v44 = vcombine.low %v4836_v34, %v4843_v32  ;;  %v4432_v14 = vshrl.u32 %v12721_v35, 16  ;;  %v4434_v28 = vshll.u32 %v12721_v35, 16 }
 0x33f   :  { %v4968_v56 = vunpack.i.h.s16 %v4825_v43  ;;  %v4970_v21 = vunpack.i.h.s16 %v4827_v49  ;;  %v12857_v50 = vpack.i.b16 %v4825_v43, %v4769_v48  ;;  %v5211_v20 = vcombine.low %v12850_v0, %v12853_v53 }
 0x340   :  { %5865 = vmatpush1.bf16.msra.mxu0 %v10334_v2  ;;  %v12862_v40 = vrot.slane %v4851_v44, %v11278_v6  ;;  %v5239_v29 = vrot.slane %v9581_v46, %v11278_v6  ;;  %v4436_v5 = vrot.slane %v4434_v28, 1  ;;  %v4475_v24 = vrot.slane %v4432_v14, 1 }
 0x341   :  { %5866 = vmatprep.subr.bf16.mxu0 %v10339_v17  ;;  %v12865_v9 = vpack.i.b16 %v4827_v49, %v4968_v56  ;;  %v12867_v22 = vpack.i.b16 %v4826_v37, %v4970_v21  ;;  %v5225_v8 = vrot.slane %v5211_v20, %v11278_v6  ;;  %v4476_v60 = vrot.slane %v4434_v28, 2  ;;  %v10343_v49 = vld [vmem:[#allocation12 + $0x140] ss:$8 sps:$4 sm:$0xff]   ;;  %v10348_v20 = vld [vmem:[#allocation12 + $0x154] ss:$8 sps:$4 sm:$0xff]  }
 0x342   :  { %v4437_v25 = vor.u32 %v4436_v5, %v4432_v14  ;;  %v4484_v16 = vrot.slane %v12703_v7, 2  ;;  %v4485_v1 = vrot.slane %v12721_v35, 2  ;;  %v4852_v19 = vcombine.high %v4836_v34, %v4843_v32 }
 0x343   :  { %v5215_v23 = vcombine.low %v12857_v50, %v12865_v9  ;;  %v9583_v12 = vcombine.low %v12867_v22, %v12862_v40  ;;  %v5276_v38 = vcombine.high %v5225_v8, %v5239_v29  ;;  %v5275_v18 = vcombine.low %v5225_v8, %v5239_v29 }
 0x344   :  { %5867 = vmatpush1.bf16.msra.mxu0 %v10337_v61  ;;  %v4453_v41 = vrot.slane %v12721_v35, 1  ;;  %v4477_v26 = vor.u32 %v4476_v60, %v4475_v24  ;;  %v12878_v3 = vrot.slane %v4484_v16, %v11278_v6  ;;  %v4885_v7 = vcombine.low %v12721_v35, %v4437_v25 }
 0x345   :  { %v5253_v54 = vrot.slane %v5215_v23, %v11278_v6  ;;  %v5267_v59 = vrot.slane %v9583_v12, %v11278_v6  ;;  %v12884_v39 = vrot.slane %v5276_v38, %v11278_v6  ;;  %5868 = vmatprep.subr.bf16.mxu0 %v10342_v30  ;;  %v12887_v52 = vrot.slane %v4852_v19, %v11278_v6 }
 0x346   :  { %v4874_v47 = vrot.slane %v12878_v3, %v11278_v6  ;;  %v4886_v2 = vcombine.low %v4453_v41, %v4477_v26  ;;  %v4893_v34 = vrot.slane %v4885_v7, %v11278_v6  ;;  %v4907_v35 = vrot.slane %v4485_v1, %v11278_v6  ;;  %v10346_v1 = vld [vmem:[#allocation12 + $0x150] ss:$8 sps:$4 sm:$0xff]  }
 0x347   :  { %v5279_v32 = vcombine.high %v5253_v54, %v5267_v59  ;;  %v5278_v46 = vcombine.low %v5253_v54, %v5267_v59  ;;  %v5210_v17 = vcombine.high %v12800_v63, %v12824_v15  ;;  %v5207_v48 = vcombine.high %v12803_v55, %v12827_v36  ;;  %v10378_v63 = vld [vmem:[#allocation12 + $0x1f4] ss:$8 sps:$4 sm:$0xff]   ;;  %v10376_v15 = vld [vmem:[#allocation12 + $0x1f0] ss:$8 sps:$4 sm:$0xff]   ;;  %v10393_v36 = vld [vmem:[#allocation12 + $0x244] ss:$8 sps:$4 sm:$0xff]  }
 0x348   :  { %v12898_v43 = vrot.slane %v5275_v18, %v11278_v6  ;;  %5869 = vmatpush1.bf16.msra.mxu0 %v10340_v42  ;;  %v4883_v37 = vcombine.high %v12862_v40, %v4874_v47  ;;  %v4900_v44 = vrot.slane %v4886_v2, %v11278_v6  ;;  %v4910_v14 = vcombine.high %v4907_v35, %v4907_v35  ;;  %v10388_v55 = vld [vmem:[#allocation12 + $0x230] ss:$8 sps:$4 sm:$0xff]  }
 0x349   :  { %v12903_v28 = vrot.slane %v5279_v32, %v11278_v6  ;;  %v12906_v56 = vrot.slane %v5278_v46, %v11278_v6  ;;  %5870 = vmatprep.subr.bf16.mxu0 %v10345_v31  ;;  %v4931_v21 = vrot.slane %v4907_v35, %v11278_v6  ;;  %v4539_v61 = vrot.slane %v4511_v57, %v11278_v6  ;;  %v10354_v31 = vld [vmem:[#allocation12 + $0x174] ss:$8 sps:$4 sm:$0xff]  }
 0x34a   :  { %v4908_v29 = vcombine.low %v4893_v34, %v4900_v44  ;;  %v4909_v5 = vcombine.high %v4893_v34, %v4900_v44  ;;  %v4938_v24 = vrot.slane %v4910_v14, %v11278_v6  ;;  %v5129_v8 = vrot.slane %v5097_v62, %v11278_v6  ;;  %v10351_v62 = vld [vmem:[#allocation12 + $0x164] ss:$8 sps:$4 sm:$0xff]  }
 0x34b   :  { %v5326_v30 = vcombine.low %v12884_v39, %v12903_v28  ;;  %v5323_v60 = vcombine.low %v12898_v43, %v12906_v56  ;;  %v5327_v25 = vcombine.high %v12884_v39, %v12903_v28  ;;  %v5324_v4 = vcombine.high %v12898_v43, %v12906_v56  ;;  %v10391_v39 = vld [vmem:[#allocation12 + $0x240] ss:$8 sps:$4 sm:$0xff]   ;;  %v10396_v28 = vld [vmem:[#allocation12 + $0x254] ss:$8 sps:$4 sm:$0xff]  }
 0x34c   :  { %5871 = vmatpush1.bf16.msra.mxu0 %v10343_v49  ;;  %v4917_v57 = vrot.slane %v4908_v29, %v11278_v6  ;;  %v4924_v16 = vrot.slane %v4909_v5, %v11278_v6  ;;  %v9578_v10 = vcombine.low %v12739_v13, %v4539_v61  ;;  %v5143_v11 = vrot.slane %v12780_v33, %v11278_v6  ;;  %v10397_v43 = vld [vmem:[#allocation12 + $0x260] ss:$8 sps:$4 sm:$0xff]   ;;  %v10402_v56 = vld [vmem:[#allocation12 + $0x274] ss:$8 sps:$4 sm:$0xff]  }
 0x34d   :  { %5843 = vmatprep.mubr.bf16.mxu0 %v5326_v30  ;;  %5872 = vmatprep.subr.bf16.mxu0 %v10348_v20  ;;  %v5157_v19 = vrot.slane %v12807_v45, %v11278_v6  ;;  %v4739_v23 = vcombine.high %v12817_v58, %v12817_v58  ;;  %v4882_v12 = vcombine.low %v12862_v40, %v4874_v47  ;;  %v10349_v40 = vld [vmem:[#allocation12 + $0x160] ss:$8 sps:$4 sm:$0xff]  }
 0x34e   :  { %5844 = vmatmul.mubr.bf16.gmra.mrb[84].mxu0 %v5323_v60  ;;  %v4939_v38 = vcombine.low %v4917_v57, %v4931_v21  ;;  %v4940_v18 = vcombine.high %v4917_v57, %v4931_v21  ;;  %v4941_v42 = vcombine.low %v4924_v16, %v4938_v24  ;;  %v5115_v13 = vrot.slane %v9578_v10, %v11278_v6  ;;  %v10357_v21 = vld [vmem:[#allocation12 + $0x184] ss:$8 sps:$4 sm:$0xff]   ;;  %v10355_v16 = vld [vmem:[#allocation12 + $0x180] ss:$8 sps:$4 sm:$0xff]  }
 0x34f   :  { %v5163_v41 = vcombine.low %v5143_v11, %v5157_v19  ;;  %v4767_v33 = vrot.slane %v4739_v23, %v11278_v6  ;;  %v5212_v26 = vcombine.high %v12850_v0, %v12853_v53  ;;  %v5216_v45 = vcombine.high %v12857_v50, %v12865_v9 }
 0x350   :  { %v4978_v7 = vunpack.i.h.s16 %v4939_v38  ;;  %v4980_v54 = vunpack.i.h.s16 %v4941_v42  ;;  %v9574_v58 = vpack.i.b16 %v4939_v38, %v4883_v37  ;;  %5873 = vmatpush1.bf16.msra.mxu0 %v10346_v1  ;;  %v5160_v59 = vcombine.low %v5115_v13, %v5129_v8  ;;  %v10360_v1 = vld [vmem:[#allocation12 + $0x194] ss:$8 sps:$4 sm:$0xff]   ;;  %v10363_v38 = vld [vmem:[#allocation12 + $0x1a4] ss:$8 sps:$4 sm:$0xff]  }
 0x351   :  { %5874 = vmatprep.subr.bf16.mxu0 %v10351_v62  ;;  %v5198_v47 = vrot.slane %v5163_v41, %v11278_v6  ;;  %v9582_v2 = vcombine.low %v12838_v27, %v4767_v33  ;;  %v5218_v34 = vcombine.high %v12867_v22, %v4882_v12  ;;  %v5232_v35 = vrot.slane %v5212_v26, %v11278_v6  ;;  %v10352_v22 = vld [vmem:[#allocation12 + $0x170] ss:$8 sps:$4 sm:$0xff]   ;;  %v10366_v13 = vld [vmem:[#allocation12 + $0x1b4] ss:$8 sps:$4 sm:$0xff]   ;;  %v10369_v33 = vld [vmem:[#allocation12 + $0x1c4] ss:$8 sps:$4 sm:$0xff]  }
 0x352   :  { %v9575_v0 = vpack.i.b16 %v4941_v42, %v4978_v7  ;;  %v9576_v53 = vpack.i.b16 %v4940_v18, %v4980_v54  ;;  %v9584_v50 = vcombine.low %v12887_v52, %v9574_v58  ;;  %v5177_v9 = vrot.slane %v5160_v59, %v11278_v6  ;;  %v10361_v42 = vld [vmem:[#allocation12 + $0x1a0] ss:$8 sps:$4 sm:$0xff]   ;;  %v10364_v41 = vld [vmem:[#allocation12 + $0x1b0] ss:$8 sps:$4 sm:$0xff]   ;;  %v10375_v54 = vld [vmem:[#allocation12 + $0x1e4] ss:$8 sps:$4 sm:$0xff]  }
 0x353   :  { %v5246_v32 = vrot.slane %v9582_v2, %v11278_v6  ;;  %v5260_v46 = vrot.slane %v5216_v45, %v11278_v6  ;;  %v5274_v49 = vrot.slane %v5218_v34, %v11278_v6  ;;  %v4853_v37 = vcombine.high %v12878_v3, %v12878_v3  ;;  %v10367_v26 = vld [vmem:[#allocation12 + $0x1c0] ss:$8 sps:$4 sm:$0xff]   ;;  %v10372_v45 = vld [vmem:[#allocation12 + $0x1d4] ss:$8 sps:$4 sm:$0xff]   ;;  %v10370_v7 = vld [vmem:[#allocation12 + $0x1d0] ss:$8 sps:$4 sm:$0xff]  }
 0x354   :  { %v5330_v27 = vcombine.low %v9575_v0, %v9576_v53  ;;  %5875 = vmatpush1.bf16.msra.mxu0 %v10349_v40  ;;  %v12953_v44 = vcombine.low %v5177_v9, %v5198_v47  ;;  %v5331_v14 = vcombine.high %v9575_v0, %v9576_v53  ;;  %v5338_v5 = vrot.slane %v9584_v50, %v11278_v6  ;;  %v10379_v40 = vld [vmem:[#allocation12 + $0x200] ss:$8 sps:$4 sm:$0xff]   ;;  %v10384_v59 = vld [vmem:[#allocation12 + $0x214] ss:$8 sps:$4 sm:$0xff]   ;;  %v10387_v47 = vld [vmem:[#allocation12 + $0x224] ss:$8 sps:$4 sm:$0xff]  }
 0x355   :  { %5876 = vmatprep.subr.bf16.mxu0 %v10354_v31  ;;  %v5277_v20 = vcombine.low %v5232_v35, %v5246_v32  ;;  %v5280_v61 = vcombine.low %v5260_v46, %v5274_v49  ;;  %v4881_v29 = vrot.slane %v4853_v37, %v11278_v6  ;;  %v10382_v31 = vld [vmem:[#allocation12 + $0x210] ss:$8 sps:$4 sm:$0xff]   ;;  %v10385_v2 = vld [vmem:[#allocation12 + $0x220] ss:$8 sps:$4 sm:$0xff]   ;;  %v10390_v34 = vld [vmem:[#allocation12 + $0x234] ss:$8 sps:$4 sm:$0xff]  }
 0x356   :  { %v5352_v24 = vrot.slane %v5330_v27, %v11278_v6  ;;  %v5359_v62 = vrot.slane %v5331_v14, %v11278_v6  ;;  %v10941_v0 = vmov 0   ;;  %v10399_v53 = vld [vmem:[#allocation12 + $0x264] ss:$8 sps:$4 sm:$0xff]   ;;  %v10407_v37 = vld [vmem:[#allocation15 + $0x50] sm:$0xff]  }
 0x357   :  { %v5294_v8 = vrot.slane %v5277_v20, %v11278_v6  ;;  %v5315_v3 = vrot.slane %v5280_v61, %v11278_v6  ;;  %v4884_v30 = vcombine.low %v12887_v52, %v4881_v29  ;;  %v10358_v52 = vld [vmem:[#allocation12 + $0x190] ss:$8 sps:$4 sm:$0xff]   ;;  %v10403_v9 = vld [vmem:[#allocation15 + $0x40] sm:$0xff]  }
 0x358   :  { %v5361_v60 = vcombine.high %v5338_v5, %v5352_v24  ;;  %v5360_v57 = vcombine.low %v5338_v5, %v5352_v24  ;;  %5877 = vmatpush1.bf16.msra.mxu0 %v10352_v22  ;;  %v10404_v32 = vld [vmem:[#allocation15] sm:$0xff]   ;;  %v10405_v46 = vld [vmem:[#allocation15 + $0x48] sm:$0xff]   ;;  %9805 = vmatprep.subr.bf16.mxu1 %v10403_v9  ;;  %v10408_v27 = vld [vmem:[#allocation15 + $0x10] sm:$0xff]  }
 0x359   :  { %5878 = vmatprep.subr.bf16.mxu0 %v10357_v21  ;;  %v12961_v10 = vcombine.low %v5294_v8, %v5315_v3  ;;  %v5329_v11 = vcombine.high %v4884_v30, %v9574_v58  ;;  %v10373_v58 = vld [vmem:[#allocation12 + $0x1e0] ss:$8 sps:$4 sm:$0xff]   ;;  %9806 = vmatpush3.bf16.msra.mxu1 %v10404_v32  ;;  %v10415_v29 = vld [vmem:[#allocation15 + $0x70] sm:$0xff]  }
 0x35a   :  { %v5383_v19 = vrot.slane %v5361_v60, %v11278_v6  ;;  %v5369_v23 = vrot.slane %v5360_v57, %v11278_v6  ;;  %v10406_v49 = vld [vmem:[#allocation15 + $0x8] sm:$0xff]   ;;  %9807 = vmatprep.subr.bf16.mxu1 %v10405_v46  ;;  %v10409_v22 = vld [vmem:[#allocation15 + $0x58] sm:$0xff]   ;;  %v10411_v14 = vld [vmem:[#allocation15 + $0x60] sm:$0xff]  }
 0x35b   :  { %v5345_v12 = vrot.slane %v5329_v11, %v11278_v6  ;;  %v10412_v21 = vld [vmem:[#allocation15 + $0x20] sm:$0xff]   ;;  %v10413_v20 = vld [vmem:[#allocation15 + $0x68] sm:$0xff]   ;;  %v10416_v5 = vld [vmem:[#allocation15 + $0x30] sm:$0xff]  }
 0x35c   :  { %5853 = vmatprep.mubr.bf16.mxu0 %v5383_v19  ;;  %5879 = vmatpush1.bf16.msra.mxu0 %v10355_v16  ;;  %v5385_v35 = vcombine.high %v5383_v19, %v5383_v19  ;;  %v10414_v61 = vld [vmem:[#allocation15 + $0x28] sm:$0xff]   ;;  %v10417_v24 = vld [vmem:[#allocation15 + $0x78] sm:$0xff]   ;;  %v10419_v3 = vld [vmem:[#allocation15 + $0xc0] sm:$0xff]  }
 0x35d   :  { %5854 = vmatmul.mubr.bf16.gmra.mrb[88].mxu0 %v5369_v23  ;;  %5880 = vmatprep.subr.bf16.mxu0 %v10360_v1  ;;  %v12967_v18 = vcombine.low %v5345_v12, %v5359_v62  ;;  %v10418_v8 = vld [vmem:[#allocation15 + $0x38] sm:$0xff]   ;;  %v13993_v30 = vld [vmem:[#allocation42_spill] sm:$0xff] }
 0x35e   :  { %5894 = vmatprep.mubr.bf16.mxu0 %v5210_v17  ;;  %v10381_v17 = vld [vmem:[#allocation12 + $0x204] ss:$8 sps:$4 sm:$0xff]   ;;  %9808 = vmatpush3.bf16.msra.mxu1 %v10406_v49  ;;  %v5066_v60 = vsub.s32 0, %v13993_v30  ;;  %v5062_v57 = vld [vmem:[#allocation13] sm:$0x3]  ;;  %v5070_v16 = vsub.s32 1, %v13993_v30 }
 0x35f   :  { %v5376_v50 = vrot.slane %v12967_v18, %v11278_v6  ;;  %9809 = vmatprep.subr.bf16.mxu1 %v10407_v37 }
 0x360   :  { %5881 = vmatpush1.bf16.msra.mxu0 %v10358_v52  ;;  %v12989_v1 = vrot.slane %v5062_v57, %v5066_v60 }
 0x361   :  { %5882 = vmatprep.subr.bf16.mxu0 %v10363_v38 }
 0x362   :  { %9810 = vmatpush3.bf16.msra.mxu1 %v10408_v27 }
 0x363   :  { %9811 = vmatprep.subr.bf16.mxu1 %v10409_v22 }
 0x364   :  { %5883 = vmatpush1.bf16.msra.mxu0 %v10361_v42 }
 0x365   :  { %5884 = vmatprep.subr.bf16.mxu0 %v10366_v13 }
 0x368   :  { %5885 = vmatpush1.bf16.msra.mxu0 %v10364_v41 }
 0x369   :  { %5886 = vmatprep.subr.bf16.mxu0 %v10369_v33 }
 0x36c   :  { %5887 = vmatpush1.bf16.msra.mxu0 %v10367_v26 }
 0x36d   :  { %5888 = vmatprep.subr.bf16.mxu0 %v10372_v45 }
 0x370   :  { %5889 = vmatpush1.bf16.msra.mxu0 %v10370_v7 }
 0x371   :  { %5890 = vmatprep.subr.bf16.mxu0 %v10375_v54 }
 0x374   :  { %5891 = vmatpush1.bf16.msra.mxu0 %v10373_v58 }
 0x375   :  { %5892 = vmatprep.subr.bf16.mxu0 %v10378_v63 }
 0x378   :  { %5893 = vmatpush1.bf16.msra.mxu0 %v10376_v15 }
 0x379   :  { %5923 = vmatprep.subr.bf16.mxu0 %v10381_v17 }
 0x37b   :  { %5895 = vmatmul.mubr.bf16.vlgmr.msra.gmra.mrb[80].mxu0 %v5207_v48  ;;  %v5384_v48 = vcombine.high %v5369_v23, %v5369_v23 }
 0x37c   :  { %5904 = vmatprep.mubr.bf16.mxu0 %v5327_v25  ;;  %5924 = vmatpush1.bf16.msra.mxu0 %v10379_v40  ;;  %v10394_v25 = vld [vmem:[#allocation12 + $0x250] ss:$8 sps:$4 sm:$0xff]  }
 0x37d   :  { %5925 = vmatprep.subr.bf16.mxu0 %v10384_v59 }
 0x380   :  { %5926 = vmatpush1.bf16.msra.mxu0 %v10382_v31 }
 0x381   :  { %5927 = vmatprep.subr.bf16.mxu0 %v10387_v47 }
 0x383   :  { %5905 = vmatmul.mubr.bf16.gmra.mrb[84].mxu0 %v5324_v4  ;;  %v10400_v4 = vld [vmem:[#allocation12 + $0x270] ss:$8 sps:$4 sm:$0xff]  }
 0x384   :  { %5914 = vmatprep.mubr.bf16.mxu0 %v5385_v35  ;;  %5928 = vmatpush1.bf16.msra.mxu0 %v10385_v2 }
 0x385   :  { %5929 = vmatprep.subr.bf16.mxu0 %v10390_v34 }
 0x388   :  { %5930 = vmatpush1.bf16.msra.mxu0 %v10388_v55 }
 0x389   :  { %5931 = vmatprep.subr.bf16.mxu0 %v10393_v36 }
 0x38b   :  { %5915 = vmatmul.mubr.bf16.gmra.mrb[88].mxu0 %v5384_v48 }
 0x38c   :  { %5932 = vmatpush1.bf16.msra.mxu0 %v10391_v39  ;;  %5955 = vmatprep.mubr.bf16.mxu0 %v10941_v0 }
 0x38d   :  { %5933 = vmatprep.subr.bf16.mxu0 %v10396_v28 }
 0x390   :  { %5934 = vmatpush1.bf16.msra.mxu0 %v10394_v25 }
 0x391   :  { %5935 = vmatprep.subr.bf16.mxu0 %v10399_v53 }
 0x394   :  { %5936 = vmatpush1.bf16.msra.mxu0 %v10397_v43 }
 0x395   :  { %5937 = vmatprep.subr.bf16.mxu0 %v10402_v56 }
 0x398   :  { %5938 = vmatpush1.bf16.msra.mxu0 %v10400_v4 }
 0x39b   :  { %5956 = vmatmul.mubr.bf16.vlgmr.msra.gmra.mrb[80].mxu0 %v12953_v44  ;;  %v10410_v44 = vld [vmem:[#allocation15 + $0x18] sm:$0xff]  }
 0x39c   :  { %5965 = vmatprep.mubr.bf16.mxu0 %v10941_v0  ;;  %9812 = vmatpush3.bf16.msra.mxu1 %v10410_v44 }
 0x39d   :  { %9813 = vmatprep.subr.bf16.mxu1 %v10411_v14 }
 0x3a0   :  { %9814 = vmatpush3.bf16.msra.mxu1 %v10412_v21 }
 0x3a1   :  { %9815 = vmatprep.subr.bf16.mxu1 %v10413_v20 }
 0x3a3   :  { %5966 = vmatmul.mubr.bf16.gmra.mrb[84].mxu0 %v12961_v10  ;;  %v12993_v10 = vrot.slane %v5062_v57, %v5070_v16 }
 0x3a4   :  { %5975 = vmatprep.mubr.bf16.mxu0 %v10941_v0  ;;  %9816 = vmatpush3.bf16.msra.mxu1 %v10414_v61 }
 0x3a5   :  { %9817 = vmatprep.subr.bf16.mxu1 %v10415_v29 }
 0x3a8   :  { %9818 = vmatpush3.bf16.msra.mxu1 %v10416_v5 }
 0x3a9   :  { %9819 = vmatprep.subr.bf16.mxu1 %v10417_v24 }
 0x3ab   :  { %5976 = vmatmul.mubr.bf16.gmra.mrb[88].mxu0 %v5376_v50 }
 0x3ac   :  { %9820 = vmatpush3.bf16.msra.mxu1 %v10418_v8 }
 0x3ad   :  { %9833 = vmatprep.subr.bf16.mxu1 %v10419_v3 }
 0x46e   :  { %v5957_v11 = vpop.f32.mrb[80].mxu0 }
 0x46f   :  { %v10188_v62 = vadd.f32 %v5957_v11, %v12989_v1  ;;  %v5959_v19 = vpop.f32.mrb[81].mxu0 }
 0x470   :  { %v10189_v23 = vadd.f32 %v5959_v19, %v12993_v10  ;;  %v5961_v12 = vpop.f32.mrb[82].mxu0 }
 0x471   :  { %v5984_v52 = vmax.f32 %v10188_v62, 0.0  ;;  %v10190_v38 = vadd.f32 %v5961_v12, %v12989_v1  ;;  %v5963_v18 = vpop.f32.mrb[83].mxu0 }
 0x472   :  { %v5985_v42 = vmax.f32 %v10189_v23, 0.0  ;;  %v10191_v13 = vadd.f32 %v5963_v18, %v12993_v10 }
 0x473   :  { %v5986_v41 = vmax.f32 %v10190_v38, 0.0 }
 0x474   :  { %v6004_v33 = vcombine.low %v5984_v52, %v5985_v42  ;;  %v6005_v26 = vcombine.high %v5984_v52, %v5985_v42  ;;  %v5987_v45 = vmax.f32 %v10191_v13, 0.0 }
 0x476   :  { %v6012_v7 = vrot.slane %v6004_v33, %v11278_v6  ;;  %v6019_v54 = vrot.slane %v6005_v26, %v11278_v6  ;;  %v6054_v58 = vcombine.low %v5986_v41, %v5987_v45  ;;  %v6055_v63 = vcombine.high %v5986_v41, %v5987_v45  ;;  %v5967_v15 = vpop.f32.mrb[84].mxu0 }
 0x477   :  { %v13002_v17 = vadd.f32 %v5967_v15, %v12989_v1  ;;  %v5969_v40 = vpop.f32.mrb[85].mxu0 }
 0x478   :  { %v6020_v59 = vcombine.high %v6012_v7, %v6012_v7  ;;  %v6021_v31 = vcombine.high %v6019_v54, %v6019_v54  ;;  %v6028_v47 = vrot.slane %v6012_v7, %v11278_v6  ;;  %v6035_v2 = vrot.slane %v6019_v54, %v11278_v6  ;;  %v13006_v34 = vpop.f32.mrb[86].mxu0 }
 0x479   :  { %v6062_v35 = vrot.slane %v6054_v58, %v11278_v6  ;;  %v6069_v55 = vrot.slane %v6055_v63, %v11278_v6  ;;  %v5988_v36 = vmax.f32 %v13002_v17, 0.0  ;;  %v13012_v39 = vadd.f32 %v5969_v40, %v12993_v10  ;;  %v13014_v48 = vpop.f32.mrb[87].mxu0 }
 0x47a   :  { %v6042_v28 = vrot.slane %v6020_v59, %v11278_v6  ;;  %v6049_v25 = vrot.slane %v6021_v31, %v11278_v6  ;;  %v6051_v0 = vcombine.high %v6035_v2, %v6035_v2  ;;  %v6276_v53 = vrot.slane %v6035_v2, %v11278_v6 }
 0x47b   :  { %v6070_v43 = vcombine.high %v6062_v35, %v6062_v35  ;;  %v6071_v56 = vcombine.high %v6069_v55, %v6069_v55  ;;  %v6078_v4 = vrot.slane %v6062_v35, %v11278_v6  ;;  %v6085_v50 = vrot.slane %v6069_v55, %v11278_v6 }
 0x47c   :  { %v6254_v9 = vcombine.low %v6028_v47, %v6042_v28  ;;  %v9665_v32 = vcombine.high %v6028_v47, %v6042_v28  ;;  %v6279_v46 = vcombine.high %v6276_v53, %v6276_v53  ;;  %v6300_v49 = vrot.slane %v6276_v53, %v11278_v6 }
 0x47d   :  { %v6310_v37 = vcombine.low %v6049_v25, %v6051_v0  ;;  %v6053_v27 = vcombine.high %v6049_v25, %v6049_v25  ;;  %v6092_v22 = vrot.slane %v6070_v43, %v11278_v6  ;;  %v13024_v44 = vrot.slane %v6071_v56, %v11278_v6 }
 0x47e   :  { %v6262_v14 = vrot.slane %v6254_v9, %v11278_v6  ;;  %v6269_v21 = vrot.slane %v9665_v32, %v11278_v6  ;;  %v6307_v20 = vrot.slane %v6279_v46, %v11278_v6  ;;  %v6101_v61 = vcombine.high %v6085_v50, %v6085_v50  ;;  %v13029_v29 = vpop.f32.mrb[88].mxu0 }
 0x47f   :  { %v6318_v5 = vrot.slane %v6310_v37, %v11278_v6  ;;  %v6311_v24 = vcombine.low %v6053_v27, %v6078_v4  ;;  %v6332_v8 = vrot.slane %v6092_v22, %v11278_v6  ;;  %v9666_v3 = vcombine.high %v6078_v4, %v6092_v22  ;;  %v13033_v57 = vpop.f32.mrb[89].mxu0 }
 0x480   :  { %v6277_v11 = vcombine.low %v6262_v14, %v6269_v21  ;;  %v6278_v62 = vcombine.high %v6262_v14, %v6269_v21  ;;  %v6367_v19 = vcombine.low %v6085_v50, %v13024_v44  ;;  %v6388_v23 = vrot.slane %v6101_v61, %v11278_v6  ;;  %v5981_v12 = vpop.f32.mrb[90].mxu0 }
 0x481   :  { %v6325_v52 = vrot.slane %v6311_v24, %v11278_v6  ;;  %v6335_v38 = vcombine.high %v6332_v8, %v6332_v8  ;;  %v6356_v18 = vrot.slane %v6332_v8, %v11278_v6  ;;  %v6374_v42 = vrot.slane %v9666_v3, %v11278_v6  ;;  %v5982_v13 = vpop.f32.mrb[91].mxu0 }
 0x482   :  { %v6286_v41 = vrot.slane %v6277_v11, %v11278_v6  ;;  %v6293_v33 = vrot.slane %v6278_v62, %v11278_v6  ;;  %v6381_v26 = vrot.slane %v6367_v19, %v11278_v6  ;;  %v6391_v45 = vcombine.high %v6388_v23, %v6388_v23 }
 0x483   :  { %v6333_v7 = vcombine.low %v6318_v5, %v6325_v52  ;;  %v6334_v54 = vcombine.high %v6318_v5, %v6325_v52  ;;  %v6363_v58 = vrot.slane %v6335_v38, %v11278_v6  ;;  %v6412_v63 = vrot.slane %v6388_v23, %v11278_v6 }
 0x484   :  { %v6308_v15 = vcombine.low %v6286_v41, %v6300_v49  ;;  %v6309_v40 = vcombine.low %v6293_v33, %v6307_v20  ;;  %v6389_v59 = vcombine.low %v6374_v42, %v6381_v26  ;;  %v6390_v31 = vcombine.high %v6374_v42, %v6381_v26 }
 0x485   :  { %v6342_v47 = vrot.slane %v6333_v7, %v11278_v6  ;;  %v6349_v2 = vrot.slane %v6334_v54, %v11278_v6  ;;  %v6419_v35 = vrot.slane %v6391_v45, %v11278_v6  ;;  %v5989_v55 = vmax.f32 %v13012_v39, 0.0 }
 0x486   :  { %v6718_v28 = vpack.c.bf16 %v6308_v15, %v6308_v15  ;;  %v6719_v25 = vpack.c.bf16 %v6309_v40, %v6309_v40  ;;  %v9669_v0 = vpack.c.bf16 %v6309_v40, %v6308_v15  ;;  %v6398_v53 = vrot.slane %v6389_v59, %v11278_v6 }
 0x487   :  { %v6364_v43 = vcombine.low %v6342_v47, %v6356_v18  ;;  %v6365_v56 = vcombine.low %v6349_v2, %v6363_v58  ;;  %v6405_v4 = vrot.slane %v6390_v31, %v11278_v6  ;;  %v6103_v50 = vcombine.high %v13024_v44, %v13024_v44 }
 0x488   :  { %v6735_v9 = vshrl.u32 %v6718_v28, 16  ;;  %v6737_v32 = vshll.u32 %v6718_v28, 16  ;;  %v6742_v46 = vshrl.u32 %v6719_v25, 16  ;;  %v6744_v49 = vshll.u32 %v6719_v25, 16 }
 0x489   :  { %v6862_v37 = vrot.slane %v6718_v28, 1  ;;  %v6863_v27 = vrot.slane %v6719_v25, 1  ;;  %v13054_v39 = vrot.slane %v9669_v0, %v11278_v6  ;;  %v13056_v22 = vcombine.low %v6398_v53, %v6412_v63 }
 0x48a   :  { %v6739_v14 = vrot.slane %v6737_v32, 1  ;;  %v6746_v21 = vrot.slane %v6744_v49, 1  ;;  %v13058_v20 = vcombine.low %v6405_v4, %v6419_v35  ;;  %v13060_v61 = vpack.c.bf16 %v6364_v43, %v6364_v43 }
 0x48b   :  { %v13062_v5 = vcombine.low %v6862_v37, %v6863_v27  ;;  %v13064_v24 = vpack.c.bf16 %v6365_v56, %v6365_v56  ;;  %v6722_v8 = vpack.c.bf16 %v13056_v22, %v13056_v22  ;;  %v9670_v3 = vpack.c.bf16 %v6365_v56, %v6364_v43 }
 0x48c   :  { %v13068_v11 = vor.u32 %v6739_v14, %v6735_v9  ;;  %v13072_v62 = vpack.c.bf16 %v13058_v20, %v13058_v20  ;;  %v6749_v19 = vshrl.u32 %v13060_v61, 16  ;;  %v6751_v23 = vshll.u32 %v13060_v61, 16 }
 0x48d   :  { %v6756_v12 = vshrl.u32 %v13064_v24, 16  ;;  %v6758_v52 = vshll.u32 %v13064_v24, 16  ;;  %v6763_v38 = vshrl.u32 %v6722_v8, 16  ;;  %v6765_v18 = vshll.u32 %v6722_v8, 16 }
 0x48e   :  { %v6753_v42 = vrot.slane %v6751_v23, 1  ;;  %v6770_v13 = vshrl.u32 %v13072_v62, 16  ;;  %v6772_v41 = vshll.u32 %v13072_v62, 16  ;;  %v6864_v33 = vrot.slane %v13060_v61, 1 }
 0x48f   :  { %v6760_v26 = vrot.slane %v6758_v52, 1  ;;  %v6767_v45 = vrot.slane %v6765_v18, 1  ;;  %v6865_v7 = vrot.slane %v13064_v24, 1  ;;  %v6866_v54 = vrot.slane %v6722_v8, 1 }
 0x490   :  { %v13082_v58 = vor.u32 %v6753_v42, %v6749_v19  ;;  %v6867_v63 = vrot.slane %v13072_v62, 1  ;;  %v13086_v15 = vrot.slane %v9670_v3, %v11278_v6  ;;  %v9671_v40 = vpack.c.bf16 %v13058_v20, %v13056_v22 }
 0x491   :  { %v13090_v59 = vor.u32 %v6760_v26, %v6756_v12  ;;  %v6104_v31 = vcombine.low %v5988_v36, %v5989_v55  ;;  %v6105_v47 = vcombine.high %v5988_v36, %v5989_v55  ;;  %v10194_v2 = vadd.f32 %v13006_v34, %v12989_v1 }
 0x492   :  { %v13098_v35 = vcombine.low %v6866_v54, %v6867_v63  ;;  %v10195_v28 = vadd.f32 %v13014_v48, %v12993_v10  ;;  %v10196_v25 = vadd.f32 %v13029_v29, %v12989_v1  ;;  %v10197_v0 = vadd.f32 %v13033_v57, %v12993_v10 }
 0x493   :  { %v6112_v53 = vrot.slane %v6104_v31, %v11278_v6  ;;  %v6119_v43 = vrot.slane %v6105_v47, %v11278_v6  ;;  %v5990_v17 = vmax.f32 %v10194_v2, 0.0  ;;  %v13108_v36 = vor.u32 %v6746_v21, %v6742_v46 }
 0x494   :  { %v5991_v55 = vmax.f32 %v10195_v28, 0.0  ;;  %v5992_v34 = vmax.f32 %v10196_v25, 0.0  ;;  %v5993_v56 = vmax.f32 %v10197_v0, 0.0  ;;  %v13110_v4 = vor.u32 %v6767_v45, %v6763_v38 }
 0x495   :  { %v6120_v9 = vcombine.high %v6112_v53, %v6112_v53  ;;  %v6121_v48 = vcombine.high %v6119_v43, %v6119_v43  ;;  %v6128_v32 = vrot.slane %v6112_v53, %v11278_v6  ;;  %v6135_v1 = vrot.slane %v6119_v43, %v11278_v6 }
 0x496   :  { %v6154_v29 = vcombine.low %v5990_v17, %v5991_v55  ;;  %v6155_v10 = vcombine.high %v5990_v17, %v5991_v55  ;;  %v6204_v57 = vcombine.low %v5992_v34, %v5993_v56  ;;  %v6205_v49 = vcombine.high %v5992_v34, %v5993_v56 }
 0x497   :  { %v6142_v37 = vrot.slane %v6120_v9, %v11278_v6  ;;  %v6149_v46 = vrot.slane %v6121_v48, %v11278_v6  ;;  %v6150_v27 = vcombine.high %v6128_v32, %v6128_v32  ;;  %v6422_v14 = vcombine.low %v6103_v50, %v6128_v32 }
 0x498   :  { %v6162_v21 = vrot.slane %v6154_v29, %v11278_v6  ;;  %v6169_v8 = vrot.slane %v6155_v10, %v11278_v6  ;;  %v13122_v3 = vrot.slane %v6204_v57, %v11278_v6  ;;  %v13125_v19 = vrot.slane %v6205_v49, %v11278_v6 }
 0x499   :  { %v6152_v23 = vcombine.high %v6142_v37, %v6142_v37  ;;  %v6423_v12 = vcombine.low %v6142_v37, %v6150_v27  ;;  %v6430_v52 = vrot.slane %v6422_v14, %v11278_v6  ;;  %v6478_v38 = vcombine.low %v6135_v1, %v6149_v46 }
 0x49a   :  { %v9667_v18 = vcombine.high %v6135_v1, %v6149_v46  ;;  %v6170_v42 = vcombine.high %v6162_v21, %v6162_v21  ;;  %v6171_v26 = vcombine.high %v6169_v8, %v6169_v8  ;;  %v6178_v44 = vrot.slane %v6162_v21, %v11278_v6 }
 0x49b   :  { %v6437_v50 = vrot.slane %v6423_v12, %v11278_v6  ;;  %v6444_v45 = vrot.slane %v6152_v23, %v11278_v6  ;;  %v6486_v54 = vrot.slane %v6478_v38, %v11278_v6  ;;  %v6185_v63 = vrot.slane %v6169_v8, %v11278_v6 }
 0x49c   :  { %v6493_v31 = vrot.slane %v9667_v18, %v11278_v6  ;;  %v6192_v47 = vrot.slane %v6170_v42, %v11278_v6  ;;  %v6199_v2 = vrot.slane %v6171_v26, %v11278_v6  ;;  %v6200_v28 = vcombine.high %v6178_v44, %v6178_v44 }
 0x49d   :  { %v6445_v25 = vcombine.low %v6430_v52, %v6437_v50  ;;  %v6446_v0 = vcombine.high %v6430_v52, %v6437_v50  ;;  %v6447_v53 = vcombine.high %v6444_v45, %v6444_v45  ;;  %v6468_v43 = vrot.slane %v6444_v45, %v11278_v6 }
 0x49e   :  { %v6501_v17 = vcombine.low %v6486_v54, %v6493_v31  ;;  %v6502_v55 = vcombine.high %v6486_v54, %v6493_v31  ;;  %v6202_v34 = vcombine.high %v6192_v47, %v6192_v47  ;;  %v6500_v56 = vrot.slane %v6178_v44, %v11278_v6 }
 0x49f   :  { %v6454_v9 = vrot.slane %v6445_v25, %v11278_v6  ;;  %v6461_v48 = vrot.slane %v6446_v0, %v11278_v6  ;;  %v6475_v32 = vrot.slane %v6447_v53, %v11278_v6  ;;  %v6534_v1 = vcombine.low %v6192_v47, %v6200_v28 }
 0x4a0   :  { %v6517_v29 = vrot.slane %v6502_v55, %v11278_v6  ;;  %v6503_v10 = vcombine.high %v6500_v56, %v6500_v56  ;;  %v6510_v57 = vrot.slane %v6501_v17, %v11278_v6  ;;  %v6524_v49 = vrot.slane %v6500_v56, %v11278_v6 }
 0x4a1   :  { %v6476_v37 = vcombine.low %v6454_v9, %v6468_v43  ;;  %v6477_v46 = vcombine.low %v6461_v48, %v6475_v32  ;;  %v6535_v27 = vcombine.low %v6202_v34, %v6185_v63  ;;  %v6542_v14 = vrot.slane %v6534_v1, %v11278_v6 }
 0x4a2   :  { %v6531_v21 = vrot.slane %v6503_v10, %v11278_v6  ;;  %v6532_v8 = vcombine.low %v6510_v57, %v6524_v49  ;;  %v6556_v23 = vrot.slane %v6199_v2, %v11278_v6  ;;  %v9668_v12 = vcombine.high %v6185_v63, %v6199_v2 }
 0x4a3   :  { %v13147_v52 = vpack.c.bf16 %v6476_v37, %v6476_v37  ;;  %v13149_v38 = vpack.c.bf16 %v6477_v46, %v6477_v46  ;;  %v9672_v18 = vpack.c.bf16 %v6477_v46, %v6476_v37  ;;  %v6549_v42 = vrot.slane %v6535_v27, %v11278_v6 }
 0x4a4   :  { %v6533_v26 = vcombine.low %v6517_v29, %v6531_v21  ;;  %v6559_v44 = vcombine.high %v6556_v23, %v6556_v23  ;;  %v6580_v50 = vrot.slane %v6556_v23, %v11278_v6  ;;  %v13154_v45 = vrot.slane %v9668_v12, %v11278_v6 }
 0x4a5   :  { %v6777_v54 = vshrl.u32 %v13147_v52, 16  ;;  %v6779_v31 = vshll.u32 %v13147_v52, 16  ;;  %v6784_v63 = vshrl.u32 %v13149_v38, 16  ;;  %v6786_v47 = vshll.u32 %v13149_v38, 16 }
 0x4a6   :  { %v6868_v2 = vrot.slane %v13147_v52, 1  ;;  %v6869_v28 = vrot.slane %v13149_v38, 1  ;;  %v13163_v25 = vrot.slane %v9672_v18, %v11278_v6  ;;  %v6557_v0 = vcombine.low %v6542_v14, %v6549_v42 }
 0x4a7   :  { %v6781_v53 = vrot.slane %v6779_v31, 1  ;;  %v6788_v43 = vrot.slane %v6786_v47, 1  ;;  %v6558_v17 = vcombine.high %v6542_v14, %v6549_v42  ;;  %v6587_v55 = vrot.slane %v6559_v44, %v11278_v6 }
 0x4a8   :  { %v6566_v34 = vrot.slane %v6557_v0, %v11278_v6  ;;  %v6726_v56 = vpack.c.bf16 %v6532_v8, %v6532_v8  ;;  %v6727_v9 = vpack.c.bf16 %v6533_v26, %v6533_v26  ;;  %v9673_v48 = vpack.c.bf16 %v6533_v26, %v6532_v8 }
 0x4a9   :  { %v13167_v32 = vor.u32 %v6781_v53, %v6777_v54  ;;  %v13169_v1 = vor.u32 %v6788_v43, %v6784_v63  ;;  %v6573_v29 = vrot.slane %v6558_v17, %v11278_v6  ;;  %v6220_v10 = vcombine.high %v13122_v3, %v13122_v3 }
 0x4aa   :  { %v6588_v57 = vcombine.low %v6566_v34, %v6580_v50  ;;  %v6791_v49 = vshrl.u32 %v6726_v56, 16  ;;  %v6793_v37 = vshll.u32 %v6726_v56, 16  ;;  %v6798_v46 = vshrl.u32 %v6727_v9, 16 }
 0x4ab   :  { %v6589_v27 = vcombine.low %v6573_v29, %v6587_v55  ;;  %v6800_v14 = vshll.u32 %v6727_v9, 16  ;;  %v6870_v21 = vrot.slane %v6726_v56, 1  ;;  %v6871_v23 = vrot.slane %v6727_v9, 1 }
 0x4ac   :  { %v13174_v12 = vpack.c.bf16 %v6588_v57, %v6588_v57  ;;  %v6795_v8 = vrot.slane %v6793_v37, 1  ;;  %v13177_v18 = vrot.slane %v9673_v48, %v11278_v6  ;;  %v6221_v42 = vcombine.high %v13125_v19, %v13125_v19 }
 0x4ad   :  { %v13181_v26 = vpack.c.bf16 %v6589_v27, %v6589_v27  ;;  %v6802_v44 = vrot.slane %v6800_v14, 1  ;;  %v13183_v50 = vcombine.low %v6870_v21, %v6871_v23  ;;  %v9674_v54 = vpack.c.bf16 %v6589_v27, %v6588_v57 }
 0x4ae   :  { %v13185_v31 = vor.u32 %v6795_v8, %v6791_v49  ;;  %v6805_v63 = vshrl.u32 %v13174_v12, 16  ;;  %v6807_v47 = vshll.u32 %v13174_v12, 16  ;;  %v6872_v0 = vrot.slane %v13174_v12, 1 }
 0x4af   :  { %v6812_v53 = vshrl.u32 %v13181_v26, 16  ;;  %v6814_v43 = vshll.u32 %v13181_v26, 16  ;;  %v6873_v17 = vrot.slane %v13181_v26, 1  ;;  %v13194_v55 = vrot.slane %v9674_v54, %v11278_v6 }
 0x4b0   :  { %v6809_v34 = vrot.slane %v6807_v47, 1  ;;  %v6228_v56 = vrot.slane %v13122_v3, %v11278_v6  ;;  %v6235_v9 = vrot.slane %v13125_v19, %v11278_v6  ;;  %v6242_v48 = vrot.slane %v6220_v10, %v11278_v6 }
 0x4b1   :  { %v6816_v29 = vrot.slane %v6814_v43, 1  ;;  %v6249_v57 = vrot.slane %v6221_v42, %v11278_v6  ;;  %v6774_v49 = vrot.slane %v6772_v41, 1  ;;  %v13204_v37 = vor.u32 %v6802_v44, %v6798_v46 }
 0x4b2   :  { %v13206_v27 = vor.u32 %v6809_v34, %v6805_v63  ;;  %v6250_v14 = vcombine.high %v6228_v56, %v6228_v56  ;;  %v6251_v21 = vcombine.high %v6235_v9, %v6235_v9  ;;  %v6252_v23 = vcombine.high %v6242_v48, %v6242_v48 }
 0x4b3   :  { %v13208_v8 = vor.u32 %v6816_v29, %v6812_v53  ;;  %v6253_v3 = vcombine.high %v6249_v57, %v6249_v57  ;;  %v6591_v54 = vcombine.low %v6228_v56, %v6242_v48  ;;  %v13212_v19 = vor.u32 %v6774_v49, %v6770_v13 }
 0x4b4   :  { %v6612_v10 = vrot.slane %v6250_v14, %v11278_v6  ;;  %v6646_v42 = vcombine.low %v6252_v23, %v6235_v9  ;;  %v6647_v47 = vcombine.low %v6249_v57, %v6251_v21  ;;  %v6879_v41 = vcombine.low %v13068_v11, %v13108_v36 }
 0x4b5   :  { %v6605_v46 = vrot.slane %v6591_v54, %v11278_v6  ;;  %v6668_v44 = vrot.slane %v6253_v3, %v11278_v6  ;;  %v13221_v63 = vrot.slane %v13062_v5, %v11278_v6  ;;  %v6936_v62 = vcombine.low %v13082_v58, %v13090_v59 }
 0x4b6   :  { %v6615_v13 = vcombine.high %v6612_v10, %v6612_v10  ;;  %v6636_v53 = vrot.slane %v6612_v10, %v11278_v6  ;;  %v6654_v43 = vrot.slane %v6646_v42, %v11278_v6  ;;  %v6661_v34 = vrot.slane %v6647_v47, %v11278_v6 }
 0x4b7   :  { %v6613_v11 = vcombine.low %v13154_v45, %v6605_v46  ;;  %v6614_v36 = vcombine.high %v13154_v45, %v6605_v46  ;;  %v6671_v56 = vcombine.high %v6668_v44, %v6668_v44  ;;  %v6692_v9 = vrot.slane %v6668_v44, %v11278_v6 }
 0x4b8   :  { %v6643_v5 = vrot.slane %v6615_v13, %v11278_v6  ;;  %v6669_v48 = vcombine.low %v6654_v43, %v6661_v34  ;;  %v6670_v29 = vcombine.high %v6654_v43, %v6661_v34  ;;  %v6894_v58 = vrot.slane %v6879_v41, %v11278_v6 }
 0x4b9   :  { %v6622_v59 = vrot.slane %v6613_v11, %v11278_v6  ;;  %v6629_v57 = vrot.slane %v6614_v36, %v11278_v6  ;;  %v6699_v49 = vrot.slane %v6671_v56, %v11278_v6  ;;  %v6904_v14 = vcombine.high %v13221_v63, %v13221_v63 }
 0x4ba   :  { %v6678_v45 = vrot.slane %v6669_v48, %v11278_v6  ;;  %v6685_v21 = vrot.slane %v6670_v29, %v11278_v6  ;;  %v6902_v23 = vcombine.low %v13054_v39, %v6894_v58  ;;  %v6903_v3 = vcombine.high %v13054_v39, %v6894_v58 }
 0x4bb   :  { %v13242_v54 = vcombine.low %v6622_v59, %v6636_v53  ;;  %v13244_v10 = vcombine.low %v6629_v57, %v6643_v5  ;;  %v13247_v42 = vrot.slane %v6904_v14, %v11278_v6  ;;  %v6937_v47 = vcombine.low %v6864_v33, %v6865_v7 }
 0x4bc   :  { %v13253_v41 = vcombine.low %v6678_v45, %v6692_v9  ;;  %v13255_v46 = vcombine.low %v6685_v21, %v6699_v49  ;;  %v13258_v44 = vrot.slane %v6902_v23, %v11278_v6  ;;  %v13261_v39 = vrot.slane %v6903_v3, %v11278_v6 }
 0x4bd   :  { %v13265_v13 = vpack.c.bf16 %v13242_v54, %v13242_v54  ;;  %v13269_v24 = vpack.c.bf16 %v13244_v10, %v13244_v10  ;;  %v9675_v61 = vpack.c.bf16 %v13244_v10, %v13242_v54  ;;  %v6951_v33 = vrot.slane %v6936_v62, %v11278_v6 }
 0x4be   :  { %v13276_v7 = vpack.c.bf16 %v13253_v41, %v13253_v41  ;;  %v13280_v53 = vpack.c.bf16 %v13255_v46, %v13255_v46  ;;  %v9676_v43 = vpack.c.bf16 %v13255_v46, %v13253_v41  ;;  %v6934_v34 = vcombine.low %v13261_v39, %v13247_v42 }
 0x4bf   :  { %v6819_v11 = vshrl.u32 %v13265_v13, 16  ;;  %v6821_v36 = vshll.u32 %v13265_v13, 16  ;;  %v6874_v62 = vrot.slane %v13265_v13, 1  ;;  %v6875_v56 = vrot.slane %v13269_v24, 1 }
 0x4c0   :  { %v6833_v9 = vshrl.u32 %v13276_v7, 16  ;;  %v6835_v5 = vshll.u32 %v13276_v7, 16  ;;  %v6840_v48 = vshrl.u32 %v13280_v53, 16  ;;  %v6842_v29 = vshll.u32 %v13280_v53, 16 }
 0x4c1   :  { %v6958_v58 = vrot.slane %v6937_v47, %v11278_v6  ;;  %v6959_v59 = vcombine.low %v13086_v15, %v6951_v33  ;;  %v6960_v57 = vcombine.high %v13086_v15, %v6951_v33  ;;  %v6993_v49 = vcombine.low %v13110_v4, %v13212_v19 }
 0x4c2   :  { %v6837_v14 = vrot.slane %v6835_v5, 1  ;;  %v6844_v45 = vrot.slane %v6842_v29, 1  ;;  %v7001_v21 = vrot.slane %v9671_v40, %v11278_v6  ;;  %v13305_v23 = vrot.slane %v13098_v35, %v11278_v6 }
 0x4c3   :  { %v6961_v3 = vcombine.high %v6958_v58, %v6958_v58  ;;  %v6968_v42 = vrot.slane %v6959_v59, %v11278_v6  ;;  %v6975_v47 = vrot.slane %v6960_v57, %v11278_v6  ;;  %v6982_v15 = vrot.slane %v6958_v58, %v11278_v6 }
 0x4c4   :  { %v7008_v4 = vrot.slane %v6993_v49, %v11278_v6  ;;  %v7018_v19 = vcombine.high %v13305_v23, %v13305_v23  ;;  %v7050_v22 = vcombine.low %v13167_v32, %v13169_v1  ;;  %v7051_v20 = vcombine.low %v6868_v2, %v6869_v28 }
 0x4c5   :  { %v6989_v40 = vrot.slane %v6961_v3, %v11278_v6  ;;  %v6990_v35 = vcombine.low %v6968_v42, %v6982_v15  ;;  %v7107_v39 = vcombine.low %v13185_v31, %v13204_v37  ;;  %v13324_v33 = vrot.slane %v13183_v50, %v11278_v6 }
 0x4c6   :  { %v7016_v5 = vcombine.low %v7001_v21, %v7008_v4  ;;  %v7017_v29 = vcombine.high %v7001_v21, %v7008_v4  ;;  %v7046_v58 = vrot.slane %v7018_v19, %v11278_v6  ;;  %v7065_v32 = vrot.slane %v7050_v22, %v11278_v6 }
 0x4c7   :  { %v6991_v38 = vcombine.low %v6975_v47, %v6989_v40  ;;  %v7072_v52 = vrot.slane %v7051_v20, %v11278_v6  ;;  %v7122_v2 = vrot.slane %v7107_v39, %v11278_v6  ;;  %v7132_v28 = vcombine.high %v13324_v33, %v13324_v33 }
 0x4c8   :  { %v13333_v1 = vrot.slane %v7016_v5, %v11278_v6  ;;  %v7032_v50 = vrot.slane %v7017_v29, %v11278_v6  ;;  %v7073_v31 = vcombine.low %v13163_v25, %v7065_v32  ;;  %v7074_v37 = vcombine.high %v13163_v25, %v7065_v32 }
 0x4c9   :  { %v7075_v59 = vcombine.high %v7072_v52, %v7072_v52  ;;  %v7096_v57 = vrot.slane %v7072_v52, %v11278_v6  ;;  %v7130_v49 = vcombine.low %v13177_v18, %v7122_v2  ;;  %v7131_v21 = vcombine.high %v13177_v18, %v7122_v2 }
 0x4ca   :  { %v7048_v3 = vcombine.low %v7032_v50, %v7046_v58  ;;  %v7082_v42 = vrot.slane %v7073_v31, %v11278_v6  ;;  %v7089_v47 = vrot.slane %v7074_v37, %v11278_v6  ;;  %v7160_v15 = vrot.slane %v7132_v28, %v11278_v6 }
 0x4cb   :  { %v7103_v4 = vrot.slane %v7075_v59, %v11278_v6  ;;  %v13346_v19 = vrot.slane %v7130_v49, %v11278_v6  ;;  %v7146_v25 = vrot.slane %v7131_v21, %v11278_v6  ;;  %v7164_v22 = vcombine.low %v13206_v27, %v13208_v8 }
 0x4cc   :  { %v7104_v20 = vcombine.low %v7082_v42, %v7096_v57  ;;  %v7165_v18 = vcombine.low %v6872_v0, %v6873_v17  ;;  %v7338_v40 = vunpack.i.h.s16 %v6990_v35  ;;  %v13355_v39 = vpack.i.b16 %v6990_v35, %v6934_v34 }
 0x4cd   :  { %v7105_v5 = vcombine.low %v7089_v47, %v7103_v4  ;;  %v7162_v29 = vcombine.low %v7146_v25, %v7160_v15  ;;  %v7179_v58 = vrot.slane %v7164_v22, %v11278_v6  ;;  %v6823_v32 = vrot.slane %v6821_v36, 1 }
 0x4ce   :  { %v7186_v52 = vrot.slane %v7165_v18, %v11278_v6  ;;  %v7344_v2 = vunpack.i.h.s16 %v7104_v20  ;;  %v13359_v28 = vpack.i.b16 %v6991_v38, %v7338_v40  ;;  %v13361_v27 = vpack.i.b16 %v7104_v20, %v7048_v3 }
 0x4cf   :  { %v7187_v26 = vcombine.low %v13194_v55, %v7179_v58  ;;  %v9686_v12 = vcombine.low %v13258_v44, %v13355_v39  ;;  %v6824_v0 = vor.u32 %v6823_v32, %v6819_v11  ;;  %v6826_v17 = vshrl.u32 %v13269_v24, 16 }
 0x4d0   :  { %v7210_v8 = vrot.slane %v7186_v52, %v11278_v6  ;;  %v13370_v34 = vpack.i.b16 %v7105_v5, %v7344_v2  ;;  %v9687_v36 = vcombine.low %v13359_v28, %v13333_v1  ;;  %v6828_v35 = vshll.u32 %v13269_v24, 16 }
 0x4d1   :  { %v7196_v38 = vrot.slane %v7187_v26, %v11278_v6  ;;  %v7487_v50 = vrot.slane %v9686_v12, %v11278_v6  ;;  %v6838_v31 = vor.u32 %v6837_v14, %v6833_v9  ;;  %v6845_v11 = vor.u32 %v6844_v45, %v6840_v48 }
 0x4d2   :  { %v7477_v37 = vcombine.low %v13361_v27, %v13370_v34  ;;  %v7501_v59 = vrot.slane %v9687_v36, %v11278_v6  ;;  %v6830_v57 = vrot.slane %v6828_v35, 1  ;;  %v6876_v49 = vrot.slane %v13276_v7, 1 }
 0x4d3   :  { %v7218_v21 = vcombine.low %v7196_v38, %v7210_v8  ;;  %v6877_v3 = vrot.slane %v13280_v53, 1  ;;  %v7188_v42 = vcombine.high %v13194_v55, %v7179_v58  ;;  %v7189_v47 = vcombine.high %v7186_v52, %v7186_v52 }
 0x4d4   :  { %v7515_v15 = vrot.slane %v7477_v37, %v11278_v6  ;;  %v7537_v9 = vcombine.low %v7487_v50, %v7501_v59  ;;  %v7538_v14 = vcombine.high %v7487_v50, %v7501_v59  ;;  %v6831_v4 = vor.u32 %v6830_v57, %v6826_v17 }
 0x4d5   :  { %v13388_v48 = vpack.i.b16 %v7218_v21, %v7162_v29  ;;  %v7203_v45 = vrot.slane %v7188_v42, %v11278_v6  ;;  %v7217_v25 = vrot.slane %v7189_v47, %v11278_v6  ;;  %v7222_v7 = vcombine.low %v6874_v62, %v6875_v56  ;;  %v10421_v47 = vld [vmem:[#allocation15 + $0xc8] sm:$0xff]  }
 0x4d6   :  { %v13397_v53 = vrot.slane %v7538_v14, %v11278_v6  ;;  %v13400_v55 = vrot.slane %v7537_v9, %v11278_v6  ;;  %v7221_v22 = vcombine.low %v6824_v0, %v6831_v4  ;;  %v7229_v20 = vrot.slane %v9675_v61, %v11278_v6 }
 0x4d7   :  { %v9688_v18 = vcombine.low %v13346_v19, %v13388_v48  ;;  %v7219_v40 = vcombine.low %v7203_v45, %v7217_v25  ;;  %v7243_v24 = vrot.slane %v7222_v7, %v11278_v6  ;;  %v7278_v13 = vcombine.low %v6838_v31, %v6845_v11 }
 0x4d8   :  { %v7236_v62 = vrot.slane %v7221_v22, %v11278_v6  ;;  %v7279_v56 = vcombine.low %v6876_v49, %v6877_v3  ;;  %v7286_v5 = vrot.slane %v9676_v43, %v11278_v6  ;;  %v7350_v29 = vunpack.i.h.s16 %v7218_v21  ;;  %v10420_v21 = vld [vmem:[#allocation15 + $0x80] sm:$0xff]  }
 0x4d9   :  { %v7529_v58 = vrot.slane %v9688_v18, %v11278_v6  ;;  %v7246_v54 = vcombine.high %v7243_v24, %v7243_v24  ;;  %v7293_v10 = vrot.slane %v7278_v13, %v11278_v6  ;;  %v6925_v61 = vrot.slane %v13221_v63, %v11278_v6  ;;  %v10422_v18 = vld [vmem:[#allocation15 + $0x88] sm:$0xff]  }
 0x4da   :  { %v7244_v32 = vcombine.low %v7229_v20, %v7236_v62  ;;  %v7245_v52 = vcombine.high %v7229_v20, %v7236_v62  ;;  %v7300_v2 = vrot.slane %v7279_v56, %v11278_v6  ;;  %v9683_v26 = vpack.i.b16 %v7219_v40, %v7350_v29 }
 0x4db   :  { %v7541_v12 = vcombine.low %v7515_v15, %v7529_v58  ;;  %v7542_v0 = vcombine.high %v7515_v15, %v7529_v58  ;;  %v7274_v17 = vrot.slane %v7246_v54, %v11278_v6  ;;  %v7301_v41 = vcombine.low %v7286_v5, %v7293_v10 }
 0x4dc   :  { %v7253_v46 = vrot.slane %v7244_v32, %v11278_v6  ;;  %v7260_v43 = vrot.slane %v7245_v52, %v11278_v6  ;;  %v7302_v8 = vcombine.high %v7286_v5, %v7293_v10  ;;  %v7303_v36 = vcombine.high %v7300_v2, %v7300_v2 }
 0x4dd   :  { %v13423_v35 = vrot.slane %v7542_v0, %v11278_v6  ;;  %v13426_v63 = vrot.slane %v7541_v12, %v11278_v6  ;;  %v7310_v38 = vrot.slane %v7301_v41, %v11278_v6  ;;  %v7324_v50 = vrot.slane %v7300_v2, %v11278_v6 }
 0x4de   :  { %v7276_v31 = vcombine.low %v7260_v43, %v7274_v17  ;;  %v7317_v11 = vrot.slane %v7302_v8, %v11278_v6  ;;  %v7331_v37 = vrot.slane %v7303_v36, %v11278_v6  ;;  %v9689_v59 = vcombine.low %v9683_v26, %v7253_v46  ;;  %v10426_v43 = vld [vmem:[#allocation15 + $0x98] sm:$0xff]   ;;  %v10427_v8 = vld [vmem:[#allocation15 + $0xe0] sm:$0xff]  }
 0x4df   :  { %v7604_v57 = vcombine.low %v13397_v53, %v13423_v35  ;;  %v7601_v49 = vcombine.low %v13400_v55, %v13426_v63  ;;  %v7332_v3 = vcombine.low %v7310_v38, %v7324_v50  ;;  %v7605_v42 = vcombine.high %v13397_v53, %v13423_v35 }
 0x4e0   :  { %v7333_v15 = vcombine.low %v7317_v11, %v7331_v37  ;;  %v7602_v9 = vcombine.high %v13400_v55, %v13426_v63  ;;  %v6933_v14 = vcombine.low %v13258_v44, %v6925_v61  ;;  %v7039_v25 = vrot.slane %v13305_v23, %v11278_v6  ;;  %v10423_v23 = vld [vmem:[#allocation15 + $0xd0] sm:$0xff]   ;;  %v10428_v37 = vld [vmem:[#allocation15 + $0xa0] sm:$0xff]   ;;  %v10445_v55 = vld [vmem:[#allocation15 + $0x168] sm:$0xff]  }
 0x4e1   :  { %8005 = vmatprep.mubr.bf16.mxu1 %v7604_v57  ;;  %v7356_v4 = vunpack.i.h.s16 %v7332_v3  ;;  %v9684_v45 = vpack.i.b16 %v7332_v3, %v7276_v31  ;;  %v7153_v7 = vrot.slane %v13324_v33, %v11278_v6  ;;  %v7478_v53 = vcombine.high %v13361_v27, %v13370_v34  ;;  %v10430_v57 = vld [vmem:[#allocation15 + $0xa8] sm:$0xff]   ;;  %v10433_v3 = vld [vmem:[#allocation15 + $0xf8] sm:$0xff]  }
 0x4e2   :  { %8006 = vmatmul.mubr.bf16.vlgmr.msra.gmra.mrb[80].mxu1 %v7601_v49  ;;  %v7474_v22 = vcombine.high %v6933_v14, %v13355_v39  ;;  %v7267_v20 = vrot.slane %v7243_v24, %v11278_v6  ;;  %v7047_v40 = vcombine.low %v13333_v1, %v7039_v25  ;;  %v7617_v27 = vrot.slane %v9689_v59, %v11278_v6  ;;  %v10424_v1 = vld [vmem:[#allocation15 + $0x90] sm:$0xff]   ;;  %v10429_v59 = vld [vmem:[#allocation15 + $0xe8] sm:$0xff]   ;;  %v10436_v14 = vld [vmem:[#allocation15 + $0x100] sm:$0xff]  }
 0x4e3   :  { %9834 = vmatpush3.bf16.msra.mxu1 %v10420_v21  ;;  %v9685_v44 = vpack.i.b16 %v7333_v15, %v7356_v4  ;;  %v7161_v13 = vcombine.low %v13346_v19, %v7153_v7  ;;  %v10431_v49 = vld [vmem:[#allocation15 + $0xf0] sm:$0xff]   ;;  %v10435_v15 = vld [vmem:[#allocation15 + $0x140] sm:$0xff]   ;;  %v10446_v63 = vld [vmem:[#allocation15 + $0x128] sm:$0xff]  }
 0x4e4   :  { %9835 = vmatprep.subr.bf16.mxu1 %v10421_v47  ;;  %v7275_v62 = vcombine.low %v7253_v46, %v7267_v20  ;;  %v7476_v33 = vcombine.high %v13359_v28, %v7047_v40  ;;  %v7494_v34 = vrot.slane %v7474_v22, %v11278_v6  ;;  %v10425_v28 = vld [vmem:[#allocation15 + $0xd8] sm:$0xff]   ;;  %v10432_v21 = vld [vmem:[#allocation15 + $0xb0] sm:$0xff]  }
 0x4e5   :  { %v7609_v56 = vcombine.low %v9684_v45, %v9685_v44  ;;  %v7480_v39 = vcombine.high %v7161_v13, %v13388_v48  ;;  %v7610_v5 = vcombine.high %v9684_v45, %v9685_v44  ;;  %v7522_v48 = vrot.slane %v7478_v53, %v11278_v6  ;;  %v10434_v47 = vld [vmem:[#allocation15 + $0xb8] sm:$0xff]   ;;  %v10438_v45 = vld [vmem:[#allocation15 + $0x108] sm:$0xff]   ;;  %v10439_v25 = vld [vmem:[#allocation15 + $0x150] sm:$0xff]  }
 0x4e6   :  { %v7608_v24 = vcombine.high %v9683_v26, %v7275_v62  ;;  %v7508_v19 = vrot.slane %v7476_v33, %v11278_v6  ;;  %v10440_v7 = vld [vmem:[#allocation15 + $0x110] sm:$0xff]   ;;  %v10441_v53 = vld [vmem:[#allocation15 + $0x158] sm:$0xff]   ;;  %v10444_v44 = vld [vmem:[#allocation15 + $0x120] sm:$0xff]  }
 0x4e7   :  { %9836 = vmatpush3.bf16.msra.mxu1 %v10422_v18  ;;  %v7631_v29 = vrot.slane %v7609_v56, %v11278_v6  ;;  %v7536_v58 = vrot.slane %v7480_v39, %v11278_v6  ;;  %v13459_v54 = vrot.slane %v7610_v5, %v11278_v6  ;;  %v10442_v20 = vld [vmem:[#allocation15 + $0x118] sm:$0xff]   ;;  %v10443_v18 = vld [vmem:[#allocation15 + $0x160] sm:$0xff]   ;;  %v10448_v40 = vld [vmem:[#allocation15 + $0x130] sm:$0xff]  }
 0x4e8   :  { %9837 = vmatprep.subr.bf16.mxu1 %v10423_v23  ;;  %v13463_v10 = vrot.slane %v7608_v24, %v11278_v6  ;;  %v7539_v52 = vcombine.low %v7494_v34, %v7508_v19  ;;  %v7540_v2 = vcombine.high %v7494_v34, %v7508_v19  ;;  %v10449_v13 = vld [vmem:[#allocation15 + $0x178] sm:$0xff]   ;;  %v8532_v23 = vld [vmem:[#allocation18] sm:$0xff]  ;;  %v8533_v62 = vld [vmem:[#allocation18 + $0x8] sm:$0xff] }
 0x4e9   :  { %v7640_v61 = vcombine.high %v7617_v27, %v7631_v29  ;;  %v7639_v32 = vcombine.low %v7617_v27, %v7631_v29  ;;  %v7543_v26 = vcombine.low %v7522_v48, %v7536_v58  ;;  %v7544_v12 = vcombine.high %v7522_v48, %v7536_v58  ;;  %v10450_v56 = vld [vmem:[#allocation15 + $0x138] sm:$0xff]   ;;  %v8529_v34 = vld [vmem:[#allocation4 + $0x8] sm:$0xff] }
 0x4ea   :  { %v7642_v0 = vcombine.high %v13463_v10, %v13459_v54  ;;  %v7641_v17 = vcombine.low %v13463_v10, %v13459_v54  ;;  %v7572_v36 = vrot.slane %v7540_v2, %v11278_v6  ;;  %v13474_v38 = vrot.slane %v7539_v52, %v11278_v6  ;;  %v8528_v27 = vld [vmem:[#allocation4] sm:$0xff] }
 0x4eb   :  { %v7663_v41 = vrot.slane %v7640_v61, %v11278_v6  ;;  %v7649_v46 = vrot.slane %v7639_v32, %v11278_v6  ;;  %9838 = vmatpush3.bf16.msra.mxu1 %v10424_v1  ;;  %v7600_v35 = vrot.slane %v7544_v12, %v11278_v6  ;;  %v13477_v50 = vrot.slane %v7543_v26, %v11278_v6  ;;  %v9677_v10 = vld [vmem:[#allocation16] ss:$0 sm:$0xff] }
 0x4ec   :  { %9839 = vmatprep.subr.bf16.mxu1 %v10425_v28  ;;  %v10160_v33 = vpack.c.bf16 %v8533_v62, %v8532_v23  ;;  %v7670_v39 = vrot.slane %v7642_v0, %v11278_v6  ;;  %v7656_v5 = vrot.slane %v7641_v17, %v11278_v6 }
 0x4ed   :  { %8013 = vmatprep.mubr.bf16.mxu1 %v7663_v41  ;;  %v7606_v31 = vcombine.low %v7572_v36, %v7600_v35  ;;  %v7603_v11 = vcombine.low %v13474_v38, %v13477_v50  ;;  %v7672_v4 = vcombine.high %v7663_v41, %v7663_v41  ;;  %v7671_v22 = vcombine.high %v7649_v46, %v7649_v46 }
 0x4ee   :  { %8014 = vmatmul.mubr.bf16.gmra.mrb[84].mxu1 %v7649_v46 }
 0x4ef   :  { %8053 = vmatprep.mubr.bf16.mxu1 %v7605_v42  ;;  %9840 = vmatpush3.bf16.msra.mxu1 %v10426_v43  ;;  %v10437_v42 = vld [vmem:[#allocation15 + $0x148] sm:$0xff]  }
 0x4f0   :  { %9841 = vmatprep.subr.bf16.mxu1 %v10427_v8 }
 0x4f3   :  { %9842 = vmatpush3.bf16.msra.mxu1 %v10428_v37 }
 0x4f4   :  { %9843 = vmatprep.subr.bf16.mxu1 %v10429_v59 }
 0x4f7   :  { %9844 = vmatpush3.bf16.msra.mxu1 %v10430_v57 }
 0x4f8   :  { %9845 = vmatprep.subr.bf16.mxu1 %v10431_v49 }
 0x4fb   :  { %9846 = vmatpush3.bf16.msra.mxu1 %v10432_v21  ;;  %v13495_v21 = vld [vmem:[#allocation19] sm:$0xff] }
 0x4fc   :  { %9847 = vmatprep.subr.bf16.mxu1 %v10433_v3 }
 0x4ff   :  { %9848 = vmatpush3.bf16.msra.mxu1 %v10434_v47 }
 0x500   :  { %9861 = vmatprep.subr.bf16.mxu1 %v10435_v15 }
 0x502   :  { %8054 = vmatmul.mubr.bf16.vlgmr.msra.gmra.mrb[88].mxu1 %v7602_v9  ;;  %v10447_v9 = vld [vmem:[#allocation15 + $0x170] sm:$0xff]  }
 0x503   :  { %8061 = vmatprep.mubr.bf16.mxu1 %v7672_v4  ;;  %9862 = vmatpush3.bf16.msra.mxu1 %v10436_v14  ;;  %v13500_v4 = vrot.slane %v13495_v21, %v5066_v60 }
 0x504   :  { %9863 = vmatprep.subr.bf16.mxu1 %v10437_v42 }
 0x507   :  { %9864 = vmatpush3.bf16.msra.mxu1 %v10438_v45  ;;  %v13505_v45 = vrot.slane %v13495_v21, %v5070_v16 }
 0x508   :  { %9865 = vmatprep.subr.bf16.mxu1 %v10439_v25 }
 0x509   :  { %v13514_v60 = vmul.f32 0.0, %v13505_v45 }
 0x50a   :  { %8062 = vmatmul.mubr.bf16.gmra.mrb[92].mxu1 %v7671_v22  ;;  %v8660_v22 = vsub.s32 2, %v13993_v30 }
 0x50b   :  { %9866 = vmatpush3.bf16.msra.mxu1 %v10440_v7  ;;  %8101 = vmatprep.mubr.bf16.mxu1 %v7606_v31 }
 0x50c   :  { %9867 = vmatprep.subr.bf16.mxu1 %v10441_v53  ;;  %v8666_v53 = vsub.s32 3, %v13993_v30 }
 0x50f   :  { %9868 = vmatpush3.bf16.msra.mxu1 %v10442_v20 }
 0x510   :  { %9869 = vmatprep.subr.bf16.mxu1 %v10443_v18 }
 0x513   :  { %9870 = vmatpush3.bf16.msra.mxu1 %v10444_v44 }
 0x514   :  { %9871 = vmatprep.subr.bf16.mxu1 %v10445_v55 }
 0x517   :  { %9872 = vmatpush3.bf16.msra.mxu1 %v10446_v63  ;;  %v13511_v63 = vmul.f32 0.0, %v13500_v4 }
 0x518   :  { %9873 = vmatprep.subr.bf16.mxu1 %v10447_v9 }
 0x51b   :  { %9874 = vmatpush3.bf16.msra.mxu1 %v10448_v40 }
 0x51c   :  { %9875 = vmatprep.subr.bf16.mxu1 %v10449_v13 }
 0x51f   :  { %9876 = vmatpush3.bf16.msra.mxu1 %v10450_v56 }
 0x520   :  { %10161 = vmatprep.subr.bf16.mxu1 %v10160_v33 }
 0x522   :  { %8102 = vmatmul.mubr.bf16.vlgmr.msra.gmra.mrb[96].mxu1 %v7603_v11 }
 0x523   :  { %8109 = vmatprep.mubr.bf16.mxu1 %v7670_v39  ;;  %10163 = vmatpush3.bf16.msra.mxu1 %v10160_v33 }
 0x524   :  { %10107 = vmatprep.subr.mxu1 %v13884_v51 }
 0x52a   :  { %8110 = vmatmul.mubr.bf16.gmra.mrb[100].mxu1 %v7656_v5  ;;  %v13520_v5 = vrot.slane %v13495_v21, %v8660_v22 }
 0x52b   :  { %10101 = vmatprep.mubr.msk.f32.mxu1 %vm8541_vm3, %v8528_v27  ;;  %v13523_v27 = vrot.slane %v13495_v21, %v8666_v53 }
 0x532   :  { %10102 = vmatmul.mubr.msk.f32.vlgmr.msra.gmra.mrb[104].mxu1 %vm8541_vm3, %v8529_v34 }
 0x5b5   :  { %v9821_v24 = vpop.f32.mrb[80].mxu1 }
 0x5b6   :  { %v9822_v29 = vpop.f32.mrb[81].mxu1 }
 0x5b7   :  { %v9823_v1 = vadd.f32 %v9822_v29, %v9821_v24  ;;  %v9824_v19 = vpop.f32.mrb[82].mxu1 }
 0x5b8   :  { %v9825_v58 = vpop.f32.mrb[83].mxu1 }
 0x5b9   :  { %v9826_v28 = vadd.f32 %v9825_v58, %v9824_v19  ;;  %v8008_v12 = vadd.f32 %v9823_v1, %v9677_v10 }
 0x5bb   :  { %v8011_v46 = vadd.f32 %v9826_v28, %v9677_v10 }
 0x5c1   :  { %v9827_v48 = vpop.f32.mrb[84].mxu1 }
 0x5c2   :  { %v9828_v61 = vpop.f32.mrb[85].mxu1 }
 0x5c3   :  { %v9829_v32 = vadd.f32 %v9828_v61, %v9827_v48  ;;  %v9830_v52 = vpop.f32.mrb[86].mxu1 }
 0x5c4   :  { %v9831_v54 = vpop.f32.mrb[87].mxu1 }
 0x5c5   :  { %v8016_v50 = vadd.f32 %v9829_v32, %v9677_v10 }
 0x5d5   :  { %v9849_v2 = vpop.f32.mrb[88].mxu1 }
 0x5d6   :  { %v9850_v26 = vpop.f32.mrb[89].mxu1 }
 0x5d7   :  { %v9851_v0 = vadd.f32 %v9850_v26, %v9849_v2  ;;  %v9852_v17 = vpop.f32.mrb[90].mxu1 }
 0x5d8   :  { %v9853_v41 = vpop.f32.mrb[91].mxu1 }
 0x5d9   :  { %v8056_v43 = vadd.f32 %v9851_v0, %v8008_v12  ;;  %v9854_v8 = vadd.f32 %v9853_v41, %v9852_v17 }
 0x5db   :  { %v8059_v36 = vadd.f32 %v9854_v8, %v8011_v46 }
 0x5dd   :  { %v9855_v35 = vpop.f32.mrb[92].mxu1 }
 0x5de   :  { %v9856_v38 = vpop.f32.mrb[93].mxu1 }
 0x5df   :  { %v9857_v31 = vadd.f32 %v9856_v38, %v9855_v35  ;;  %v9858_v11 = vpop.f32.mrb[94].mxu1 }
 0x5e0   :  { %v9859_v37 = vpop.f32.mrb[95].mxu1 }
 0x5e1   :  { %v8064_v59 = vadd.f32 %v9857_v31, %v8016_v50 }
 0x5f5   :  { %v9877_v57 = vpop.f32.mrb[96].mxu1 }
 0x5f6   :  { %v9878_v49 = vpop.f32.mrb[97].mxu1 }
 0x5f7   :  { %v9879_v3 = vadd.f32 %v9878_v49, %v9877_v57  ;;  %v9880_v47 = vpop.f32.mrb[98].mxu1 }
 0x5f8   :  { %v9881_v15 = vpop.f32.mrb[99].mxu1 }
 0x5f9   :  { %v8104_v14 = vadd.f32 %v9879_v3, %v8056_v43  ;;  %v9882_v42 = vadd.f32 %v9881_v15, %v9880_v47 }
 0x5fb   :  { %v8117_v25 = vmax.f32 %v8104_v14, 0.0  ;;  %v8107_v7 = vadd.f32 %v9882_v42, %v8059_v36 }
 0x5fd   :  { %v8123_v20 = vcombine.high %v8117_v25, %v8117_v25  ;;  %v8130_v18 = vrot.slane %v8117_v25, %v11278_v6  ;;  %v8118_v44 = vmax.f32 %v8107_v7, 0.0  ;;  %v9883_v55 = vpop.f32.mrb[100].mxu1 }
 0x5fe   :  { %v9884_v9 = vpop.f32.mrb[101].mxu1 }
 0x5ff   :  { %v8137_v16 = vrot.slane %v8123_v20, %v11278_v6  ;;  %v8138_v40 = vcombine.high %v8130_v18, %v8130_v18  ;;  %v8146_v13 = vrot.slane %v8130_v18, %v11278_v6  ;;  %v8172_v23 = vcombine.high %v8118_v44, %v8118_v44  ;;  %v9886_v62 = vpop.f32.mrb[102].mxu1 }
 0x600   :  { %v8179_v56 = vrot.slane %v8118_v44, %v11278_v6  ;;  %v9885_v33 = vadd.f32 %v9884_v9, %v9883_v55  ;;  %v9887_v39 = vpop.f32.mrb[103].mxu1 }
 0x601   :  { %v8139_v34 = vcombine.high %v8137_v16, %v8137_v16  ;;  %v8153_v24 = vrot.slane %v8137_v16, %v11278_v6  ;;  %v8160_v29 = vrot.slane %v8138_v40, %v11278_v6  ;;  %v8168_v1 = vcombine.high %v8146_v13, %v8146_v13 }
 0x602   :  { %v8186_v19 = vrot.slane %v8172_v23, %v11278_v6  ;;  %v8187_v58 = vcombine.high %v8179_v56, %v8179_v56  ;;  %v8195_v28 = vrot.slane %v8179_v56, %v11278_v6  ;;  %v8112_v48 = vadd.f32 %v9885_v33, %v8064_v59 }
 0x603   :  { %v8167_v61 = vrot.slane %v8139_v34, %v11278_v6  ;;  %v8170_v32 = vcombine.high %v8160_v29, %v8160_v29  ;;  %v8270_v52 = vcombine.low %v8146_v13, %v8160_v29  ;;  %v8284_v54 = vrot.slane %v8168_v1, %v11278_v6 }
 0x604   :  { %v8188_v10 = vcombine.high %v8186_v19, %v8186_v19  ;;  %v8202_v2 = vrot.slane %v8186_v19, %v11278_v6  ;;  %v8209_v26 = vrot.slane %v8187_v58, %v11278_v6  ;;  %v8217_v12 = vcombine.high %v8195_v28, %v8195_v28 }
 0x605   :  { %v8277_v0 = vrot.slane %v8270_v52, %v11278_v6  ;;  %v8293_v17 = vcombine.low %v8170_v32, %v8153_v24  ;;  %v8307_v41 = vrot.slane %v8167_v61, %v11278_v6  ;;  %v9738_v46 = vcombine.high %v8153_v24, %v8167_v61  ;;  %v13535_v43 = vpop.f32.mrb[104].mxu1 }
 0x606   :  { %v8216_v8 = vrot.slane %v8188_v10, %v11278_v6  ;;  %v8218_v36 = vcombine.high %v8202_v2, %v8202_v2  ;;  %v8219_v35 = vcombine.high %v8209_v26, %v8209_v26  ;;  %v8330_v38 = vrot.slane %v8195_v28, %v11278_v6  ;;  %v13539_v50 = vpop.f32.mrb[105].mxu1 }
 0x607   :  { %v8285_v31 = vcombine.low %v8277_v0, %v8284_v54  ;;  %v8300_v11 = vrot.slane %v8293_v17, %v11278_v6  ;;  %v8323_v37 = vrot.slane %v9738_v46, %v11278_v6  ;;  %v8339_v59 = vcombine.low %v8209_v26, %v8217_v12 }
 0x608   :  { %v8353_v57 = vrot.slane %v8219_v35, %v11278_v6  ;;  %v8362_v49 = vcombine.low %v8202_v2, %v8216_v8  ;;  %v8376_v3 = vrot.slane %v8218_v36, %v11278_v6  ;;  %v8119_v47 = vmax.f32 %v8112_v48, 0.0 }
 0x609   :  { %v8292_v15 = vrot.slane %v8285_v31, %v11278_v6  ;;  %v8308_v14 = vcombine.low %v8300_v11, %v8307_v41  ;;  %v8331_v42 = vcombine.low %v8323_v37, %v8330_v38  ;;  %v8346_v25 = vrot.slane %v8339_v59, %v11278_v6 }
 0x60a   :  { %v8369_v7 = vrot.slane %v8362_v49, %v11278_v6  ;;  %v8220_v22 = vcombine.high %v8216_v8, %v8216_v8  ;;  %v8221_v53 = vcombine.high %v8119_v47, %v8119_v47  ;;  %v8228_v20 = vrot.slane %v8119_v47, %v11278_v6 }
 0x60b   :  { %v8315_v18 = vrot.slane %v8308_v14, %v11278_v6  ;;  %v8463_v44 = vsel %vm8462_vm4, %v8292_v15, 0.0  ;;  %v8338_v55 = vrot.slane %v8331_v42, %v11278_v6  ;;  %v8354_v9 = vcombine.low %v8346_v25, %v8353_v57  ;;  %v13565_v57 = vld [vmem:[#allocation21] ss:$0 sm:$0xff] }
 0x60c   :  { %v8464_v16 = vrot.slane %v8463_v44, 4  ;;  %v8377_v40 = vcombine.low %v8369_v7, %v8376_v3  ;;  %v8235_v13 = vrot.slane %v8221_v53, %v11278_v6  ;;  %v8236_v23 = vcombine.high %v8228_v20, %v8228_v20 }
 0x60d   :  { %v8470_v62 = vsel %vm8462_vm4, %v8315_v18, 0.0  ;;  %v8361_v56 = vrot.slane %v8354_v9, %v11278_v6  ;;  %v8477_v33 = vsel %vm8462_vm4, %v8338_v55, 0.0  ;;  %v8244_v39 = vrot.slane %v8228_v20, %v11278_v6 }
 0x60e   :  { %v8465_v34 = vadd.f32 %v8464_v16, %v8463_v44  ;;  %v8471_v24 = vrot.slane %v8470_v62, 4  ;;  %v8384_v29 = vrot.slane %v8377_v40, %v11278_v6  ;;  %v8478_v1 = vrot.slane %v8477_v33, 4 }
 0x60f   :  { %v8484_v19 = vsel %vm8462_vm4, %v8361_v56, 0.0  ;;  %v8237_v58 = vcombine.high %v8235_v13, %v8235_v13  ;;  %v8251_v28 = vrot.slane %v8235_v13, %v11278_v6  ;;  %v8258_v48 = vrot.slane %v8236_v23, %v11278_v6 }
 0x610   :  { %v8466_v61 = vrot.slane %v8465_v34, 2  ;;  %v8472_v32 = vadd.f32 %v8471_v24, %v8470_v62  ;;  %v8479_v52 = vadd.f32 %v8478_v1, %v8477_v33  ;;  %v8485_v54 = vrot.slane %v8484_v19, 4 }
 0x611   :  { %v8491_v10 = vsel %vm8462_vm4, %v8384_v29, 0.0  ;;  %v8265_v2 = vrot.slane %v8237_v58, %v11278_v6  ;;  %v8267_v26 = vcombine.high %v8251_v28, %v8251_v28  ;;  %v8385_v12 = vcombine.low %v8220_v22, %v8244_v39 }
 0x612   :  { %v8467_v0 = vadd.f32 %v8466_v61, %v8465_v34  ;;  %v8473_v17 = vrot.slane %v8472_v32, 2  ;;  %v8480_v41 = vrot.slane %v8479_v52, 2  ;;  %v8486_v46 = vadd.f32 %v8485_v54, %v8484_v19 }
 0x613   :  { %v8492_v8 = vrot.slane %v8491_v10, 4  ;;  %v8269_v36 = vcombine.high %v8265_v2, %v8265_v2  ;;  %v8392_v35 = vrot.slane %v8385_v12, %v11278_v6  ;;  %v8399_v38 = vrot.slane %v8258_v48, %v11278_v6 }
 0x614   :  { %v8468_v31 = vrot.slane %v8467_v0, 1  ;;  %v8474_v11 = vadd.f32 %v8473_v17, %v8472_v32  ;;  %v8481_v37 = vadd.f32 %v8480_v41, %v8479_v52  ;;  %v8487_v59 = vrot.slane %v8486_v46, 2 }
 0x615   :  { %v8493_v49 = vadd.f32 %v8492_v8, %v8491_v10  ;;  %v8400_v3 = vcombine.low %v8392_v35, %v8399_v38  ;;  %v9739_v47 = vcombine.high %v8244_v39, %v8258_v48  ;;  %v8422_v15 = vrot.slane %v8251_v28, %v11278_v6 }
 0x616   :  { %v8469_v14 = vadd.f32 %v8468_v31, %v8467_v0  ;;  %v8475_v42 = vrot.slane %v8474_v11, 1  ;;  %v8482_v25 = vrot.slane %v8481_v37, 1  ;;  %v8431_v7 = vcombine.low %v8265_v2, %v8267_v26 }
 0x617   :  { %v8407_v22 = vrot.slane %v8400_v3, %v11278_v6  ;;  %v8415_v53 = vrot.slane %v9739_v47, %v11278_v6  ;;  %v8445_v20 = vrot.slane %v8269_v36, %v11278_v6  ;;  %v8626_v18 = vadd.f32 %v13535_v43, %v13565_v57 }
 0x618   :  { %v8476_v44 = vadd.f32 %v8475_v42, %v8474_v11  ;;  %v8483_v55 = vadd.f32 %v8482_v25, %v8481_v37  ;;  %v8438_v9 = vrot.slane %v8431_v7, %v11278_v6  ;;  %v8621_v13 = vadd.f32 %v13565_v57, %v13539_v50 }
 0x619   :  { %v8423_v16 = vcombine.low %v8415_v53, %v8422_v15  ;;  %v8498_v40 = vsel %vm8462_vm4, %v8407_v22, 0.0  ;;  %8641 = vst.msk [vmem:[#allocation2 + $0x8] sm:$0xff] %vm8639_vm5, %v8626_v18  ;;  %v8488_v23 = vadd.f32 %v8487_v59, %v8486_v46  ;;  %v8520_v62 = vmul.f32 0.33333334, %v8469_v14 }
 0x61a   :  { %v8446_v56 = vcombine.low %v8438_v9, %v8445_v20  ;;  %v8499_v33 = vrot.slane %v8498_v40, 4  ;;  %v8494_v39 = vrot.slane %v8493_v49, 2  ;;  %v8522_v34 = vmul.f32 0.33333334, %v8483_v55  ;;  %8640 = vst.msk [vmem:[#allocation2] sm:$0xff] %vm8639_vm5, %v8621_v13 }
 0x61b   :  { %v8430_v43 = vrot.slane %v8423_v16, %v11278_v6  ;;  %v8489_v24 = vrot.slane %v8488_v23, 1  ;;  %v8521_v29 = vmul.f32 0.33333334, %v8476_v44  ;;  %v8672_v10 = vsub.s32 4, %v13993_v30 }
 0x61c   :  { %v8500_v1 = vadd.f32 %v8499_v33, %v8498_v40  ;;  %v8453_v19 = vrot.slane %v8446_v56, %v11278_v6  ;;  %v8495_v58 = vadd.f32 %v8494_v39, %v8493_v49  ;;  %v8678_v6 = vsub.s32 5, %v13993_v30 }
 0x61d   :  { %v8505_v28 = vsel %vm8462_vm4, %v8430_v43, 0.0  ;;  %v8490_v50 = vadd.f32 %v8489_v24, %v8488_v23  ;;  %v9229_v48 = vsel %vm9228_vm6, %v8521_v29, %v8520_v62  ;;  %v8662_v46 = vmul.f32 0.0, %v13520_v5 }
 0x61e   :  { %v8506_v61 = vrot.slane %v8505_v28, 4  ;;  %v8496_v32 = vrot.slane %v8495_v58, 1  ;;  %v8501_v52 = vrot.slane %v8500_v1, 2  ;;  %v8512_v54 = vsel %vm8462_vm4, %v8453_v19, 0.0 }
 0x61f   :  { %v8513_v2 = vrot.slane %v8512_v54, 4  ;;  %v8523_v26 = vmul.f32 0.33333334, %v8490_v50  ;;  %v9231_v12 = vsel %vm9230_vm7, %v8522_v34, %v9229_v48  ;;  %v8668_v38 = vmul.f32 0.0, %v13523_v27 }
 0x620   :  { %v8497_v0 = vadd.f32 %v8496_v32, %v8495_v58  ;;  %v8502_v17 = vadd.f32 %v8501_v52, %v8500_v1  ;;  %v8507_v41 = vadd.f32 %v8506_v61, %v8505_v28  ;;  %v13590_v49 = vrot.slane %v13495_v21, %v8672_v10 }
 0x621   :  { %v8514_v8 = vadd.f32 %v8513_v2, %v8512_v54  ;;  %v9233_v36 = vsel %vm9232_vm8, %v8523_v26, %v9231_v12  ;;  %v8645_v35 = vld [vmem:[#allocation2] sm:$0xff]  ;;  %v8684_v3 = vsub.s32 6, %v13993_v30  ;;  %v13594_v15 = vrot.slane %v13495_v21, %v8678_v6 }
 0x622   :  { %v8503_v31 = vrot.slane %v8502_v17, 1  ;;  %v8508_v11 = vrot.slane %v8507_v41, 2  ;;  %v8524_v37 = vmul.f32 0.33333334, %v8497_v0  ;;  %v8651_v59 = vadd.f32 %v13511_v63, %v8645_v35 }
 0x623   :  { %v8515_v47 = vrot.slane %v8514_v8, 2  ;;  %v8690_v22 = vsub.s32 7, %v13993_v30  ;;  %v8674_v44 = vmul.f32 0.0, %v13590_v49  ;;  %v13600_v55 = vrot.slane %v13495_v21, %v8684_v3 }
 0x624   :  { %v8504_v14 = vadd.f32 %v8503_v31, %v8502_v17  ;;  %v8509_v42 = vadd.f32 %v8508_v11, %v8507_v41  ;;  %v9235_v25 = vsel %vm9234_vm9, %v8524_v37, %v9233_v36  ;;  %v8657_v7 = vadd.f32 %v13514_v60, %v8651_v59  ;;  %v8724_v37 = vld [vmem:[#allocation2 + $0x8] sm:$0xff] }
 0x625   :  { %v8516_v53 = vadd.f32 %v8515_v47, %v8514_v8  ;;  %v8680_v16 = vmul.f32 0.0, %v13594_v15  ;;  %v13604_v60 = vrot.slane %v13495_v21, %v8690_v22  ;;  %v8686_v33 = vmul.f32 0.0, %v13600_v55 }
 0x626   :  { %v8510_v20 = vrot.slane %v8509_v42, 1  ;;  %v8525_v63 = vmul.f32 0.33333334, %v8504_v14  ;;  %v8663_v18 = vadd.f32 %v8662_v46, %v8657_v7  ;;  %v10943_v2 = vmov 17  }
 0x627   :  { %v8517_v9 = vrot.slane %v8516_v53, 1  ;;  %v8692_v24 = vmul.f32 0.0, %v13604_v60  ;;  %10260 = vset.pattern.permute.xlu0 %v10943_v2  ;;  %v10944_v26 = vmov 16   ;;  %v10945_v17 = vmov 20  }
 0x628   :  { %v8511_v40 = vadd.f32 %v8510_v20, %v8509_v42  ;;  %v9237_v13 = vsel %vm9236_vm10, %v8525_v63, %v9235_v25  ;;  %v8669_v23 = vadd.f32 %v8668_v38, %v8663_v18  ;;  %10259 = vset.pattern.permute.xlu1 %v10944_v26  ;;  %v10946_v41 = vmov 18  }
 0x629   :  { %v8518_v30 = vadd.f32 %v8517_v9, %v8516_v53  ;;  %v10947_v46 = vmov 23   ;;  %v10948_v8 = vmov 19   ;;  %v10949_v36 = vmov 21  }
 0x62a   :  { %v8526_v62 = vmul.f32 0.33333334, %v8511_v40  ;;  %v8675_v56 = vadd.f32 %v8674_v44, %v8669_v23  ;;  %v10950_v35 = vmov 22  }
 0x62b   :  { %v8527_v39 = vmul.f32 0.33333334, %v8518_v30 }
 0x62c   :  { %v9239_v34 = vsel %vm9238_vm11, %v8526_v62, %v9237_v13  ;;  %v8681_v43 = vadd.f32 %v8680_v16, %v8675_v56 }
 0x62d   :  { %v13608_v29 = vsel %vm9240_vm12, %v8527_v39, %v9239_v34 }
 0x62e   :  { %v8687_v1 = vadd.f32 %v8686_v33, %v8681_v43 }
 0x630   :  { %v8693_v19 = vadd.f32 %v8692_v24, %v8687_v1 }
 0x632   :  { %10451 = vtanh.f32 %v8693_v19  ;;  %v9745_v21 = vmul.f32 -1.442695, %v8693_v19 }
 0x634   :  { %10453 = vpow2.f32 %v9745_v21  ;;  %v8531_v21 = vld [vmem:[#allocation4 + $0x18] sm:$0xff] }
 0x63c   :  { %v10452_v58 = vpop.eup %10451 }
 0x63d   :  { %8703 = vrot.lane.b32.xlu0 %v10452_v58, %s10942_s22  ;;  %v8530_v58 = vld [vmem:[#allocation4 + $0x10] sm:$0xff] }
 0x63e   :  { %v10454_v28 = vpop.eup %10453  ;;  %10104 = vmatprep.mubr.msk.f32.mxu1 %vm8541_vm3, %v8530_v58 }
 0x63f   :  { %v8697_v50 = vadd.f32 1.0, %v10454_v28  ;;  %10105 = vmatmul.mubr.msk.f32.gmra.mrb[106].mxu1 %vm8541_vm3, %v8531_v21 }
 0x640   :  { %10109 = vmatprep.mubr.msk.f32.mxu1 %vm10939_vm0, %v13884_v51 }
 0x641   :  { %10455 = vrcp.f32 %v8697_v50 }
 0x64b   :  { %v10456_v48 = vpop.eup %10455 }
 0x64c   :  { %v8701_v52 = vmul.f32 0.0, %v10456_v48 }
 0x6af   :  { %v8704_v61 = vpop.permute.xlu0 %8703 }
 0x6b0   :  { %v8706_v32 = vmul.f32 %v10456_v48, %v8704_v61 }
 0x6b2   :  { %8708 = vrot.lane.b32.xlu0 %v8706_v32, %s10929_s7 }
 0x712   :  { %v10106_v32 = vpop.f32.mrb[106].mxu1 }
 0x724   :  { %v8709_v54 = vpop.permute.xlu0 %8708 }
 0x725   :  { %v13612_v10 = vadd.f32 %v8709_v54, %v8701_v52  ;;  %v8636_v52 = vadd.f32 %v10106_v32, %v13565_v57  ;;  %v8630_v54 = vpop.f32.mrb[107].mxu1 }
 0x727   :  { %10457 = vtanh.f32 %v13612_v10  ;;  %8643 = vst.msk [vmem:[#allocation2 + $0x18] sm:$0xff] %vm8639_vm5, %v8636_v52 }
 0x731   :  { %v10458_v12 = vpop.eup %10457 }
 0x732   :  { %8714 = vrot.lane.b32.xlu1 %v10458_v12, %s10929_s7  ;;  %v8631_v12 = vadd.f32 %v13565_v57, %v8630_v54 }
 0x734   :  { %8642 = vst.msk [vmem:[#allocation2 + $0x10] sm:$0xff] %vm8639_vm5, %v8631_v12 }
 0x73b   :  { %v8804_v57 = vld [vmem:[#allocation2 + $0x10] sm:$0xff] }
 0x7a4   :  { %v8715_v6 = vpop.permute.xlu1 %8714 }
 0x7a5   :  { %v13618_v0 = vmul.f32 %v10456_v48, %v8715_v6 }
 0x7a7   :  { %8732 = vperm.xlu0 %10260, %v13618_v0   ;;  %8726 = vperm.xlu1 %10259, %v13618_v0  }
 0x7ab   :  { %10263 = vset.pattern.permute.xlu0 %v10945_v17  ;;  %10261 = vset.pattern.permute.xlu1 %v10946_v41 }
 0x7ac   :  { %8750 = vperm.xlu0 %10263, %v13618_v0   ;;  %8738 = vperm.xlu1 %10261, %v13618_v0  }
 0x7b0   :  { %10266 = vset.pattern.permute.xlu0 %v10947_v46  ;;  %10262 = vset.pattern.permute.xlu1 %v10948_v8 }
 0x7b1   :  { %8768 = vperm.xlu0 %10266, %v13618_v0   ;;  %8744 = vperm.xlu1 %10262, %v13618_v0  }
 0x7b5   :  { %10264 = vset.pattern.permute.xlu1 %v10949_v36  ;;  %10268 = vset.pattern.permute.xlu0 %v10943_v2 }
 0x7b6   :  { %8756 = vperm.xlu1 %10264, %v13618_v0  }
 0x7ba   :  { %10265 = vset.pattern.permute.xlu1 %v10950_v35 }
 0x7bb   :  { %8762 = vperm.xlu1 %10265, %v13618_v0  }
 0x7bf   :  { %10267 = vset.pattern.permute.xlu1 %v10944_v26 }
 0x826   :  { %v8727_v38 = vpop.permute.xlu1 %8726  ;;  %v8733_v11 = vpop.permute.xlu0 %8732 }
 0x827   :  { %v8729_v31 = vmul.f32 %v8727_v38, %v13500_v4  ;;  %v8735_v3 = vmul.f32 %v8733_v11, %v13505_v45 }
 0x829   :  { %v8730_v59 = vadd.f32 %v8729_v31, %v8724_v37 }
 0x82b   :  { %v8739_v47 = vpop.permute.xlu1 %8738  ;;  %v8736_v14 = vadd.f32 %v8735_v3, %v8730_v59  ;;  %v8751_v53 = vpop.permute.xlu0 %8750 }
 0x82c   :  { %v8741_v42 = vmul.f32 %v8739_v47, %v13520_v5  ;;  %v8753_v63 = vmul.f32 %v8751_v53, %v13590_v49 }
 0x82e   :  { %v8742_v7 = vadd.f32 %v8741_v42, %v8736_v14 }
 0x830   :  { %v8745_v25 = vpop.permute.xlu1 %8744  ;;  %v8769_v16 = vpop.permute.xlu0 %8768 }
 0x831   :  { %v8747_v22 = vmul.f32 %v8745_v25, %v13523_v27  ;;  %v8771_v30 = vmul.f32 %v8769_v16, %v13604_v60 }
 0x833   :  { %v8748_v20 = vadd.f32 %v8747_v22, %v8742_v7 }
 0x835   :  { %v8757_v18 = vpop.permute.xlu1 %8756  ;;  %v8754_v44 = vadd.f32 %v8753_v63, %v8748_v20 }
 0x836   :  { %v8759_v9 = vmul.f32 %v8757_v18, %v13594_v15 }
 0x838   :  { %v8760_v13 = vadd.f32 %v8759_v9, %v8754_v44 }
 0x83a   :  { %v8763_v40 = vpop.permute.xlu1 %8762 }
 0x83b   :  { %v8765_v23 = vmul.f32 %v8763_v40, %v13600_v55 }
 0x83d   :  { %v8766_v62 = vadd.f32 %v8765_v23, %v8760_v13 }
 0x83f   :  { %v8772_v56 = vadd.f32 %v8771_v30, %v8766_v62 }
 0x841   :  { %10459 = vtanh.f32 %v8772_v56  ;;  %v9746_v39 = vmul.f32 -1.442695, %v8772_v56 }
 0x843   :  { %10461 = vpow2.f32 %v9746_v39 }
 0x84b   :  { %v10460_v33 = vpop.eup %10459 }
 0x84c   :  { %8782 = vrot.lane.b32.xlu1 %v10460_v33, %s10942_s22 }
 0x84d   :  { %v10462_v34 = vpop.eup %10461 }
 0x84e   :  { %v8776_v43 = vadd.f32 1.0, %v10462_v34 }
 0x850   :  { %10463 = vrcp.f32 %v8776_v43 }
 0x85a   :  { %v10464_v24 = vpop.eup %10463 }
 0x85b   :  { %v8780_v28 = vmul.f32 %v10464_v24, %v13612_v10 }
 0x8be   :  { %v8783_v1 = vpop.permute.xlu1 %8782 }
 0x8bf   :  { %v8785_v19 = vmul.f32 %v10464_v24, %v8783_v1 }
 0x8c1   :  { %8787 = vrot.lane.b32.xlu1 %v8785_v19, %s10929_s7 }
 0x933   :  { %v8788_v50 = vpop.permute.xlu1 %8787 }
 0x934   :  { %v13651_v48 = vadd.f32 %v8788_v50, %v8780_v28 }
 0x936   :  { %10465 = vtanh.f32 %v13651_v48 }
 0x940   :  { %v10466_v61 = vpop.eup %10465 }
 0x941   :  { %8793 = vrot.lane.b32.xlu0 %v10466_v61, %s10929_s7  ;;  %v8884_v61 = vld [vmem:[#allocation2 + $0x18] sm:$0xff] }
 0x9b3   :  { %v8794_v6 = vpop.permute.xlu0 %8793 }
 0x9b4   :  { %v13659_v10 = vmul.f32 %v10464_v24, %v8794_v6 }
 0x9b6   :  { %8812 = vperm.xlu0 %10268, %v13659_v10   ;;  %8806 = vperm.xlu1 %10267, %v13659_v10  }
 0x9ba   :  { %10271 = vset.pattern.permute.xlu0 %v10945_v17  ;;  %10269 = vset.pattern.permute.xlu1 %v10946_v41 }
 0x9bb   :  { %8830 = vperm.xlu0 %10271, %v13659_v10   ;;  %8818 = vperm.xlu1 %10269, %v13659_v10  }
 0x9bf   :  { %10274 = vset.pattern.permute.xlu0 %v10947_v46  ;;  %10270 = vset.pattern.permute.xlu1 %v10948_v8 }
 0x9c0   :  { %8848 = vperm.xlu0 %10274, %v13659_v10   ;;  %8824 = vperm.xlu1 %10270, %v13659_v10  }
 0x9c4   :  { %10272 = vset.pattern.permute.xlu1 %v10949_v36  ;;  %10276 = vset.pattern.permute.xlu0 %v10943_v2 }
 0x9c5   :  { %8836 = vperm.xlu1 %10272, %v13659_v10  }
 0x9c9   :  { %10273 = vset.pattern.permute.xlu1 %v10950_v35 }
 0x9ca   :  { %8842 = vperm.xlu1 %10273, %v13659_v10  }
 0x9ce   :  { %10275 = vset.pattern.permute.xlu1 %v10944_v26 }
 0xa35   :  { %v8807_v38 = vpop.permute.xlu1 %8806  ;;  %v8813_v11 = vpop.permute.xlu0 %8812 }
 0xa36   :  { %v8809_v31 = vmul.f32 %v8807_v38, %v13500_v4  ;;  %v8815_v59 = vmul.f32 %v8813_v11, %v13505_v45 }
 0xa38   :  { %v8810_v37 = vadd.f32 %v8809_v31, %v8804_v57 }
 0xa3a   :  { %v8819_v3 = vpop.permute.xlu1 %8818  ;;  %v8816_v47 = vadd.f32 %v8815_v59, %v8810_v37  ;;  %v8831_v7 = vpop.permute.xlu0 %8830 }
 0xa3b   :  { %v8821_v2 = vmul.f32 %v8819_v3, %v13520_v5  ;;  %v8833_v26 = vmul.f32 %v8831_v7, %v13590_v49 }
 0xa3d   :  { %v8822_v42 = vadd.f32 %v8821_v2, %v8816_v47 }
 0xa3f   :  { %v8825_v14 = vpop.permute.xlu1 %8824  ;;  %v8849_v18 = vpop.permute.xlu0 %8848 }
 0xa40   :  { %v8827_v25 = vmul.f32 %v8825_v14, %v13523_v27  ;;  %v8851_v40 = vmul.f32 %v8849_v18, %v13604_v60 }
 0xa42   :  { %v8828_v22 = vadd.f32 %v8827_v25, %v8822_v42 }
 0xa44   :  { %v8837_v53 = vpop.permute.xlu1 %8836  ;;  %v8834_v20 = vadd.f32 %v8833_v26, %v8828_v22  ;;  %v8967_v26 = vld [vmem:[#allocation22] sm:$0xff] }
 0xa45   :  { %v8839_v63 = vmul.f32 %v8837_v53, %v13594_v15  ;;  %10108 = vmatpush3.msra.mxu1 %v8967_v26 }
 0xa47   :  { %v8840_v9 = vadd.f32 %v8839_v63, %v8834_v20  ;;  %v9040_v63 = vld [vmem:[#allocation24] sm:$0xff] }
 0xa48   :  { %10112 = vmatprep.subr.mxu1 %v9040_v63 }
 0xa49   :  { %v8843_v44 = vpop.permute.xlu1 %8842 }
 0xa4a   :  { %v8845_v16 = vmul.f32 %v8843_v44, %v13600_v55 }
 0xa4c   :  { %v8846_v13 = vadd.f32 %v8845_v16, %v8840_v9  ;;  %v9204_v9 = vld [vmem:[#allocation28] sm:$0xff]  ;;  %v9205_v16 = vld [vmem:[#allocation28 + $0x8] sm:$0xff] }
 0xa4e   :  { %v8852_v23 = vadd.f32 %v8851_v40, %v8846_v13 }
 0xa50   :  { %10467 = vtanh.f32 %v8852_v23  ;;  %v9747_v62 = vmul.f32 -1.442695, %v8852_v23  ;;  %v10952_v23 = vmov 0.0|0.0  }
 0xa52   :  { %10469 = vpow2.f32 %v9747_v62  ;;  %v9207_v62 = vld [vmem:[#allocation28 + $0x18] sm:$0xff] }
 0xa5a   :  { %v10468_v30 = vpop.eup %10467 }
 0xa5b   :  { %8862 = vrot.lane.b32.xlu1 %v10468_v30, %s10942_s22  ;;  %v9206_v30 = vld [vmem:[#allocation28 + $0x10] sm:$0xff] }
 0xa5c   :  { %v10470_v56 = vpop.eup %10469 }
 0xa5d   :  { %v8856_v33 = vadd.f32 1.0, %v10470_v56 }
 0xa5f   :  { %10471 = vrcp.f32 %v8856_v33 }
 0xa69   :  { %v10472_v39 = vpop.eup %10471 }
 0xa6a   :  { %v8860_v24 = vmul.f32 %v10472_v39, %v13651_v48 }
 0xacd   :  { %v8863_v34 = vpop.permute.xlu1 %8862 }
 0xace   :  { %v8865_v43 = vmul.f32 %v10472_v39, %v8863_v34  ;;  %v9208_v34 = vld [vmem:[#allocation28 + $0x20] sm:$0xff] }
 0xad0   :  { %8867 = vrot.lane.b32.xlu1 %v8865_v43, %s10929_s7  ;;  %v9209_v43 = vld [vmem:[#allocation28 + $0x28] sm:$0xff] }
 0xb42   :  { %v8868_v1 = vpop.permute.xlu1 %8867 }
 0xb43   :  { %v8870_v19 = vadd.f32 %v8868_v1, %v8860_v24  ;;  %v10171_v1 = vpack.c.bf16 %v9209_v43, %v9208_v34 }
 0xb45   :  { %10473 = vtanh.f32 %v8870_v19 }
 0xb4f   :  { %v10474_v58 = vpop.eup %10473 }
 0xb50   :  { %8873 = vrot.lane.b32.xlu0 %v10474_v58, %s10929_s7  ;;  %v9211_v58 = vld [vmem:[#allocation28 + $0x38] sm:$0xff] }
 0xbc2   :  { %v8874_v21 = vpop.permute.xlu0 %8873 }
 0xbc3   :  { %v8876_v28 = vmul.f32 %v10472_v39, %v8874_v21  ;;  %v10168_v39 = vpack.c.bf16 %v9207_v62, %v9206_v30 }
 0xbc5   :  { %8892 = vperm.xlu0 %10276, %v8876_v28   ;;  %8886 = vperm.xlu1 %10275, %v8876_v28  }
 0xbc9   :  { %10279 = vset.pattern.permute.xlu0 %v10945_v17  ;;  %10277 = vset.pattern.permute.xlu1 %v10946_v41 }
 0xbca   :  { %8910 = vperm.xlu0 %10279, %v8876_v28   ;;  %8898 = vperm.xlu1 %10277, %v8876_v28  }
 0xbce   :  { %10282 = vset.pattern.permute.xlu0 %v10947_v46  ;;  %10278 = vset.pattern.permute.xlu1 %v10948_v8 }
 0xbcf   :  { %8928 = vperm.xlu0 %10282, %v8876_v28   ;;  %8904 = vperm.xlu1 %10278, %v8876_v28  }
 0xbd3   :  { %10280 = vset.pattern.permute.xlu1 %v10949_v36 }
 0xbd4   :  { %8916 = vperm.xlu1 %10280, %v8876_v28  }
 0xbd8   :  { %10281 = vset.pattern.permute.xlu1 %v10950_v35 }
 0xbd9   :  { %8922 = vperm.xlu1 %10281, %v8876_v28  }
 0xc44   :  { %v8887_v50 = vpop.permute.xlu1 %8886  ;;  %v8893_v17 = vpop.permute.xlu0 %8892 }
 0xc45   :  { %v8889_v48 = vmul.f32 %v8887_v50, %v13500_v4  ;;  %v8895_v32 = vmul.f32 %v8893_v17, %v13505_v45  ;;  %v9213_v50 = vld [vmem:[#allocation28 + $0x48] sm:$0xff]  ;;  %v9214_v17 = vld [vmem:[#allocation28 + $0x50] sm:$0xff] }
 0xc47   :  { %v8890_v41 = vadd.f32 %v8889_v48, %v8884_v61  ;;  %v9215_v61 = vld [vmem:[#allocation28 + $0x58] sm:$0xff] }
 0xc49   :  { %v8899_v52 = vpop.permute.xlu1 %8898  ;;  %v8896_v46 = vadd.f32 %v8895_v32, %v8890_v41  ;;  %v8911_v6 = vpop.permute.xlu0 %8910  ;;  %v10180_v41 = vpack.c.bf16 %v9215_v61, %v9214_v17  ;;  %v9216_v32 = vld [vmem:[#allocation28 + $0x60] sm:$0xff] }
 0xc4a   :  { %v8901_v8 = vmul.f32 %v8899_v52, %v13520_v5  ;;  %v8913_v35 = vmul.f32 %v8911_v6, %v13590_v49  ;;  %v9217_v52 = vld [vmem:[#allocation28 + $0x68] sm:$0xff] }
 0xc4c   :  { %v8902_v12 = vadd.f32 %v8901_v8, %v8896_v46  ;;  %v10183_v46 = vpack.c.bf16 %v9217_v52, %v9216_v32  ;;  %v9218_v8 = vld [vmem:[#allocation28 + $0x70] sm:$0xff] }
 0xc4e   :  { %v8905_v54 = vpop.permute.xlu1 %8904  ;;  %v8929_v11 = vpop.permute.xlu0 %8928 }
 0xc4f   :  { %v8907_v36 = vmul.f32 %v8905_v54, %v13523_v27  ;;  %v8931_v3 = vmul.f32 %v8929_v11, %v13604_v60  ;;  %v9219_v54 = vld [vmem:[#allocation28 + $0x78] sm:$0xff] }
 0xc51   :  { %v8908_v57 = vadd.f32 %v8907_v36, %v8902_v12  ;;  %v10186_v12 = vpack.c.bf16 %v9219_v54, %v9218_v8 }
 0xc53   :  { %v8917_v38 = vpop.permute.xlu1 %8916  ;;  %v8914_v31 = vadd.f32 %v8913_v35, %v8908_v57 }
 0xc54   :  { %v8919_v4 = vmul.f32 %v8917_v38, %v13594_v15 }
 0xc56   :  { %v8920_v59 = vadd.f32 %v8919_v4, %v8914_v31 }
 0xc58   :  { %v8923_v37 = vpop.permute.xlu1 %8922 }
 0xc59   :  { %v8925_v45 = vmul.f32 %v8923_v37, %v13600_v55 }
 0xc5b   :  { %v8926_v5 = vadd.f32 %v8925_v45, %v8920_v59  ;;  %v9754_v45 = vld [vmem:[#allocation25] ss:$0 sm:$0xff] }
 0xc5d   :  { %v8932_v47 = vadd.f32 %v8931_v3, %v8926_v5 }
 0xc5f   :  { %10475 = vtanh.f32 %v8932_v47  ;;  %v9748_v27 = vmul.f32 -1.442695, %v8932_v47 }
 0xc61   :  { %10477 = vpow2.f32 %v9748_v27 }
 0xc69   :  { %v10476_v2 = vpop.eup %10475 }
 0xc6a   :  { %8942 = vrot.lane.b32.xlu1 %v10476_v2, %s10942_s22 }
 0xc6b   :  { %v10478_v49 = vpop.eup %10477 }
 0xc6c   :  { %v8936_v14 = vadd.f32 1.0, %v10478_v49 }
 0xc6e   :  { %10479 = vrcp.f32 %v8936_v14 }
 0xc78   :  { %v10480_v42 = vpop.eup %10479 }
 0xc79   :  { %v8940_v55 = vmul.f32 %v10480_v42, %v8870_v19  ;;  %v9210_v19 = vld [vmem:[#allocation28 + $0x30] sm:$0xff] }
 0xc7a   :  { %v10174_v21 = vpack.c.bf16 %v9211_v58, %v9210_v19 }
 0xcdc   :  { %v8943_v15 = vpop.permute.xlu1 %8942 }
 0xcdd   :  { %v8945_v25 = vmul.f32 %v10480_v42, %v8943_v15 }
 0xcdf   :  { %8947 = vrot.lane.b32.xlu1 %v8945_v25, %s10929_s7 }
 0xce3   :  { %8719 = vrot.lane.b32.xlu1 %v13618_v0, %s10951_s24 }
 0xce7   :  { %8878 = vrot.lane.b32.xlu1 %v8876_v28, %s10951_s24  ;;  %v9212_v28 = vld [vmem:[#allocation28 + $0x40] sm:$0xff] }
 0xce8   :  { %v10177_v48 = vpack.c.bf16 %v9213_v50, %v9212_v28 }
 0xd51   :  { %v8948_v60 = vpop.permute.xlu1 %8947 }
 0xd52   :  { %v8950_v7 = vadd.f32 %v8948_v60, %v8940_v55 }
 0xd54   :  { %10481 = vtanh.f32 %v8950_v7  ;;  %v9203_v7 = vld [vmem:[#allocation27] sm:$0xff] }
 0xd55   :  { %v8720_v22 = vpop.permute.xlu1 %8719 }
 0xd56   :  { %8722 = vst.msk [vmem:[#allocation3] sm:$0xff] %vm943_vm2, %v8720_v22 }
 0xd59   :  { %v8879_v53 = vpop.permute.xlu1 %8878 }
 0xd5a   :  { %8882 = vst.msk [vmem:[#allocation3 + $0x10] sm:$0xff] %vm943_vm2, %v8879_v53 }
 0xd5d   :  { %v13713_v13 = vld [vmem:[#allocation3] sm:$0xff] }
 0xd5e   :  { %v10482_v20 = vpop.eup %10481 }
 0xd5f   :  { %8953 = vrot.lane.b32.xlu0 %v10482_v20, %s10929_s7  ;;  %s10953_s7 = smov [#allocation31]  }
 0xd60   :  { %s9401_s10 = sshll.u32 %s10953_s7, 4  ;;  %s9402_s10 = int_to_ptr.vmem [resolvable:$true] %s9401_s10 }
 0xd61   :  { %v13721_v33 = vld [vmem:[#allocation3 + $0x10] sm:$0xff]  ;;  %s10875_s2 = scalar_lea.vmem %s9402_s10, 128  ;;  %p10880_p11 = scmp.lt.s32.totalorder %s9402_s10, %s9402_s10 }
 0xd62   :  { %p10876_p10 = scmp.ne.s32.totalorder %s9402_s10, %s10875_s2  ;;  %p10881_p12 = scmp.lt.s32.totalorder %s10875_s2, %s10875_s2 }
 0xd63   :  { %8798 = vrot.lane.b32.xlu0 %v13659_v10, %s10951_s24  ;;  %v10165_v10 = vpack.c.bf16 %v9205_v16, %v9204_v9 }
 0xd64   :  { %p10882_p13 = por %p10881_p12, %p10880_p11 }
 0xd66   :  { %p10883_p0 = pnand %p10882_p13, %p10876_p10 }
 0xdd1   :  { %v8954_v0 = vpop.permute.xlu0 %8953 }
 0xdd2   :  { %v8956_v18 = vmul.f32 %v10480_v42, %v8954_v0 }
 0xdd4   :  { %8958 = vrot.lane.b32.xlu0 %v8956_v18, %s10951_s24 }
 0xdd5   :  { %v8799_v44 = vpop.permute.xlu0 %8798 }
 0xdd6   :  { %8802 = vst.msk [vmem:[#allocation3 + $0x8] sm:$0xff] %vm943_vm2, %v8799_v44 }
 0xddd   :  { %v13717_v56 = vld [vmem:[#allocation3 + $0x8] sm:$0xff] }
 0xe46   :  { %v8959_v40 = vpop.permute.xlu0 %8958 }
 0xe47   :  { %8962 = vst.msk [vmem:[#allocation3 + $0x18] sm:$0xff] %vm943_vm2, %v8959_v40  ;;  %10110 = vmatmul.mubr.msk.f32.vlgmr.msra.gmra.mrb[108].mxu1 %vm943_vm2, %v8959_v40 }
 0xe48   :  { %10113 = vmatpush3.msra.mxu1 %v9040_v63  ;;  %10114 = vmatprep.mubr.msk.f32.mxu1 %vm943_vm2, %v13713_v13 }
 0xe49   :  { %10164 = vmatprep.subr.bf16.mxu1 %v10952_v23 }
 0xe4b   :  { %10115 = vmatmul.mubr.msk.f32.vlgmr.msra.gmra.mrb[110].mxu1 %vm943_vm2, %v13717_v56 }
 0xe4c   :  { %10166 = vmatpush3.bf16.msra.mxu1 %v10165_v10  ;;  %10117 = vmatprep.mubr.msk.f32.mxu1 %vm943_vm2, %v13721_v33 }
 0xe4d   :  { %10167 = vmatprep.subr.bf16.mxu1 %v10952_v23 }
 0xe4e   :  { %v13725_v24 = vld [vmem:[#allocation3 + $0x18] sm:$0xff] }
 0xe4f   :  { %10118 = vmatmul.mubr.msk.f32.gmra.mrb[112].mxu1 %vm943_vm2, %v13725_v24 }
 0xe50   :  { %10169 = vmatpush3.bf16.msra.mxu1 %v10168_v39  ;;  %10152 = vmatprep.mubr.msk.f32.mxu1 %vm10939_vm0, %v13884_v51 }
 0xe51   :  { %10170 = vmatprep.subr.bf16.mxu1 %v10952_v23 }
 0xe54   :  { %10172 = vmatpush3.bf16.msra.mxu1 %v10171_v1 }
 0xe55   :  { %10173 = vmatprep.subr.bf16.mxu1 %v10952_v23 }
 0xe58   :  { %10175 = vmatpush3.bf16.msra.mxu1 %v10174_v21 }
 0xe59   :  { %10176 = vmatprep.subr.bf16.mxu1 %v10952_v23 }
 0xe5c   :  { %10178 = vmatpush3.bf16.msra.mxu1 %v10177_v48 }
 0xe5d   :  { %10179 = vmatprep.subr.bf16.mxu1 %v10952_v23 }
 0xe60   :  { %10181 = vmatpush3.bf16.msra.mxu1 %v10180_v41 }
 0xe61   :  { %10182 = vmatprep.subr.bf16.mxu1 %v10952_v23 }
 0xe64   :  { %10184 = vmatpush3.bf16.msra.mxu1 %v10183_v46 }
 0xe65   :  { %10185 = vmatprep.subr.bf16.mxu1 %v10952_v23 }
 0xe68   :  { %10187 = vmatpush3.bf16.msra.mxu1 %v10186_v12 }
 0xe69   :  { %10155 = vmatprep.subr.mxu1 %v13884_v51 }
 0xe6b   :  { %10153 = vmatmul.mubr.f32.vlgmr.msra.gmra.mrb[114].mxu1 %v13608_v29 }
 0xe6c   :  { %10157 = vmatprep.mubr.msk.f32.mxu1 %vm10939_vm0, %v13884_v51  ;;  %10156 = vmatpush3.msra.mxu1 %v9203_v7 }
 0xf1a   :  { %v9036_v36 = vpop.f32.mrb[108].mxu1 }
 0xf1b   :  { %v10111_v6 = vpop.f32.mrb[109].mxu1 }
 0xf1e   :  { %v10116_v57 = vpop.f32.mrb[110].mxu1 }
 0xf1f   :  { %v9139_v35 = vadd.f32 %v10116_v57, %v9036_v36  ;;  %v9119_v38 = vpop.f32.mrb[111].mxu1 }
 0xf20   :  { %v9138_v31 = vadd.f32 %v9119_v38, %v9036_v36  ;;  %v9756_v38 = vld [vmem:[#allocation30] ss:$0 sm:$0xff] }
 0xf21   :  { %10483 = vtanh.f32 %v9139_v35 }
 0xf22   :  { %10485 = vtanh.f32 %v9138_v31  ;;  %v10119_v4 = vpop.f32.mrb[112].mxu1 }
 0xf23   :  { %v9141_v11 = vadd.f32 %v10119_v4, %v9036_v36  ;;  %v9129_v37 = vpop.f32.mrb[113].mxu1 }
 0xf24   :  { %v9140_v59 = vadd.f32 %v9129_v37, %v9036_v36 }
 0xf25   :  { %10487 = vtanh.f32 %v9141_v11 }
 0xf26   :  { %10489 = vtanh.f32 %v9140_v59 }
 0xf2b   :  { %v10484_v3 = vpop.eup %10483 }
 0xf2c   :  { %v10486_v29 = vpop.eup %10485  ;;  %v9154_v5 = vmul.f32 %v10484_v3, %v9754_v45 }
 0xf2d   :  { %v9153_v47 = vmul.f32 %v10486_v29, %v9754_v45 }
 0xf2e   :  { %v9160_v51 = vsel %vm943_vm2, %v9154_v5, 0.0 }
 0xf2f   :  { %v10488_v2 = vpop.eup %10487  ;;  %9161 = vadd.xlane.f32.xlu0 %v9160_v51  ;;  %v9157_v27 = vsel %vm943_vm2, %v9153_v47, 0.0 }
 0xf30   :  { %v10490_v49 = vpop.eup %10489  ;;  %9158 = vadd.xlane.f32.xlu1 %v9157_v27  ;;  %v9156_v14 = vmul.f32 %v10488_v2, %v9754_v45 }
 0xf31   :  { %v9155_v42 = vmul.f32 %v10490_v49, %v9754_v45 }
 0xf32   :  { %v9166_v15 = vsel %vm943_vm2, %v9156_v14, 0.0 }
 0xf33   :  { %v9163_v25 = vsel %vm943_vm2, %v9155_v42, 0.0 }
 0xf34   :  { %9167 = vadd.xlane.f32.xlu1 %v9166_v15  ;;  %9164 = vadd.xlane.f32.xlu0 %v9163_v25 }
 0xf3e   :  { %v9309_v55 = vpop.f32.mrb[114].mxu1 }
 0xf3f   :  { %v10154_v60 = vpop.f32.mrb[115].mxu1 }
 0xfbc   :  { %v9162_v22 = vpop.xlane.xlu0 %9161 }
 0xfbd   :  { %v9159_v26 = vpop.xlane.xlu1 %9158 }
 0xfbe   :  { %v9169_v63 = vmax.f32 %v9159_v26, %v9162_v22 }
 0xfc1   :  { %v9168_v53 = vpop.xlane.xlu1 %9167  ;;  %v9165_v20 = vpop.xlane.xlu0 %9164 }
 0xfc2   :  { %v9170_v0 = vmax.f32 %v9165_v20, %v9168_v53 }
 0xfc4   :  { %v9171_v18 = vmax.f32 %v9169_v63, %v9170_v0 }
 0xfc6   :  { %v9172_v44 = vsub.f32 %v9159_v26, %v9171_v18  ;;  %v9173_v9 = vsub.f32 %v9162_v22, %v9171_v18  ;;  %v9174_v16 = vsub.f32 %v9165_v20, %v9171_v18  ;;  %v9175_v40 = vsub.f32 %v9168_v53, %v9171_v18 }
 0xfc8   :  { %v9176_v10 = vmul.f32 1.442695, %v9172_v44  ;;  %v9178_v23 = vmul.f32 1.442695, %v9173_v9  ;;  %v9180_v30 = vmul.f32 1.442695, %v9174_v16 }
 0xfc9   :  { %v9182_v62 = vmul.f32 1.442695, %v9175_v40 }
 0xfca   :  { %10491 = vpow2.f32 %v9176_v10 }
 0xfcb   :  { %10493 = vpow2.f32 %v9178_v23 }
 0xfcc   :  { %10495 = vpow2.f32 %v9180_v30 }
 0xfcd   :  { %10497 = vpow2.f32 %v9182_v62 }
 0xfd4   :  { %v10492_v39 = vpop.eup %10491 }
 0xfd5   :  { %v10494_v34 = vpop.eup %10493 }
 0xfd6   :  { %v9184_v43 = vadd.f32 %v10494_v34, %v10492_v39  ;;  %v10496_v1 = vpop.eup %10495 }
 0xfd7   :  { %v10498_v58 = vpop.eup %10497 }
 0xfd8   :  { %v9185_v19 = vadd.f32 %v10496_v1, %v9184_v43 }
 0xfda   :  { %v9186_v21 = vadd.f32 %v10498_v58, %v9185_v19 }
 0xfdc   :  { %10499 = vrcp.f32 %v9186_v21 }
 0xfe6   :  { %v10500_v28 = vpop.eup %10499 }
 0xfe7   :  { %v9190_v50 = vmul.f32 %v10500_v28, %v10496_v1  ;;  %v9188_v48 = vmul.f32 %v10500_v28, %v10492_v39  ;;  %v9189_v17 = vmul.f32 %v10500_v28, %v10494_v34  ;;  %v9191_v61 = vmul.f32 %v10500_v28, %v10498_v58 }
 0xfe9   :  { %v9194_v41 = vmul.f32 %v9190_v50, %v13721_v33  ;;  %v9192_v32 = vmul.f32 %v9188_v48, %v13713_v13  ;;  %v9193_v52 = vmul.f32 %v9189_v17, %v13717_v56  ;;  %v9195_v46 = vmul.f32 %v9191_v61, %v13725_v24 }
 0xfeb   :  { %v9196_v8 = vsel %vm943_vm2, %v9192_v32, 0.0  ;;  %v9197_v54 = vsel %vm943_vm2, %v9193_v52, 0.0  ;;  %v9199_v36 = vsel %vm943_vm2, %v9194_v41, 0.0  ;;  %v9201_v57 = vsel %vm943_vm2, %v9195_v46, 0.0 }
 0xfec   :  { %v9198_v12 = vadd.f32 %v9197_v54, %v9196_v8 }
 0xfee   :  { %v9200_v6 = vadd.f32 %v9199_v36, %v9198_v12 }
 0xff0   :  { %v9202_v35 = vadd.f32 %v9201_v57, %v9200_v6 }
 0xff2   :  { %10158 = vmatmul.mubr.msk.f32.vlgmr.msra.gmra.mrb[116].mxu1 %vm943_vm2, %v9202_v35 }
0x10c5   :  { %v9382_v33 = vpop.f32.mrb[116].mxu1 }
0x10c6   :  { %v9383_v13 = vadd.f32 %v9382_v33, %v9309_v55  ;;  %v10159_v56 = vpop.f32.mrb[117].mxu1 }
0x10c8   :  { %v9393_v24 = vadd.f32 %v9756_v38, %v9383_v13 }
0x10ca   :  { %9394 = vst [vmem:[#allocation31] sm:$0xff] %v9393_v24 }
0x10cb   :  { %10886 = shalt.err (!%p10883_p0)
}
0x10cc   :  { %s13994_s20 = sld [smem:[#allocation86_spill]] }
0x10d2   :  { %s10887_s21 = scalar_lea.hbm %s13994_s20, 128 }
0x10d3   :  { %p10888_p1 = scmp.ne.s32.totalorder %s13994_s20, %s10887_s21  ;;  %p10891_p2 = scmp.lt.u32.totalorder %s10887_s21, %s13994_s20 }
0x10d5   :  { %p10893_p3 = pnand %p10891_p2, %p10888_p1 }
0x10d7   :  { %10896 = shalt.err (!%p10893_p3)
}
0x10d8   :  { %9404 = dma.vmem_to_hbm [thread:$0]  %s9402_s10, 128, %s13994_s20, [#allocation6]  }
0x10d9   :  { %10915 = dma.done.wait [#allocation6], 128  }
0x10da   :  { %10916 = vsyncadd [#allocation6], 4294967168 }
0x10db   :  { %9408 = vsyncpa [#allocation5], 1 }
0x10dc   :  { %9409 = vsyncpa [#allocation8], 1 }
0x10dd   :  { %9410 = vsyncpa [#allocation11], 1 }
0x10de   :  { %9411 = vsyncpa [#allocation14], 1 }
0x10df   :  { %9412 = vsyncpa [#allocation17], 1 }
0x10e0   :  { %9413 = vsyncpa [#allocation20], 1 }
0x10e1   :  { %9414 = vsyncpa [#allocation23], 1 }
0x10e2   :  { %9415 = vsyncpa [#allocation26], 1 }
0x10e3   :  { %9416 = vsyncpa [#allocation29], 1 }
0x10e4   :  { %9417 = vsyncpa [#allocation6], 1 }

</bundles_post_ra>
